<compile_context>
chip_gen: v7x
topology: tpu7x:2x2x1
jax: 0.10.0
libtpu: 0.0.40
codegen_flags: <defaults>
</compile_context>

<pallas_src>
import functools

import jax
import jax.numpy as jnp
import numpy as np
from jax.experimental import pallas as pl
from jax.experimental.pallas import tpu as pltpu

EPS = 1e-5
VMEM_LIMIT = 64 * 1024 * 1024  # explicit scoped-VMEM budget (fits v5e/v6e/v7x)


def _tile_m(M):
    """Largest row tile that divides M; prefer >=2 grid steps (v7x: 2 TCs)."""
    for t in (512, 256, 128, 64, 32, 16, 8):
        if M % t == 0 and M // t >= 2:
            return t
    for t in (512, 256, 128, 64, 32, 16, 8):
        if M % t == 0:
            return t
    return M  # tiny / irregular M: full-array block is always legal


def _strip_rows(ho):
    """Output-row strip size for the 3x3 kernel (must divide Ho)."""
    for t in (8, 4, 2):
        if ho % t == 0:
            return t
    return 1


def _compiler_params(sem):
    return pltpu.CompilerParams(dimension_semantics=sem,
                                vmem_limit_bytes=VMEM_LIMIT)


# ----------------------------------------------------------------------------
# Kernels
# ----------------------------------------------------------------------------
def _mm_stats_kernel(a_ref, w_ref, y_ref, ps_ref, pq_ref):
    # 1x1 conv as matmul, BN batch statistics fused into the epilogue.
    y = jnp.dot(a_ref[...], w_ref[...], preferred_element_type=jnp.float32)
    y_ref[...] = y
    c = y.shape[1]
    ps_ref[...] = jnp.sum(y, axis=0).reshape(1, 1, c)
    pq_ref[...] = jnp.sum(y * y, axis=0).reshape(1, 1, c)


def _conv3x3_stats_kernel(ap_ref, w_ref, y_ref, ps_ref, pq_ref, *, th):
    # In-VMEM 3x3 stride-s conv (no im2col in HBM).
    #   ap_ref: (H+2, s, Wq, C1) zero-padded, BN1+ReLU-applied, W-phase-split
    #           activation of ONE image: ap[h, px, j, :] = a1p[h, j*s + px, :].
    #   One grid step (n, r) computes output rows [r*th, (r+1)*th) of image n
    #   (each row as 9 accumulated (Wo, C1) @ (C1, C2) matmuls) and accumulates
    #   per-image BN statistics of the conv output.
    s = ap_ref.shape[1]
    wo = y_ref.shape[2]
    c2 = y_ref.shape[3]
    r = pl.program_id(1)

    @pl.when(r == 0)
    def _():
        ps_ref[...] = jnp.zeros_like(ps_ref)
        pq_ref[...] = jnp.zeros_like(pq_ref)

    w = w_ref[...]                                       # (9, C1, C2), once
    strip_s = jnp.zeros((c2,), jnp.float32)
    strip_q = jnp.zeros((c2,), jnp.float32)
    rows = []
    for t in range(th):                                  # unrolled strip loop
        acc = jnp.zeros((wo, c2), jnp.float32)
        for dy in range(3):
            vrow = ap_ref[(r * th + t) * s + dy]         # (s, Wq, C1), dynamic
            for dx in range(3):
                px, qx = dx % s, dx // s
                a2d = vrow[px, qx:qx + wo, :]            # (Wo, C1)
                acc = acc + jnp.dot(a2d, w[dy * 3 + dx],
                                    preferred_element_type=jnp.float32)
        rows.append(acc)
        strip_s = strip_s + jnp.sum(acc, axis=0)
        strip_q = strip_q + jnp.sum(acc * acc, axis=0)

    y_ref[...] = jnp.stack(rows, axis=0).reshape(1, th, wo, c2)
    ps_ref[...] += strip_s.reshape(1, 1, c2)
    pq_ref[...] += strip_q.reshape(1, 1, c2)


def _stage3_kernel(a_ref, sc_ref, sh_ref, w3_ref, xs_ref, ws_ref,
                   y3_ref, ys_ref, p3_ref, q3_ref, ps_ref, qs_ref):
    # BN2-apply + ReLU fused into the conv3 matmul; shortcut 1x1 matmul done in
    # the same pass over M; BN3 / BN_shortcut statistics in the epilogue.
    a = jnp.maximum(a_ref[...] * sc_ref[...] + sh_ref[...], 0.0)
    y3 = jnp.dot(a, w3_ref[...], preferred_element_type=jnp.float32)
    ys = jnp.dot(xs_ref[...], ws_ref[...], preferred_element_type=jnp.float32)
    y3_ref[...] = y3
    ys_ref[...] = ys
    c3 = y3.shape[1]
    p3_ref[...] = jnp.sum(y3, axis=0).reshape(1, 1, c3)
    q3_ref[...] = jnp.sum(y3 * y3, axis=0).reshape(1, 1, c3)
    ps_ref[...] = jnp.sum(ys, axis=0).reshape(1, 1, c3)
    qs_ref[...] = jnp.sum(ys * ys, axis=0).reshape(1, 1, c3)


def _bn_add_relu_kernel(y3_ref, sc3_ref, sh3_ref, ys_ref, scs_ref, shs_ref, o_ref):
    # ReLU( BN3(y3) + BN_s(ys) ) -- final fused elementwise pass.
    o_ref[...] = jnp.maximum(
        y3_ref[...] * sc3_ref[...] + sh3_ref[...]
        + ys_ref[...] * scs_ref[...] + shs_ref[...], 0.0)


# ----------------------------------------------------------------------------
# pallas_call wrappers
# ----------------------------------------------------------------------------
def matmul_stats(a, w):
    M, K = a.shape
    C = w.shape[1]
    tm = _tile_m(M)
    g = M // tm
    return pl.pallas_call(
        _mm_stats_kernel,
        out_shape=(jax.ShapeDtypeStruct((M, C), jnp.float32),
                   jax.ShapeDtypeStruct((g, 1, C), jnp.float32),
                   jax.ShapeDtypeStruct((g, 1, C), jnp.float32)),
        grid=(g,),
        in_specs=[pl.BlockSpec((tm, K), lambda i: (i, 0)),
                  pl.BlockSpec((K, C), lambda i: (0, 0))],
        out_specs=(pl.BlockSpec((tm, C), lambda i: (i, 0)),
                   pl.BlockSpec((1, 1, C), lambda i: (i, 0, 0)),
                   pl.BlockSpec((1, 1, C), lambda i: (i, 0, 0))),
        compiler_params=_compiler_params(("parallel",)),
    )(a, w)


def conv3x3_stats(ap, w2, *, n, h, s, ho, wo, th):
    hp = h + 2
    _, ss, wq, c1 = ap.shape
    assert ss == s and ho % th == 0
    c2 = w2.shape[2]
    return pl.pallas_call(
        functools.partial(_conv3x3_stats_kernel, th=th),
        out_shape=(jax.ShapeDtypeStruct((n, ho, wo, c2), jnp.float32),
                   jax.ShapeDtypeStruct((n, 1, c2), jnp.float32),
                   jax.ShapeDtypeStruct((n, 1, c2), jnp.float32)),
        grid=(n, ho // th),
        in_specs=[pl.BlockSpec((hp, s, wq, c1), lambda i, r: (i, 0, 0, 0)),
                  pl.BlockSpec((9, c1, c2), lambda i, r: (0, 0, 0))],
        out_specs=(pl.BlockSpec((1, th, wo, c2), lambda i, r: (i, r, 0, 0)),
                   pl.BlockSpec((1, 1, c2), lambda i, r: (i, 0, 0)),
                   pl.BlockSpec((1, 1, c2), lambda i, r: (i, 0, 0))),
        compiler_params=_compiler_params(("parallel", "arbitrary")),
    )(ap, w2)


def conv3_shortcut_stats(a, sc2, sh2, w3, xs, ws):
    M, C2 = a.shape
    C0 = xs.shape[1]
    C3 = w3.shape[1]
    tm = _tile_m(M)
    g = M // tm
    return pl.pallas_call(
        _stage3_kernel,
        out_shape=(jax.ShapeDtypeStruct((M, C3), jnp.float32),
                   jax.ShapeDtypeStruct((M, C3), jnp.float32),
                   jax.ShapeDtypeStruct((g, 1, C3), jnp.float32),
                   jax.ShapeDtypeStruct((g, 1, C3), jnp.float32),
                   jax.ShapeDtypeStruct((g, 1, C3), jnp.float32),
                   jax.ShapeDtypeStruct((g, 1, C3), jnp.float32)),
        grid=(g,),
        in_specs=[pl.BlockSpec((tm, C2), lambda i: (i, 0)),
                  pl.BlockSpec((1, C2), lambda i: (0, 0)),
                  pl.BlockSpec((1, C2), lambda i: (0, 0)),
                  pl.BlockSpec((C2, C3), lambda i: (0, 0)),
                  pl.BlockSpec((tm, C0), lambda i: (i, 0)),
                  pl.BlockSpec((C0, C3), lambda i: (0, 0))],
        out_specs=(pl.BlockSpec((tm, C3), lambda i: (i, 0)),
                   pl.BlockSpec((tm, C3), lambda i: (i, 0)),
                   pl.BlockSpec((1, 1, C3), lambda i: (i, 0, 0)),
                   pl.BlockSpec((1, 1, C3), lambda i: (i, 0, 0)),
                   pl.BlockSpec((1, 1, C3), lambda i: (i, 0, 0)),
                   pl.BlockSpec((1, 1, C3), lambda i: (i, 0, 0))),
        compiler_params=_compiler_params(("parallel",)),
    )(a, sc2, sh2, w3, xs, ws)


def bn_add_relu(y3, sc3, sh3, ys, scs, shs):
    M, C = y3.shape
    tm = _tile_m(M)
    return pl.pallas_call(
        _bn_add_relu_kernel,
        out_shape=jax.ShapeDtypeStruct((M, C), jnp.float32),
        grid=(M // tm,),
        in_specs=[pl.BlockSpec((tm, C), lambda i: (i, 0)),
                  pl.BlockSpec((1, C), lambda i: (0, 0)),
                  pl.BlockSpec((1, C), lambda i: (0, 0)),
                  pl.BlockSpec((tm, C), lambda i: (i, 0)),
                  pl.BlockSpec((1, C), lambda i: (0, 0)),
                  pl.BlockSpec((1, C), lambda i: (0, 0))],
        out_specs=pl.BlockSpec((tm, C), lambda i: (i, 0)),
        compiler_params=_compiler_params(("parallel",)),
    )(y3, sc3, sh3, ys, scs, shs)


# ----------------------------------------------------------------------------
# BN folding (tiny per-channel math, done in plain JAX)
# ----------------------------------------------------------------------------
def _fold_bn(psum, psq, count, gamma, beta):
    # Training-mode BN with biased variance.  E[x^2]-E[x]^2 matches the f32
    # reference at the tested scales.
    total = jnp.sum(psum, axis=(0, 1))
    totsq = jnp.sum(psq, axis=(0, 1))
    mean = total / count
    var = totsq / count - mean * mean
    scale = gamma * jax.lax.rsqrt(var + EPS)
    shift = beta - mean * scale
    return scale.reshape(1, -1), shift.reshape(1, -1)


# ----------------------------------------------------------------------------
# Forward pass
# ----------------------------------------------------------------------------
@functools.partial(jax.jit, static_argnames=("stride",))
def conv_block_forward(x_nchw, params, stride):
    """Pallas ConvBlock forward. Input/output NCHW (PyTorch convention)."""
    N, C0, H, W = x_nchw.shape
    s = stride
    C1 = params["w1"].shape[0]
    C2 = params["w2"].shape[0]
    C3 = params["w3"].shape[0]
    Ho = (H - 1) // s + 1
    Wo = (W - 1) // s + 1
    M1 = N * H * W
    M2 = N * Ho * Wo

    x = jnp.transpose(x_nchw, (0, 2, 3, 1))            # NCHW -> NHWC (once)

    # --- conv1 (1x1) + BN1 stats in epilogue --------------------------------
    w1 = params["w1"][:, :, 0, 0].T                    # (C0, C1)
    y1, s1, q1 = matmul_stats(x.reshape(M1, C0), w1)
    sc1, sh1 = _fold_bn(s1, q1, M1, params["g1"], params["be1"])

    # --- BN1 apply + ReLU + zero pad + W-phase split (one fused XLA pass) ---
    a1 = jnp.maximum(y1 * sc1 + sh1, 0.0).reshape(N, H, W, C1)
    wq = -(-(W + 2) // s)
    a1p = jnp.pad(a1, ((0, 0), (1, 1), (1, 1 + wq * s - (W + 2)), (0, 0)))
    ap = (a1p.reshape(N, H + 2, wq, s, C1)
             .transpose(0, 1, 3, 2, 4)
             .reshape(N * (H + 2), s, wq, C1))

    # --- conv2 (3x3, stride s, pad 1) in-kernel + BN2 stats ------------------
    w2 = params["w2"].transpose(2, 3, 1, 0).reshape(9, C1, C2)
    th = _strip_rows(Ho)
    y2, s2, q2 = conv3x3_stats(ap, w2, n=N, h=H, s=s, ho=Ho, wo=Wo, th=th)
    sc2, sh2 = _fold_bn(s2, q2, M2, params["g2"], params["be2"])

    # --- conv3 (1x1) + shortcut conv (1x1 stride s), BN stats fused ---------
    w3 = params["w3"][:, :, 0, 0].T                    # (C2, C3)
    ws = params["ws"][:, :, 0, 0].T                    # (C0, C3)
    xs = x[:, ::s, ::s, :].reshape(M2, C0)
    y3, ys, s3, q3, ss_, qs_ = conv3_shortcut_stats(
        y2.reshape(M2, C2), sc2, sh2, w3, xs, ws)
    sc3, sh3 = _fold_bn(s3, q3, M2, params["g3"], params["be3"])
    scs, shs = _fold_bn(ss_, qs_, M2, params["gs"], params["bes"])

    # --- ReLU( BN3(y3) + BN_s(ys) ) ------------------------------------------
    out = bn_add_relu(y3, sc3, sh3, ys, scs, shs)
    out = out.reshape(N, Ho, Wo, C3)
    return jnp.transpose(out, (0, 3, 1, 2))            # NHWC -> NCHW (once)


# ----------------------------------------------------------------------------
# Pure-JAX reference (NCHW, lax conv) for verification
# ----------------------------------------------------------------------------
def _ref_conv(x, w, b, stride, pad):
    y = jax.lax.conv_general_dilated(
        x, w, (stride, stride), [(pad, pad), (pad, pad)],
        dimension_numbers=("NCHW", "OIHW", "NCHW"))
    return y + b.reshape(1, -1, 1, 1)


def _ref_bn(x, gamma, beta):
    mean = x.mean(axis=(0, 2, 3), keepdims=True)
    var = x.var(axis=(0, 2, 3), keepdims=True)  # biased
    return gamma.reshape(1, -1, 1, 1) * (x - mean) / jnp.sqrt(var + EPS) \
        + beta.reshape(1, -1, 1, 1)


def conv_block_reference(x, p, stride):
    y = jax.nn.relu(_ref_bn(_ref_conv(x, p["w1"], p["b1"], 1, 0), p["g1"], p["be1"]))
    y = jax.nn.relu(_ref_bn(_ref_conv(y, p["w2"], p["b2"], stride, 1), p["g2"], p["be2"]))
    x1 = _ref_bn(_ref_conv(y, p["w3"], p["b3"], 1, 0), p["g3"], p["be3"])
    x2 = _ref_bn(_ref_conv(x, p["ws"], p["bs"], stride, 0), p["gs"], p["bes"])
    return jax.nn.relu(x1 + x2)


# ----------------------------------------------------------------------------
def init_params(key, channels):
    c0, c1, c2, c3 = channels
    keys = jax.random.split(key, 16)
    f32 = jnp.float32
    return {
        # conv weights in PyTorch OIHW layout (biases kept for the reference;
        # they cancel exactly through training-mode BN, so kernels drop them)
        "w1": 0.2 * jax.random.normal(keys[0], (c1, c0, 1, 1), f32),
        "b1": 0.1 * jax.random.normal(keys[1], (c1,), f32),
        "w2": 0.2 * jax.random.normal(keys[2], (c2, c1, 3, 3), f32),
        "b2": 0.1 * jax.random.normal(keys[3], (c2,), f32),
        "w3": 0.2 * jax.random.normal(keys[4], (c3, c2, 1, 1), f32),
        "b3": 0.1 * jax.random.normal(keys[5], (c3,), f32),
        "ws": 0.2 * jax.random.normal(keys[6], (c3, c0, 1, 1), f32),
        "bs": 0.1 * jax.random.normal(keys[7], (c3,), f32),
        # batchnorm affine params
        "g1": 1.0 + 0.1 * jax.random.normal(keys[8], (c1,), f32),
        "be1": 0.1 * jax.random.normal(keys[9], (c1,), f32),
        "g2": 1.0 + 0.1 * jax.random.normal(keys[10], (c2,), f32),
        "be2": 0.1 * jax.random.normal(keys[11], (c2,), f32),
        "g3": 1.0 + 0.1 * jax.random.normal(keys[12], (c3,), f32),
        "be3": 0.1 * jax.random.normal(keys[13], (c3,), f32),
        "gs": 1.0 + 0.1 * jax.random.normal(keys[14], (c3,), f32),
        "bes": 0.1 * jax.random.normal(keys[15], (c3,), f32),
    }


if __name__ == "__main__":
    key = jax.random.PRNGKey(0)
    channels = [4, 8, 8, 16]
    kx, kp = jax.random.split(key)
    x = jax.random.normal(kx, (2, channels[0], 16, 16), jnp.float32)  # NCHW
    params = init_params(kp, channels)

    # stride-2 block (the bottleneck/downsample configuration)
    out = jax.block_until_ready(conv_block_forward(x, params, 2))
    ref = jax.block_until_ready(conv_block_reference(x, params, 2))
    np.testing.assert_allclose(np.asarray(out), np.asarray(ref),
                               rtol=2e-3, atol=2e-3)

    # stride-1 block (exercises the s=1 path of the in-kernel 3x3 conv)
    out1 = jax.block_until_ready(conv_block_forward(x, params, 1))
    ref1 = jax.block_until_ready(conv_block_reference(x, params, 1))
    np.testing.assert_allclose(np.asarray(out1), np.asarray(ref1),
                               rtol=2e-3, atol=2e-3)

    print("KERNEL_OK")
</pallas_src>

<mosaic_0001>
module attributes {stable_mosaic.version = 11 : i64} {
  func.func @_mm_stats_kernel(%arg0: i32, %arg1: memref<256x4xf32, #tpu.memory_space<vmem>>, %arg2: memref<4x8xf32, #tpu.memory_space<vmem>>, %arg3: memref<256x8xf32, #tpu.memory_space<vmem>>, %arg4: memref<1x1x8xf32, #tpu.memory_space<vmem>>, %arg5: memref<1x1x8xf32, #tpu.memory_space<vmem>>) attributes {dimension_semantics = [#tpu.dimension_semantics<parallel>], iteration_bounds = array<i64: 2>, scalar_prefetch = 0 : i64, scratch_operands = 0 : i64, tpu.core_type = #tpu.core_type<tc>, window_params = [{transform_indices = @transform_0, window_bounds = array<i64: 256, 4>}, {pipeline_mode = #tpu.pipeline_mode<synchronous>, transform_indices = @transform_1, window_bounds = array<i64: 4, 8>}, {transform_indices = @transform_2, window_bounds = array<i64: 256, 8>}, {transform_indices = @transform_3, window_bounds = array<i64: 1, 1, 8>}, {transform_indices = @transform_4, window_bounds = array<i64: 1, 1, 8>}]} {
    %c0 = arith.constant 0 : index
    %c0_0 = arith.constant 0 : index
    %0 = vector.load %arg1[%c0, %c0_0] : memref<256x4xf32, #tpu.memory_space<vmem>>, vector<256x4xf32>
    %c0_1 = arith.constant 0 : index
    %c0_2 = arith.constant 0 : index
    %1 = vector.load %arg2[%c0_1, %c0_2] : memref<4x8xf32, #tpu.memory_space<vmem>>, vector<4x8xf32>
    %cst = arith.constant dense<0.000000e+00> : vector<256x8xf32>
    %2 = tpu.matmul %0, %1, %cst {dimension_numbers = #tpu.dot_dimension_numbers<[1], [0], [0], [1], [0, 0, 1, 1], [], []>} : vector<256x4xf32>, vector<4x8xf32>, vector<256x8xf32> -> vector<256x8xf32>
    %c0_3 = arith.constant 0 : index
    %c0_4 = arith.constant 0 : index
    %3 = vector.load %arg3[%c0_3, %c0_4] : memref<256x8xf32, #tpu.memory_space<vmem>>, vector<256x8xf32>
    tpu.vector_store %arg3[%c0_3, %c0_4], %2 {strides = array<i32>} : memref<256x8xf32, #tpu.memory_space<vmem>>, vector<256x8xf32>,
    %cst_5 = arith.constant dense<0.000000e+00> : vector<8xf32>
    %4 = vector.multi_reduction <add>, %2, %cst_5 [0] : vector<256x8xf32> to vector<8xf32>
    %5 = vector.shape_cast %4 : vector<8xf32> to vector<1x1x8xf32>
    %c0_6 = arith.constant 0 : index
    %c0_7 = arith.constant 0 : index
    %c0_8 = arith.constant 0 : index
    %6 = vector.load %arg4[%c0_6, %c0_7, %c0_8] : memref<1x1x8xf32, #tpu.memory_space<vmem>>, vector<1x1x8xf32>
    tpu.vector_store %arg4[%c0_6, %c0_7, %c0_8], %5 {strides = array<i32>} : memref<1x1x8xf32, #tpu.memory_space<vmem>>, vector<1x1x8xf32>,
    %7 = arith.mulf %2, %2 : vector<256x8xf32>
    %cst_9 = arith.constant dense<0.000000e+00> : vector<8xf32>
    %8 = vector.multi_reduction <add>, %7, %cst_9 [0] : vector<256x8xf32> to vector<8xf32>
    %9 = vector.shape_cast %8 : vector<8xf32> to vector<1x1x8xf32>
    %c0_10 = arith.constant 0 : index
    %c0_11 = arith.constant 0 : index
    %c0_12 = arith.constant 0 : index
    %10 = vector.load %arg5[%c0_10, %c0_11, %c0_12] : memref<1x1x8xf32, #tpu.memory_space<vmem>>, vector<1x1x8xf32>
    tpu.vector_store %arg5[%c0_10, %c0_11, %c0_12], %9 {strides = array<i32>} : memref<1x1x8xf32, #tpu.memory_space<vmem>>, vector<1x1x8xf32>,
    return
  }
  func.func @transform_0(%arg0: i32) -> (i32, i32) {
    %c0_i32 = arith.constant 0 : i32
    %c0_i32_0 = arith.constant 0 : i32
    return %arg0, %c0_i32 : i32, i32
  }
  func.func @transform_1(%arg0: i32) -> (i32, i32) {
    %c0_i32 = arith.constant 0 : i32
    %c0_i32_0 = arith.constant 0 : i32
    %c0_i32_1 = arith.constant 0 : i32
    return %c0_i32, %c0_i32_0 : i32, i32
  }
  func.func @transform_2(%arg0: i32) -> (i32, i32) {
    %c0_i32 = arith.constant 0 : i32
    %c0_i32_0 = arith.constant 0 : i32
    return %arg0, %c0_i32 : i32, i32
  }
  func.func @transform_3(%arg0: i32) -> (i32, i32, i32) {
    %c0_i32 = arith.constant 0 : i32
    %c0_i32_0 = arith.constant 0 : i32
    %c0_i32_1 = arith.constant 0 : i32
    return %arg0, %c0_i32, %c0_i32_0 : i32, i32, i32
  }
  func.func @transform_4(%arg0: i32) -> (i32, i32, i32) {
    %c0_i32 = arith.constant 0 : i32
    %c0_i32_0 = arith.constant 0 : i32
    %c0_i32_1 = arith.constant 0 : i32
    return %arg0, %c0_i32, %c0_i32_0 : i32, i32, i32
  }
}

module attributes {stable_mosaic.version = 11 : i64} {
  func.func @_conv3x3_stats_kernel(%arg0: i32, %arg1: i32, %arg2: memref<18x2x9x8xf32, #tpu.memory_space<vmem>>, %arg3: memref<9x8x8xf32, #tpu.memory_space<vmem>>, %arg4: memref<1x8x8x8xf32, #tpu.memory_space<vmem>>, %arg5: memref<1x1x8xf32, #tpu.memory_space<vmem>>, %arg6: memref<1x1x8xf32, #tpu.memory_space<vmem>>) attributes {dimension_semantics = [#tpu.dimension_semantics<parallel>, #tpu.dimension_semantics<arbitrary>], iteration_bounds = array<i64: 2, 1>, scalar_prefetch = 0 : i64, scratch_operands = 0 : i64, tpu.core_type = #tpu.core_type<tc>, window_params = [{transform_indices = @transform_0, window_bounds = array<i64: 18, 2, 9, 8>}, {pipeline_mode = #tpu.pipeline_mode<synchronous>, transform_indices = @transform_1, window_bounds = array<i64: 9, 8, 8>}, {transform_indices = @transform_2, window_bounds = array<i64: 1, 8, 8, 8>}, {transform_indices = @transform_3, window_bounds = array<i64: 1, 1, 8>}, {transform_indices = @transform_4, window_bounds = array<i64: 1, 1, 8>}]} {
    %c0_i32 = arith.constant 0 : i32
    %0 = arith.cmpi eq, %arg1, %c0_i32 : i32
    %1 = arith.extui %0 : i1 to i32
    %c0_i32_0 = arith.constant 0 : i32
    %2 = arith.cmpi ne, %1, %c0_i32_0 : i32
    scf.if %2 {
      %cst_276 = arith.constant 0.000000e+00 : f32
      %673 = vector.broadcast %cst_276 : f32 to vector<1x1x8xf32>
      %c0_277 = arith.constant 0 : index
      %c0_278 = arith.constant 0 : index
      %c0_279 = arith.constant 0 : index
      %674 = vector.load %arg5[%c0_277, %c0_278, %c0_279] : memref<1x1x8xf32, #tpu.memory_space<vmem>>, vector<1x1x8xf32>
      tpu.vector_store %arg5[%c0_277, %c0_278, %c0_279], %673 {strides = array<i32>} : memref<1x1x8xf32, #tpu.memory_space<vmem>>, vector<1x1x8xf32>,
      %cst_280 = arith.constant 0.000000e+00 : f32
      %675 = vector.broadcast %cst_280 : f32 to vector<1x1x8xf32>
      %c0_281 = arith.constant 0 : index
      %c0_282 = arith.constant 0 : index
      %c0_283 = arith.constant 0 : index
      %676 = vector.load %arg6[%c0_281, %c0_282, %c0_283] : memref<1x1x8xf32, #tpu.memory_space<vmem>>, vector<1x1x8xf32>
      tpu.vector_store %arg6[%c0_281, %c0_282, %c0_283], %675 {strides = array<i32>} : memref<1x1x8xf32, #tpu.memory_space<vmem>>, vector<1x1x8xf32>,
    } else {
    }
    %c0 = arith.constant 0 : index
    %c0_1 = arith.constant 0 : index
    %c0_2 = arith.constant 0 : index
    %3 = vector.load %arg3[%c0, %c0_1, %c0_2] : memref<9x8x8xf32, #tpu.memory_space<vmem>>, vector<9x8x8xf32>
    %cst = arith.constant 0.000000e+00 : f32
    %4 = vector.broadcast %cst : f32 to vector<8xf32>
    %cst_3 = arith.constant 0.000000e+00 : f32
    %5 = vector.broadcast %cst_3 : f32 to vector<8xf32>
    %cst_4 = arith.constant 0.000000e+00 : f32
    %6 = vector.broadcast %cst_4 : f32 to vector<8x8xf32>
    %c8_i32 = arith.constant 8 : i32
    %7 = arith.muli %arg1, %c8_i32 : i32
    %c0_i32_5 = arith.constant 0 : i32
    %8 = arith.addi %7, %c0_i32_5 : i32
    %c2_i32 = arith.constant 2 : i32
    %9 = arith.muli %8, %c2_i32 : i32
    %c0_i32_6 = arith.constant 0 : i32
    %10 = arith.addi %9, %c0_i32_6 : i32
    %11 = arith.index_cast %10 : i32 to index
    %c0_7 = arith.constant 0 : index
    %c0_8 = arith.constant 0 : index
    %c0_9 = arith.constant 0 : index
    %12 = vector.load %arg2[%11, %c0_7, %c0_8, %c0_9] : memref<18x2x9x8xf32, #tpu.memory_space<vmem>>, vector<1x2x9x8xf32>
    %13 = vector.shape_cast %12 : vector<1x2x9x8xf32> to vector<2x9x8xf32>
    %14 = vector.extract_strided_slice %13 {offsets = [0, 0, 0], sizes = [1, 8, 8], strides = [1, 1, 1]} : vector<2x9x8xf32> to vector<1x8x8xf32>
    %15 = vector.shape_cast %14 : vector<1x8x8xf32> to vector<8x8xf32>
    %16 = vector.extract_strided_slice %3 {offsets = [0, 0, 0], sizes = [1, 8, 8], strides = [1, 1, 1]} : vector<9x8x8xf32> to vector<1x8x8xf32>
    %17 = vector.shape_cast %16 : vector<1x8x8xf32> to vector<8x8xf32>
    %cst_10 = arith.constant dense<0.000000e+00> : vector<8x8xf32>
    %18 = tpu.matmul %15, %17, %cst_10 {dimension_numbers = #tpu.dot_dimension_numbers<[1], [0], [0], [1], [0, 0, 1, 1], [], []>} : vector<8x8xf32>, vector<8x8xf32>, vector<8x8xf32> -> vector<8x8xf32>
    %19 = arith.addf %6, %18 : vector<8x8xf32>
    %20 = vector.extract_strided_slice %13 {offsets = [1, 0, 0], sizes = [1, 8, 8], strides = [1, 1, 1]} : vector<2x9x8xf32> to vector<1x8x8xf32>
    %21 = vector.shape_cast %20 : vector<1x8x8xf32> to vector<8x8xf32>
    %22 = vector.extract_strided_slice %3 {offsets = [1, 0, 0], sizes = [1, 8, 8], strides = [1, 1, 1]} : vector<9x8x8xf32> to vector<1x8x8xf32>
    %23 = vector.shape_cast %22 : vector<1x8x8xf32> to vector<8x8xf32>
    %cst_11 = arith.constant dense<0.000000e+00> : vector<8x8xf32>
    %24 = tpu.matmul %21, %23, %cst_11 {dimension_numbers = #tpu.dot_dimension_numbers<[1], [0], [0], [1], [0, 0, 1, 1], [], []>} : vector<8x8xf32>, vector<8x8xf32>, vector<8x8xf32> -> vector<8x8xf32>
    %25 = arith.addf %19, %24 : vector<8x8xf32>
    %26 = vector.extract_strided_slice %13 {offsets = [0, 1, 0], sizes = [1, 8, 8], strides = [1, 1, 1]} : vector<2x9x8xf32> to vector<1x8x8xf32>
    %27 = vector.shape_cast %26 : vector<1x8x8xf32> to vector<8x8xf32>
    %28 = vector.extract_strided_slice %3 {offsets = [2, 0, 0], sizes = [1, 8, 8], strides = [1, 1, 1]} : vector<9x8x8xf32> to vector<1x8x8xf32>
    %29 = vector.shape_cast %28 : vector<1x8x8xf32> to vector<8x8xf32>
    %cst_12 = arith.constant dense<0.000000e+00> : vector<8x8xf32>
    %30 = tpu.matmul %27, %29, %cst_12 {dimension_numbers = #tpu.dot_dimension_numbers<[1], [0], [0], [1], [0, 0, 1, 1], [], []>} : vector<8x8xf32>, vector<8x8xf32>, vector<8x8xf32> -> vector<8x8xf32>
    %31 = arith.addf %25, %30 : vector<8x8xf32>
    %c8_i32_13 = arith.constant 8 : i32
    %32 = arith.muli %arg1, %c8_i32_13 : i32
    %c0_i32_14 = arith.constant 0 : i32
    %33 = arith.addi %32, %c0_i32_14 : i32
    %c2_i32_15 = arith.constant 2 : i32
    %34 = arith.muli %33, %c2_i32_15 : i32
    %c1_i32 = arith.constant 1 : i32
    %35 = arith.addi %34, %c1_i32 : i32
    %36 = arith.index_cast %35 : i32 to index
    %c0_16 = arith.constant 0 : index
    %c0_17 = arith.constant 0 : index
    %c0_18 = arith.constant 0 : index
    %37 = vector.load %arg2[%36, %c0_16, %c0_17, %c0_18] : memref<18x2x9x8xf32, #tpu.memory_space<vmem>>, vector<1x2x9x8xf32>
    %38 = vector.shape_cast %37 : vector<1x2x9x8xf32> to vector<2x9x8xf32>
    %39 = vector.extract_strided_slice %38 {offsets = [0, 0, 0], sizes = [1, 8, 8], strides = [1, 1, 1]} : vector<2x9x8xf32> to vector<1x8x8xf32>
    %40 = vector.shape_cast %39 : vector<1x8x8xf32> to vector<8x8xf32>
    %41 = vector.extract_strided_slice %3 {offsets = [3, 0, 0], sizes = [1, 8, 8], strides = [1, 1, 1]} : vector<9x8x8xf32> to vector<1x8x8xf32>
    %42 = vector.shape_cast %41 : vector<1x8x8xf32> to vector<8x8xf32>
    %cst_19 = arith.constant dense<0.000000e+00> : vector<8x8xf32>
    %43 = tpu.matmul %40, %42, %cst_19 {dimension_numbers = #tpu.dot_dimension_numbers<[1], [0], [0], [1], [0, 0, 1, 1], [], []>} : vector<8x8xf32>, vector<8x8xf32>, vector<8x8xf32> -> vector<8x8xf32>
    %44 = arith.addf %31, %43 : vector<8x8xf32>
    %45 = vector.extract_strided_slice %38 {offsets = [1, 0, 0], sizes = [1, 8, 8], strides = [1, 1, 1]} : vector<2x9x8xf32> to vector<1x8x8xf32>
    %46 = vector.shape_cast %45 : vector<1x8x8xf32> to vector<8x8xf32>
    %47 = vector.extract_strided_slice %3 {offsets = [4, 0, 0], sizes = [1, 8, 8], strides = [1, 1, 1]} : vector<9x8x8xf32> to vector<1x8x8xf32>
    %48 = vector.shape_cast %47 : vector<1x8x8xf32> to vector<8x8xf32>
    %cst_20 = arith.constant dense<0.000000e+00> : vector<8x8xf32>
    %49 = tpu.matmul %46, %48, %cst_20 {dimension_numbers = #tpu.dot_dimension_numbers<[1], [0], [0], [1], [0, 0, 1, 1], [], []>} : vector<8x8xf32>, vector<8x8xf32>, vector<8x8xf32> -> vector<8x8xf32>
    %50 = arith.addf %44, %49 : vector<8x8xf32>
    %51 = vector.extract_strided_slice %38 {offsets = [0, 1, 0], sizes = [1, 8, 8], strides = [1, 1, 1]} : vector<2x9x8xf32> to vector<1x8x8xf32>
    %52 = vector.shape_cast %51 : vector<1x8x8xf32> to vector<8x8xf32>
    %53 = vector.extract_strided_slice %3 {offsets = [5, 0, 0], sizes = [1, 8, 8], strides = [1, 1, 1]} : vector<9x8x8xf32> to vector<1x8x8xf32>
    %54 = vector.shape_cast %53 : vector<1x8x8xf32> to vector<8x8xf32>
    %cst_21 = arith.constant dense<0.000000e+00> : vector<8x8xf32>
    %55 = tpu.matmul %52, %54, %cst_21 {dimension_numbers = #tpu.dot_dimension_numbers<[1], [0], [0], [1], [0, 0, 1, 1], [], []>} : vector<8x8xf32>, vector<8x8xf32>, vector<8x8xf32> -> vector<8x8xf32>
    %56 = arith.addf %50, %55 : vector<8x8xf32>
    %c8_i32_22 = arith.constant 8 : i32
    %57 = arith.muli %arg1, %c8_i32_22 : i32
    %c0_i32_23 = arith.constant 0 : i32
    %58 = arith.addi %57, %c0_i32_23 : i32
    %c2_i32_24 = arith.constant 2 : i32
    %59 = arith.muli %58, %c2_i32_24 : i32
    %c2_i32_25 = arith.constant 2 : i32
    %60 = arith.addi %59, %c2_i32_25 : i32
    %61 = arith.index_cast %60 : i32 to index
    %c0_26 = arith.constant 0 : index
    %c0_27 = arith.constant 0 : index
    %c0_28 = arith.constant 0 : index
    %62 = vector.load %arg2[%61, %c0_26, %c0_27, %c0_28] : memref<18x2x9x8xf32, #tpu.memory_space<vmem>>, vector<1x2x9x8xf32>
    %63 = vector.shape_cast %62 : vector<1x2x9x8xf32> to vector<2x9x8xf32>
    %64 = vector.extract_strided_slice %63 {offsets = [0, 0, 0], sizes = [1, 8, 8], strides = [1, 1, 1]} : vector<2x9x8xf32> to vector<1x8x8xf32>
    %65 = vector.shape_cast %64 : vector<1x8x8xf32> to vector<8x8xf32>
    %66 = vector.extract_strided_slice %3 {offsets = [6, 0, 0], sizes = [1, 8, 8], strides = [1, 1, 1]} : vector<9x8x8xf32> to vector<1x8x8xf32>
    %67 = vector.shape_cast %66 : vector<1x8x8xf32> to vector<8x8xf32>
    %cst_29 = arith.constant dense<0.000000e+00> : vector<8x8xf32>
    %68 = tpu.matmul %65, %67, %cst_29 {dimension_numbers = #tpu.dot_dimension_numbers<[1], [0], [0], [1], [0, 0, 1, 1], [], []>} : vector<8x8xf32>, vector<8x8xf32>, vector<8x8xf32> -> vector<8x8xf32>
    %69 = arith.addf %56, %68 : vector<8x8xf32>
    %70 = vector.extract_strided_slice %63 {offsets = [1, 0, 0], sizes = [1, 8, 8], strides = [1, 1, 1]} : vector<2x9x8xf32> to vector<1x8x8xf32>
    %71 = vector.shape_cast %70 : vector<1x8x8xf32> to vector<8x8xf32>
    %72 = vector.extract_strided_slice %3 {offsets = [7, 0, 0], sizes = [1, 8, 8], strides = [1, 1, 1]} : vector<9x8x8xf32> to vector<1x8x8xf32>
    %73 = vector.shape_cast %72 : vector<1x8x8xf32> to vector<8x8xf32>
    %cst_30 = arith.constant dense<0.000000e+00> : vector<8x8xf32>
    %74 = tpu.matmul %71, %73, %cst_30 {dimension_numbers = #tpu.dot_dimension_numbers<[1], [0], [0], [1], [0, 0, 1, 1], [], []>} : vector<8x8xf32>, vector<8x8xf32>, vector<8x8xf32> -> vector<8x8xf32>
    %75 = arith.addf %69, %74 : vector<8x8xf32>
    %76 = vector.extract_strided_slice %63 {offsets = [0, 1, 0], sizes = [1, 8, 8], strides = [1, 1, 1]} : vector<2x9x8xf32> to vector<1x8x8xf32>
    %77 = vector.shape_cast %76 : vector<1x8x8xf32> to vector<8x8xf32>
    %78 = vector.extract_strided_slice %3 {offsets = [8, 0, 0], sizes = [1, 8, 8], strides = [1, 1, 1]} : vector<9x8x8xf32> to vector<1x8x8xf32>
    %79 = vector.shape_cast %78 : vector<1x8x8xf32> to vector<8x8xf32>
    %cst_31 = arith.constant dense<0.000000e+00> : vector<8x8xf32>
    %80 = tpu.matmul %77, %79, %cst_31 {dimension_numbers = #tpu.dot_dimension_numbers<[1], [0], [0], [1], [0, 0, 1, 1], [], []>} : vector<8x8xf32>, vector<8x8xf32>, vector<8x8xf32> -> vector<8x8xf32>
    %81 = arith.addf %75, %80 : vector<8x8xf32>
    %cst_32 = arith.constant dense<0.000000e+00> : vector<8xf32>
    %82 = vector.multi_reduction <add>, %81, %cst_32 [0] : vector<8x8xf32> to vector<8xf32>
    %83 = arith.addf %4, %82 : vector<8xf32>
    %84 = arith.mulf %81, %81 : vector<8x8xf32>
    %cst_33 = arith.constant dense<0.000000e+00> : vector<8xf32>
    %85 = vector.multi_reduction <add>, %84, %cst_33 [0] : vector<8x8xf32> to vector<8xf32>
    %86 = arith.addf %5, %85 : vector<8xf32>
    %cst_34 = arith.constant 0.000000e+00 : f32
    %87 = vector.broadcast %cst_34 : f32 to vector<8x8xf32>
    %c8_i32_35 = arith.constant 8 : i32
    %88 = arith.muli %arg1, %c8_i32_35 : i32
    %c1_i32_36 = arith.constant 1 : i32
    %89 = arith.addi %88, %c1_i32_36 : i32
    %c2_i32_37 = arith.constant 2 : i32
    %90 = arith.muli %89, %c2_i32_37 : i32
    %c0_i32_38 = arith.constant 0 : i32
    %91 = arith.addi %90, %c0_i32_38 : i32
    %92 = arith.index_cast %91 : i32 to index
    %c0_39 = arith.constant 0 : index
    %c0_40 = arith.constant 0 : index
    %c0_41 = arith.constant 0 : index
    %93 = vector.load %arg2[%92, %c0_39, %c0_40, %c0_41] : memref<18x2x9x8xf32, #tpu.memory_space<vmem>>, vector<1x2x9x8xf32>
    %94 = vector.shape_cast %93 : vector<1x2x9x8xf32> to vector<2x9x8xf32>
    %95 = vector.extract_strided_slice %94 {offsets = [0, 0, 0], sizes = [1, 8, 8], strides = [1, 1, 1]} : vector<2x9x8xf32> to vector<1x8x8xf32>
    %96 = vector.shape_cast %95 : vector<1x8x8xf32> to vector<8x8xf32>
    %97 = vector.extract_strided_slice %3 {offsets = [0, 0, 0], sizes = [1, 8, 8], strides = [1, 1, 1]} : vector<9x8x8xf32> to vector<1x8x8xf32>
    %98 = vector.shape_cast %97 : vector<1x8x8xf32> to vector<8x8xf32>
    %cst_42 = arith.constant dense<0.000000e+00> : vector<8x8xf32>
    %99 = tpu.matmul %96, %98, %cst_42 {dimension_numbers = #tpu.dot_dimension_numbers<[1], [0], [0], [1], [0, 0, 1, 1], [], []>} : vector<8x8xf32>, vector<8x8xf32>, vector<8x8xf32> -> vector<8x8xf32>
    %100 = arith.addf %87, %99 : vector<8x8xf32>
    %101 = vector.extract_strided_slice %94 {offsets = [1, 0, 0], sizes = [1, 8, 8], strides = [1, 1, 1]} : vector<2x9x8xf32> to vector<1x8x8xf32>
    %102 = vector.shape_cast %101 : vector<1x8x8xf32> to vector<8x8xf32>
    %103 = vector.extract_strided_slice %3 {offsets = [1, 0, 0], sizes = [1, 8, 8], strides = [1, 1, 1]} : vector<9x8x8xf32> to vector<1x8x8xf32>
    %104 = vector.shape_cast %103 : vector<1x8x8xf32> to vector<8x8xf32>
    %cst_43 = arith.constant dense<0.000000e+00> : vector<8x8xf32>
    %105 = tpu.matmul %102, %104, %cst_43 {dimension_numbers = #tpu.dot_dimension_numbers<[1], [0], [0], [1], [0, 0, 1, 1], [], []>} : vector<8x8xf32>, vector<8x8xf32>, vector<8x8xf32> -> vector<8x8xf32>
    %106 = arith.addf %100, %105 : vector<8x8xf32>
    %107 = vector.extract_strided_slice %94 {offsets = [0, 1, 0], sizes = [1, 8, 8], strides = [1, 1, 1]} : vector<2x9x8xf32> to vector<1x8x8xf32>
    %108 = vector.shape_cast %107 : vector<1x8x8xf32> to vector<8x8xf32>
    %109 = vector.extract_strided_slice %3 {offsets = [2, 0, 0], sizes = [1, 8, 8], strides = [1, 1, 1]} : vector<9x8x8xf32> to vector<1x8x8xf32>
    %110 = vector.shape_cast %109 : vector<1x8x8xf32> to vector<8x8xf32>
    %cst_44 = arith.constant dense<0.000000e+00> : vector<8x8xf32>
    %111 = tpu.matmul %108, %110, %cst_44 {dimension_numbers = #tpu.dot_dimension_numbers<[1], [0], [0], [1], [0, 0, 1, 1], [], []>} : vector<8x8xf32>, vector<8x8xf32>, vector<8x8xf32> -> vector<8x8xf32>
    %112 = arith.addf %106, %111 : vector<8x8xf32>
    %c8_i32_45 = arith.constant 8 : i32
    %113 = arith.muli %arg1, %c8_i32_45 : i32
    %c1_i32_46 = arith.constant 1 : i32
    %114 = arith.addi %113, %c1_i32_46 : i32
    %c2_i32_47 = arith.constant 2 : i32
    %115 = arith.muli %114, %c2_i32_47 : i32
    %c1_i32_48 = arith.constant 1 : i32
    %116 = arith.addi %115, %c1_i32_48 : i32
    %117 = arith.index_cast %116 : i32 to index
    %c0_49 = arith.constant 0 : index
    %c0_50 = arith.constant 0 : index
    %c0_51 = arith.constant 0 : index
    %118 = vector.load %arg2[%117, %c0_49, %c0_50, %c0_51] : memref<18x2x9x8xf32, #tpu.memory_space<vmem>>, vector<1x2x9x8xf32>
    %119 = vector.shape_cast %118 : vector<1x2x9x8xf32> to vector<2x9x8xf32>
    %120 = vector.extract_strided_slice %119 {offsets = [0, 0, 0], sizes = [1, 8, 8], strides = [1, 1, 1]} : vector<2x9x8xf32> to vector<1x8x8xf32>
    %121 = vector.shape_cast %120 : vector<1x8x8xf32> to vector<8x8xf32>
    %122 = vector.extract_strided_slice %3 {offsets = [3, 0, 0], sizes = [1, 8, 8], strides = [1, 1, 1]} : vector<9x8x8xf32> to vector<1x8x8xf32>
    %123 = vector.shape_cast %122 : vector<1x8x8xf32> to vector<8x8xf32>
    %cst_52 = arith.constant dense<0.000000e+00> : vector<8x8xf32>
    %124 = tpu.matmul %121, %123, %cst_52 {dimension_numbers = #tpu.dot_dimension_numbers<[1], [0], [0], [1], [0, 0, 1, 1], [], []>} : vector<8x8xf32>, vector<8x8xf32>, vector<8x8xf32> -> vector<8x8xf32>
    %125 = arith.addf %112, %124 : vector<8x8xf32>
    %126 = vector.extract_strided_slice %119 {offsets = [1, 0, 0], sizes = [1, 8, 8], strides = [1, 1, 1]} : vector<2x9x8xf32> to vector<1x8x8xf32>
    %127 = vector.shape_cast %126 : vector<1x8x8xf32> to vector<8x8xf32>
    %128 = vector.extract_strided_slice %3 {offsets = [4, 0, 0], sizes = [1, 8, 8], strides = [1, 1, 1]} : vector<9x8x8xf32> to vector<1x8x8xf32>
    %129 = vector.shape_cast %128 : vector<1x8x8xf32> to vector<8x8xf32>
    %cst_53 = arith.constant dense<0.000000e+00> : vector<8x8xf32>
    %130 = tpu.matmul %127, %129, %cst_53 {dimension_numbers = #tpu.dot_dimension_numbers<[1], [0], [0], [1], [0, 0, 1, 1], [], []>} : vector<8x8xf32>, vector<8x8xf32>, vector<8x8xf32> -> vector<8x8xf32>
    %131 = arith.addf %125, %130 : vector<8x8xf32>
    %132 = vector.extract_strided_slice %119 {offsets = [0, 1, 0], sizes = [1, 8, 8], strides = [1, 1, 1]} : vector<2x9x8xf32> to vector<1x8x8xf32>
    %133 = vector.shape_cast %132 : vector<1x8x8xf32> to vector<8x8xf32>
    %134 = vector.extract_strided_slice %3 {offsets = [5, 0, 0], sizes = [1, 8, 8], strides = [1, 1, 1]} : vector<9x8x8xf32> to vector<1x8x8xf32>
    %135 = vector.shape_cast %134 : vector<1x8x8xf32> to vector<8x8xf32>
    %cst_54 = arith.constant dense<0.000000e+00> : vector<8x8xf32>
    %136 = tpu.matmul %133, %135, %cst_54 {dimension_numbers = #tpu.dot_dimension_numbers<[1], [0], [0], [1], [0, 0, 1, 1], [], []>} : vector<8x8xf32>, vector<8x8xf32>, vector<8x8xf32> -> vector<8x8xf32>
    %137 = arith.addf %131, %136 : vector<8x8xf32>
    %c8_i32_55 = arith.constant 8 : i32
    %138 = arith.muli %arg1, %c8_i32_55 : i32
    %c1_i32_56 = arith.constant 1 : i32
    %139 = arith.addi %138, %c1_i32_56 : i32
    %c2_i32_57 = arith.constant 2 : i32
    %140 = arith.muli %139, %c2_i32_57 : i32
    %c2_i32_58 = arith.constant 2 : i32
    %141 = arith.addi %140, %c2_i32_58 : i32
    %142 = arith.index_cast %141 : i32 to index
    %c0_59 = arith.constant 0 : index
    %c0_60 = arith.constant 0 : index
    %c0_61 = arith.constant 0 : index
    %143 = vector.load %arg2[%142, %c0_59, %c0_60, %c0_61] : memref<18x2x9x8xf32, #tpu.memory_space<vmem>>, vector<1x2x9x8xf32>
    %144 = vector.shape_cast %143 : vector<1x2x9x8xf32> to vector<2x9x8xf32>
    %145 = vector.extract_strided_slice %144 {offsets = [0, 0, 0], sizes = [1, 8, 8], strides = [1, 1, 1]} : vector<2x9x8xf32> to vector<1x8x8xf32>
    %146 = vector.shape_cast %145 : vector<1x8x8xf32> to vector<8x8xf32>
    %147 = vector.extract_strided_slice %3 {offsets = [6, 0, 0], sizes = [1, 8, 8], strides = [1, 1, 1]} : vector<9x8x8xf32> to vector<1x8x8xf32>
    %148 = vector.shape_cast %147 : vector<1x8x8xf32> to vector<8x8xf32>
    %cst_62 = arith.constant dense<0.000000e+00> : vector<8x8xf32>
    %149 = tpu.matmul %146, %148, %cst_62 {dimension_numbers = #tpu.dot_dimension_numbers<[1], [0], [0], [1], [0, 0, 1, 1], [], []>} : vector<8x8xf32>, vector<8x8xf32>, vector<8x8xf32> -> vector<8x8xf32>
    %150 = arith.addf %137, %149 : vector<8x8xf32>
    %151 = vector.extract_strided_slice %144 {offsets = [1, 0, 0], sizes = [1, 8, 8], strides = [1, 1, 1]} : vector<2x9x8xf32> to vector<1x8x8xf32>
    %152 = vector.shape_cast %151 : vector<1x8x8xf32> to vector<8x8xf32>
    %153 = vector.extract_strided_slice %3 {offsets = [7, 0, 0], sizes = [1, 8, 8], strides = [1, 1, 1]} : vector<9x8x8xf32> to vector<1x8x8xf32>
    %154 = vector.shape_cast %153 : vector<1x8x8xf32> to vector<8x8xf32>
    %cst_63 = arith.constant dense<0.000000e+00> : vector<8x8xf32>
    %155 = tpu.matmul %152, %154, %cst_63 {dimension_numbers = #tpu.dot_dimension_numbers<[1], [0], [0], [1], [0, 0, 1, 1], [], []>} : vector<8x8xf32>, vector<8x8xf32>, vector<8x8xf32> -> vector<8x8xf32>
    %156 = arith.addf %150, %155 : vector<8x8xf32>
    %157 = vector.extract_strided_slice %144 {offsets = [0, 1, 0], sizes = [1, 8, 8], strides = [1, 1, 1]} : vector<2x9x8xf32> to vector<1x8x8xf32>
    %158 = vector.shape_cast %157 : vector<1x8x8xf32> to vector<8x8xf32>
    %159 = vector.extract_strided_slice %3 {offsets = [8, 0, 0], sizes = [1, 8, 8], strides = [1, 1, 1]} : vector<9x8x8xf32> to vector<1x8x8xf32>
    %160 = vector.shape_cast %159 : vector<1x8x8xf32> to vector<8x8xf32>
    %cst_64 = arith.constant dense<0.000000e+00> : vector<8x8xf32>
    %161 = tpu.matmul %158, %160, %cst_64 {dimension_numbers = #tpu.dot_dimension_numbers<[1], [0], [0], [1], [0, 0, 1, 1], [], []>} : vector<8x8xf32>, vector<8x8xf32>, vector<8x8xf32> -> vector<8x8xf32>
    %162 = arith.addf %156, %161 : vector<8x8xf32>
    %cst_65 = arith.constant dense<0.000000e+00> : vector<8xf32>
    %163 = vector.multi_reduction <add>, %162, %cst_65 [0] : vector<8x8xf32> to vector<8xf32>
    %164 = arith.addf %83, %163 : vector<8xf32>
    %165 = arith.mulf %162, %162 : vector<8x8xf32>
    %cst_66 = arith.constant dense<0.000000e+00> : vector<8xf32>
    %166 = vector.multi_reduction <add>, %165, %cst_66 [0] : vector<8x8xf32> to vector<8xf32>
    %167 = arith.addf %86, %166 : vector<8xf32>
    %cst_67 = arith.constant 0.000000e+00 : f32
    %168 = vector.broadcast %cst_67 : f32 to vector<8x8xf32>
    %c8_i32_68 = arith.constant 8 : i32
    %169 = arith.muli %arg1, %c8_i32_68 : i32
    %c2_i32_69 = arith.constant 2 : i32
    %170 = arith.addi %169, %c2_i32_69 : i32
    %c2_i32_70 = arith.constant 2 : i32
    %171 = arith.muli %170, %c2_i32_70 : i32
    %c0_i32_71 = arith.constant 0 : i32
    %172 = arith.addi %171, %c0_i32_71 : i32
    %173 = arith.index_cast %172 : i32 to index
    %c0_72 = arith.constant 0 : index
    %c0_73 = arith.constant 0 : index
    %c0_74 = arith.constant 0 : index
    %174 = vector.load %arg2[%173, %c0_72, %c0_73, %c0_74] : memref<18x2x9x8xf32, #tpu.memory_space<vmem>>, vector<1x2x9x8xf32>
    %175 = vector.shape_cast %174 : vector<1x2x9x8xf32> to vector<2x9x8xf32>
    %176 = vector.extract_strided_slice %175 {offsets = [0, 0, 0], sizes = [1, 8, 8], strides = [1, 1, 1]} : vector<2x9x8xf32> to vector<1x8x8xf32>
    %177 = vector.shape_cast %176 : vector<1x8x8xf32> to vector<8x8xf32>
    %178 = vector.extract_strided_slice %3 {offsets = [0, 0, 0], sizes = [1, 8, 8], strides = [1, 1, 1]} : vector<9x8x8xf32> to vector<1x8x8xf32>
    %179 = vector.shape_cast %178 : vector<1x8x8xf32> to vector<8x8xf32>
    %cst_75 = arith.constant dense<0.000000e+00> : vector<8x8xf32>
    %180 = tpu.matmul %177, %179, %cst_75 {dimension_numbers = #tpu.dot_dimension_numbers<[1], [0], [0], [1], [0, 0, 1, 1], [], []>} : vector<8x8xf32>, vector<8x8xf32>, vector<8x8xf32> -> vector<8x8xf32>
    %181 = arith.addf %168, %180 : vector<8x8xf32>
    %182 = vector.extract_strided_slice %175 {offsets = [1, 0, 0], sizes = [1, 8, 8], strides = [1, 1, 1]} : vector<2x9x8xf32> to vector<1x8x8xf32>
    %183 = vector.shape_cast %182 : vector<1x8x8xf32> to vector<8x8xf32>
    %184 = vector.extract_strided_slice %3 {offsets = [1, 0, 0], sizes = [1, 8, 8], strides = [1, 1, 1]} : vector<9x8x8xf32> to vector<1x8x8xf32>
    %185 = vector.shape_cast %184 : vector<1x8x8xf32> to vector<8x8xf32>
    %cst_76 = arith.constant dense<0.000000e+00> : vector<8x8xf32>
    %186 = tpu.matmul %183, %185, %cst_76 {dimension_numbers = #tpu.dot_dimension_numbers<[1], [0], [0], [1], [0, 0, 1, 1], [], []>} : vector<8x8xf32>, vector<8x8xf32>, vector<8x8xf32> -> vector<8x8xf32>
    %187 = arith.addf %181, %186 : vector<8x8xf32>
    %188 = vector.extract_strided_slice %175 {offsets = [0, 1, 0], sizes = [1, 8, 8], strides = [1, 1, 1]} : vector<2x9x8xf32> to vector<1x8x8xf32>
    %189 = vector.shape_cast %188 : vector<1x8x8xf32> to vector<8x8xf32>
    %190 = vector.extract_strided_slice %3 {offsets = [2, 0, 0], sizes = [1, 8, 8], strides = [1, 1, 1]} : vector<9x8x8xf32> to vector<1x8x8xf32>
    %191 = vector.shape_cast %190 : vector<1x8x8xf32> to vector<8x8xf32>
    %cst_77 = arith.constant dense<0.000000e+00> : vector<8x8xf32>
    %192 = tpu.matmul %189, %191, %cst_77 {dimension_numbers = #tpu.dot_dimension_numbers<[1], [0], [0], [1], [0, 0, 1, 1], [], []>} : vector<8x8xf32>, vector<8x8xf32>, vector<8x8xf32> -> vector<8x8xf32>
    %193 = arith.addf %187, %192 : vector<8x8xf32>
    %c8_i32_78 = arith.constant 8 : i32
    %194 = arith.muli %arg1, %c8_i32_78 : i32
    %c2_i32_79 = arith.constant 2 : i32
    %195 = arith.addi %194, %c2_i32_79 : i32
    %c2_i32_80 = arith.constant 2 : i32
    %196 = arith.muli %195, %c2_i32_80 : i32
    %c1_i32_81 = arith.constant 1 : i32
    %197 = arith.addi %196, %c1_i32_81 : i32
    %198 = arith.index_cast %197 : i32 to index
    %c0_82 = arith.constant 0 : index
    %c0_83 = arith.constant 0 : index
    %c0_84 = arith.constant 0 : index
    %199 = vector.load %arg2[%198, %c0_82, %c0_83, %c0_84] : memref<18x2x9x8xf32, #tpu.memory_space<vmem>>, vector<1x2x9x8xf32>
    %200 = vector.shape_cast %199 : vector<1x2x9x8xf32> to vector<2x9x8xf32>
    %201 = vector.extract_strided_slice %200 {offsets = [0, 0, 0], sizes = [1, 8, 8], strides = [1, 1, 1]} : vector<2x9x8xf32> to vector<1x8x8xf32>
    %202 = vector.shape_cast %201 : vector<1x8x8xf32> to vector<8x8xf32>
    %203 = vector.extract_strided_slice %3 {offsets = [3, 0, 0], sizes = [1, 8, 8], strides = [1, 1, 1]} : vector<9x8x8xf32> to vector<1x8x8xf32>
    %204 = vector.shape_cast %203 : vector<1x8x8xf32> to vector<8x8xf32>
    %cst_85 = arith.constant dense<0.000000e+00> : vector<8x8xf32>
    %205 = tpu.matmul %202, %204, %cst_85 {dimension_numbers = #tpu.dot_dimension_numbers<[1], [0], [0], [1], [0, 0, 1, 1], [], []>} : vector<8x8xf32>, vector<8x8xf32>, vector<8x8xf32> -> vector<8x8xf32>
    %206 = arith.addf %193, %205 : vector<8x8xf32>
    %207 = vector.extract_strided_slice %200 {offsets = [1, 0, 0], sizes = [1, 8, 8], strides = [1, 1, 1]} : vector<2x9x8xf32> to vector<1x8x8xf32>
    %208 = vector.shape_cast %207 : vector<1x8x8xf32> to vector<8x8xf32>
    %209 = vector.extract_strided_slice %3 {offsets = [4, 0, 0], sizes = [1, 8, 8], strides = [1, 1, 1]} : vector<9x8x8xf32> to vector<1x8x8xf32>
    %210 = vector.shape_cast %209 : vector<1x8x8xf32> to vector<8x8xf32>
    %cst_86 = arith.constant dense<0.000000e+00> : vector<8x8xf32>
    %211 = tpu.matmul %208, %210, %cst_86 {dimension_numbers = #tpu.dot_dimension_numbers<[1], [0], [0], [1], [0, 0, 1, 1], [], []>} : vector<8x8xf32>, vector<8x8xf32>, vector<8x8xf32> -> vector<8x8xf32>
    %212 = arith.addf %206, %211 : vector<8x8xf32>
    %213 = vector.extract_strided_slice %200 {offsets = [0, 1, 0], sizes = [1, 8, 8], strides = [1, 1, 1]} : vector<2x9x8xf32> to vector<1x8x8xf32>
    %214 = vector.shape_cast %213 : vector<1x8x8xf32> to vector<8x8xf32>
    %215 = vector.extract_strided_slice %3 {offsets = [5, 0, 0], sizes = [1, 8, 8], strides = [1, 1, 1]} : vector<9x8x8xf32> to vector<1x8x8xf32>
    %216 = vector.shape_cast %215 : vector<1x8x8xf32> to vector<8x8xf32>
    %cst_87 = arith.constant dense<0.000000e+00> : vector<8x8xf32>
    %217 = tpu.matmul %214, %216, %cst_87 {dimension_numbers = #tpu.dot_dimension_numbers<[1], [0], [0], [1], [0, 0, 1, 1], [], []>} : vector<8x8xf32>, vector<8x8xf32>, vector<8x8xf32> -> vector<8x8xf32>
    %218 = arith.addf %212, %217 : vector<8x8xf32>
    %c8_i32_88 = arith.constant 8 : i32
    %219 = arith.muli %arg1, %c8_i32_88 : i32
    %c2_i32_89 = arith.constant 2 : i32
    %220 = arith.addi %219, %c2_i32_89 : i32
    %c2_i32_90 = arith.constant 2 : i32
    %221 = arith.muli %220, %c2_i32_90 : i32
    %c2_i32_91 = arith.constant 2 : i32
    %222 = arith.addi %221, %c2_i32_91 : i32
    %223 = arith.index_cast %222 : i32 to index
    %c0_92 = arith.constant 0 : index
    %c0_93 = arith.constant 0 : index
    %c0_94 = arith.constant 0 : index
    %224 = vector.load %arg2[%223, %c0_92, %c0_93, %c0_94] : memref<18x2x9x8xf32, #tpu.memory_space<vmem>>, vector<1x2x9x8xf32>
    %225 = vector.shape_cast %224 : vector<1x2x9x8xf32> to vector<2x9x8xf32>
    %226 = vector.extract_strided_slice %225 {offsets = [0, 0, 0], sizes = [1, 8, 8], strides = [1, 1, 1]} : vector<2x9x8xf32> to vector<1x8x8xf32>
    %227 = vector.shape_cast %226 : vector<1x8x8xf32> to vector<8x8xf32>
    %228 = vector.extract_strided_slice %3 {offsets = [6, 0, 0], sizes = [1, 8, 8], strides = [1, 1, 1]} : vector<9x8x8xf32> to vector<1x8x8xf32>
    %229 = vector.shape_cast %228 : vector<1x8x8xf32> to vector<8x8xf32>
    %cst_95 = arith.constant dense<0.000000e+00> : vector<8x8xf32>
    %230 = tpu.matmul %227, %229, %cst_95 {dimension_numbers = #tpu.dot_dimension_numbers<[1], [0], [0], [1], [0, 0, 1, 1], [], []>} : vector<8x8xf32>, vector<8x8xf32>, vector<8x8xf32> -> vector<8x8xf32>
    %231 = arith.addf %218, %230 : vector<8x8xf32>
    %232 = vector.extract_strided_slice %225 {offsets = [1, 0, 0], sizes = [1, 8, 8], strides = [1, 1, 1]} : vector<2x9x8xf32> to vector<1x8x8xf32>
    %233 = vector.shape_cast %232 : vector<1x8x8xf32> to vector<8x8xf32>
    %234 = vector.extract_strided_slice %3 {offsets = [7, 0, 0], sizes = [1, 8, 8], strides = [1, 1, 1]} : vector<9x8x8xf32> to vector<1x8x8xf32>
    %235 = vector.shape_cast %234 : vector<1x8x8xf32> to vector<8x8xf32>
    %cst_96 = arith.constant dense<0.000000e+00> : vector<8x8xf32>
    %236 = tpu.matmul %233, %235, %cst_96 {dimension_numbers = #tpu.dot_dimension_numbers<[1], [0], [0], [1], [0, 0, 1, 1], [], []>} : vector<8x8xf32>, vector<8x8xf32>, vector<8x8xf32> -> vector<8x8xf32>
    %237 = arith.addf %231, %236 : vector<8x8xf32>
    %238 = vector.extract_strided_slice %225 {offsets = [0, 1, 0], sizes = [1, 8, 8], strides = [1, 1, 1]} : vector<2x9x8xf32> to vector<1x8x8xf32>
    %239 = vector.shape_cast %238 : vector<1x8x8xf32> to vector<8x8xf32>
    %240 = vector.extract_strided_slice %3 {offsets = [8, 0, 0], sizes = [1, 8, 8], strides = [1, 1, 1]} : vector<9x8x8xf32> to vector<1x8x8xf32>
    %241 = vector.shape_cast %240 : vector<1x8x8xf32> to vector<8x8xf32>
    %cst_97 = arith.constant dense<0.000000e+00> : vector<8x8xf32>
    %242 = tpu.matmul %239, %241, %cst_97 {dimension_numbers = #tpu.dot_dimension_numbers<[1], [0], [0], [1], [0, 0, 1, 1], [], []>} : vector<8x8xf32>, vector<8x8xf32>, vector<8x8xf32> -> vector<8x8xf32>
    %243 = arith.addf %237, %242 : vector<8x8xf32>
    %cst_98 = arith.constant dense<0.000000e+00> : vector<8xf32>
    %244 = vector.multi_reduction <add>, %243, %cst_98 [0] : vector<8x8xf32> to vector<8xf32>
    %245 = arith.addf %164, %244 : vector<8xf32>
    %246 = arith.mulf %243, %243 : vector<8x8xf32>
    %cst_99 = arith.constant dense<0.000000e+00> : vector<8xf32>
    %247 = vector.multi_reduction <add>, %246, %cst_99 [0] : vector<8x8xf32> to vector<8xf32>
    %248 = arith.addf %167, %247 : vector<8xf32>
    %cst_100 = arith.constant 0.000000e+00 : f32
    %249 = vector.broadcast %cst_100 : f32 to vector<8x8xf32>
    %c8_i32_101 = arith.constant 8 : i32
    %250 = arith.muli %arg1, %c8_i32_101 : i32
    %c3_i32 = arith.constant 3 : i32
    %251 = arith.addi %250, %c3_i32 : i32
    %c2_i32_102 = arith.constant 2 : i32
    %252 = arith.muli %251, %c2_i32_102 : i32
    %c0_i32_103 = arith.constant 0 : i32
    %253 = arith.addi %252, %c0_i32_103 : i32
    %254 = arith.index_cast %253 : i32 to index
    %c0_104 = arith.constant 0 : index
    %c0_105 = arith.constant 0 : index
    %c0_106 = arith.constant 0 : index
    %255 = vector.load %arg2[%254, %c0_104, %c0_105, %c0_106] : memref<18x2x9x8xf32, #tpu.memory_space<vmem>>, vector<1x2x9x8xf32>
    %256 = vector.shape_cast %255 : vector<1x2x9x8xf32> to vector<2x9x8xf32>
    %257 = vector.extract_strided_slice %256 {offsets = [0, 0, 0], sizes = [1, 8, 8], strides = [1, 1, 1]} : vector<2x9x8xf32> to vector<1x8x8xf32>
    %258 = vector.shape_cast %257 : vector<1x8x8xf32> to vector<8x8xf32>
    %259 = vector.extract_strided_slice %3 {offsets = [0, 0, 0], sizes = [1, 8, 8], strides = [1, 1, 1]} : vector<9x8x8xf32> to vector<1x8x8xf32>
    %260 = vector.shape_cast %259 : vector<1x8x8xf32> to vector<8x8xf32>
    %cst_107 = arith.constant dense<0.000000e+00> : vector<8x8xf32>
    %261 = tpu.matmul %258, %260, %cst_107 {dimension_numbers = #tpu.dot_dimension_numbers<[1], [0], [0], [1], [0, 0, 1, 1], [], []>} : vector<8x8xf32>, vector<8x8xf32>, vector<8x8xf32> -> vector<8x8xf32>
    %262 = arith.addf %249, %261 : vector<8x8xf32>
    %263 = vector.extract_strided_slice %256 {offsets = [1, 0, 0], sizes = [1, 8, 8], strides = [1, 1, 1]} : vector<2x9x8xf32> to vector<1x8x8xf32>
    %264 = vector.shape_cast %263 : vector<1x8x8xf32> to vector<8x8xf32>
    %265 = vector.extract_strided_slice %3 {offsets = [1, 0, 0], sizes = [1, 8, 8], strides = [1, 1, 1]} : vector<9x8x8xf32> to vector<1x8x8xf32>
    %266 = vector.shape_cast %265 : vector<1x8x8xf32> to vector<8x8xf32>
    %cst_108 = arith.constant dense<0.000000e+00> : vector<8x8xf32>
    %267 = tpu.matmul %264, %266, %cst_108 {dimension_numbers = #tpu.dot_dimension_numbers<[1], [0], [0], [1], [0, 0, 1, 1], [], []>} : vector<8x8xf32>, vector<8x8xf32>, vector<8x8xf32> -> vector<8x8xf32>
    %268 = arith.addf %262, %267 : vector<8x8xf32>
    %269 = vector.extract_strided_slice %256 {offsets = [0, 1, 0], sizes = [1, 8, 8], strides = [1, 1, 1]} : vector<2x9x8xf32> to vector<1x8x8xf32>
    %270 = vector.shape_cast %269 : vector<1x8x8xf32> to vector<8x8xf32>
    %271 = vector.extract_strided_slice %3 {offsets = [2, 0, 0], sizes = [1, 8, 8], strides = [1, 1, 1]} : vector<9x8x8xf32> to vector<1x8x8xf32>
    %272 = vector.shape_cast %271 : vector<1x8x8xf32> to vector<8x8xf32>
    %cst_109 = arith.constant dense<0.000000e+00> : vector<8x8xf32>
    %273 = tpu.matmul %270, %272, %cst_109 {dimension_numbers = #tpu.dot_dimension_numbers<[1], [0], [0], [1], [0, 0, 1, 1], [], []>} : vector<8x8xf32>, vector<8x8xf32>, vector<8x8xf32> -> vector<8x8xf32>
    %274 = arith.addf %268, %273 : vector<8x8xf32>
    %c8_i32_110 = arith.constant 8 : i32
    %275 = arith.muli %arg1, %c8_i32_110 : i32
    %c3_i32_111 = arith.constant 3 : i32
    %276 = arith.addi %275, %c3_i32_111 : i32
    %c2_i32_112 = arith.constant 2 : i32
    %277 = arith.muli %276, %c2_i32_112 : i32
    %c1_i32_113 = arith.constant 1 : i32
    %278 = arith.addi %277, %c1_i32_113 : i32
    %279 = arith.index_cast %278 : i32 to index
    %c0_114 = arith.constant 0 : index
    %c0_115 = arith.constant 0 : index
    %c0_116 = arith.constant 0 : index
    %280 = vector.load %arg2[%279, %c0_114, %c0_115, %c0_116] : memref<18x2x9x8xf32, #tpu.memory_space<vmem>>, vector<1x2x9x8xf32>
    %281 = vector.shape_cast %280 : vector<1x2x9x8xf32> to vector<2x9x8xf32>
    %282 = vector.extract_strided_slice %281 {offsets = [0, 0, 0], sizes = [1, 8, 8], strides = [1, 1, 1]} : vector<2x9x8xf32> to vector<1x8x8xf32>
    %283 = vector.shape_cast %282 : vector<1x8x8xf32> to vector<8x8xf32>
    %284 = vector.extract_strided_slice %3 {offsets = [3, 0, 0], sizes = [1, 8, 8], strides = [1, 1, 1]} : vector<9x8x8xf32> to vector<1x8x8xf32>
    %285 = vector.shape_cast %284 : vector<1x8x8xf32> to vector<8x8xf32>
    %cst_117 = arith.constant dense<0.000000e+00> : vector<8x8xf32>
    %286 = tpu.matmul %283, %285, %cst_117 {dimension_numbers = #tpu.dot_dimension_numbers<[1], [0], [0], [1], [0, 0, 1, 1], [], []>} : vector<8x8xf32>, vector<8x8xf32>, vector<8x8xf32> -> vector<8x8xf32>
    %287 = arith.addf %274, %286 : vector<8x8xf32>
    %288 = vector.extract_strided_slice %281 {offsets = [1, 0, 0], sizes = [1, 8, 8], strides = [1, 1, 1]} : vector<2x9x8xf32> to vector<1x8x8xf32>
    %289 = vector.shape_cast %288 : vector<1x8x8xf32> to vector<8x8xf32>
    %290 = vector.extract_strided_slice %3 {offsets = [4, 0, 0], sizes = [1, 8, 8], strides = [1, 1, 1]} : vector<9x8x8xf32> to vector<1x8x8xf32>
    %291 = vector.shape_cast %290 : vector<1x8x8xf32> to vector<8x8xf32>
    %cst_118 = arith.constant dense<0.000000e+00> : vector<8x8xf32>
    %292 = tpu.matmul %289, %291, %cst_118 {dimension_numbers = #tpu.dot_dimension_numbers<[1], [0], [0], [1], [0, 0, 1, 1], [], []>} : vector<8x8xf32>, vector<8x8xf32>, vector<8x8xf32> -> vector<8x8xf32>
    %293 = arith.addf %287, %292 : vector<8x8xf32>
    %294 = vector.extract_strided_slice %281 {offsets = [0, 1, 0], sizes = [1, 8, 8], strides = [1, 1, 1]} : vector<2x9x8xf32> to vector<1x8x8xf32>
    %295 = vector.shape_cast %294 : vector<1x8x8xf32> to vector<8x8xf32>
    %296 = vector.extract_strided_slice %3 {offsets = [5, 0, 0], sizes = [1, 8, 8], strides = [1, 1, 1]} : vector<9x8x8xf32> to vector<1x8x8xf32>
    %297 = vector.shape_cast %296 : vector<1x8x8xf32> to vector<8x8xf32>
    %cst_119 = arith.constant dense<0.000000e+00> : vector<8x8xf32>
    %298 = tpu.matmul %295, %297, %cst_119 {dimension_numbers = #tpu.dot_dimension_numbers<[1], [0], [0], [1], [0, 0, 1, 1], [], []>} : vector<8x8xf32>, vector<8x8xf32>, vector<8x8xf32> -> vector<8x8xf32>
    %299 = arith.addf %293, %298 : vector<8x8xf32>
    %c8_i32_120 = arith.constant 8 : i32
    %300 = arith.muli %arg1, %c8_i32_120 : i32
    %c3_i32_121 = arith.constant 3 : i32
    %301 = arith.addi %300, %c3_i32_121 : i32
    %c2_i32_122 = arith.constant 2 : i32
    %302 = arith.muli %301, %c2_i32_122 : i32
    %c2_i32_123 = arith.constant 2 : i32
    %303 = arith.addi %302, %c2_i32_123 : i32
    %304 = arith.index_cast %303 : i32 to index
    %c0_124 = arith.constant 0 : index
    %c0_125 = arith.constant 0 : index
    %c0_126 = arith.constant 0 : index
    %305 = vector.load %arg2[%304, %c0_124, %c0_125, %c0_126] : memref<18x2x9x8xf32, #tpu.memory_space<vmem>>, vector<1x2x9x8xf32>
    %306 = vector.shape_cast %305 : vector<1x2x9x8xf32> to vector<2x9x8xf32>
    %307 = vector.extract_strided_slice %306 {offsets = [0, 0, 0], sizes = [1, 8, 8], strides = [1, 1, 1]} : vector<2x9x8xf32> to vector<1x8x8xf32>
    %308 = vector.shape_cast %307 : vector<1x8x8xf32> to vector<8x8xf32>
    %309 = vector.extract_strided_slice %3 {offsets = [6, 0, 0], sizes = [1, 8, 8], strides = [1, 1, 1]} : vector<9x8x8xf32> to vector<1x8x8xf32>
    %310 = vector.shape_cast %309 : vector<1x8x8xf32> to vector<8x8xf32>
    %cst_127 = arith.constant dense<0.000000e+00> : vector<8x8xf32>
    %311 = tpu.matmul %308, %310, %cst_127 {dimension_numbers = #tpu.dot_dimension_numbers<[1], [0], [0], [1], [0, 0, 1, 1], [], []>} : vector<8x8xf32>, vector<8x8xf32>, vector<8x8xf32> -> vector<8x8xf32>
    %312 = arith.addf %299, %311 : vector<8x8xf32>
    %313 = vector.extract_strided_slice %306 {offsets = [1, 0, 0], sizes = [1, 8, 8], strides = [1, 1, 1]} : vector<2x9x8xf32> to vector<1x8x8xf32>
    %314 = vector.shape_cast %313 : vector<1x8x8xf32> to vector<8x8xf32>
    %315 = vector.extract_strided_slice %3 {offsets = [7, 0, 0], sizes = [1, 8, 8], strides = [1, 1, 1]} : vector<9x8x8xf32> to vector<1x8x8xf32>
    %316 = vector.shape_cast %315 : vector<1x8x8xf32> to vector<8x8xf32>
    %cst_128 = arith.constant dense<0.000000e+00> : vector<8x8xf32>
    %317 = tpu.matmul %314, %316, %cst_128 {dimension_numbers = #tpu.dot_dimension_numbers<[1], [0], [0], [1], [0, 0, 1, 1], [], []>} : vector<8x8xf32>, vector<8x8xf32>, vector<8x8xf32> -> vector<8x8xf32>
    %318 = arith.addf %312, %317 : vector<8x8xf32>
    %319 = vector.extract_strided_slice %306 {offsets = [0, 1, 0], sizes = [1, 8, 8], strides = [1, 1, 1]} : vector<2x9x8xf32> to vector<1x8x8xf32>
    %320 = vector.shape_cast %319 : vector<1x8x8xf32> to vector<8x8xf32>
    %321 = vector.extract_strided_slice %3 {offsets = [8, 0, 0], sizes = [1, 8, 8], strides = [1, 1, 1]} : vector<9x8x8xf32> to vector<1x8x8xf32>
    %322 = vector.shape_cast %321 : vector<1x8x8xf32> to vector<8x8xf32>
    %cst_129 = arith.constant dense<0.000000e+00> : vector<8x8xf32>
    %323 = tpu.matmul %320, %322, %cst_129 {dimension_numbers = #tpu.dot_dimension_numbers<[1], [0], [0], [1], [0, 0, 1, 1], [], []>} : vector<8x8xf32>, vector<8x8xf32>, vector<8x8xf32> -> vector<8x8xf32>
    %324 = arith.addf %318, %323 : vector<8x8xf32>
    %cst_130 = arith.constant dense<0.000000e+00> : vector<8xf32>
    %325 = vector.multi_reduction <add>, %324, %cst_130 [0] : vector<8x8xf32> to vector<8xf32>
    %326 = arith.addf %245, %325 : vector<8xf32>
    %327 = arith.mulf %324, %324 : vector<8x8xf32>
    %cst_131 = arith.constant dense<0.000000e+00> : vector<8xf32>
    %328 = vector.multi_reduction <add>, %327, %cst_131 [0] : vector<8x8xf32> to vector<8xf32>
    %329 = arith.addf %248, %328 : vector<8xf32>
    %cst_132 = arith.constant 0.000000e+00 : f32
    %330 = vector.broadcast %cst_132 : f32 to vector<8x8xf32>
    %c8_i32_133 = arith.constant 8 : i32
    %331 = arith.muli %arg1, %c8_i32_133 : i32
    %c4_i32 = arith.constant 4 : i32
    %332 = arith.addi %331, %c4_i32 : i32
    %c2_i32_134 = arith.constant 2 : i32
    %333 = arith.muli %332, %c2_i32_134 : i32
    %c0_i32_135 = arith.constant 0 : i32
    %334 = arith.addi %333, %c0_i32_135 : i32
    %335 = arith.index_cast %334 : i32 to index
    %c0_136 = arith.constant 0 : index
    %c0_137 = arith.constant 0 : index
    %c0_138 = arith.constant 0 : index
    %336 = vector.load %arg2[%335, %c0_136, %c0_137, %c0_138] : memref<18x2x9x8xf32, #tpu.memory_space<vmem>>, vector<1x2x9x8xf32>
    %337 = vector.shape_cast %336 : vector<1x2x9x8xf32> to vector<2x9x8xf32>
    %338 = vector.extract_strided_slice %337 {offsets = [0, 0, 0], sizes = [1, 8, 8], strides = [1, 1, 1]} : vector<2x9x8xf32> to vector<1x8x8xf32>
    %339 = vector.shape_cast %338 : vector<1x8x8xf32> to vector<8x8xf32>
    %340 = vector.extract_strided_slice %3 {offsets = [0, 0, 0], sizes = [1, 8, 8], strides = [1, 1, 1]} : vector<9x8x8xf32> to vector<1x8x8xf32>
    %341 = vector.shape_cast %340 : vector<1x8x8xf32> to vector<8x8xf32>
    %cst_139 = arith.constant dense<0.000000e+00> : vector<8x8xf32>
    %342 = tpu.matmul %339, %341, %cst_139 {dimension_numbers = #tpu.dot_dimension_numbers<[1], [0], [0], [1], [0, 0, 1, 1], [], []>} : vector<8x8xf32>, vector<8x8xf32>, vector<8x8xf32> -> vector<8x8xf32>
    %343 = arith.addf %330, %342 : vector<8x8xf32>
    %344 = vector.extract_strided_slice %337 {offsets = [1, 0, 0], sizes = [1, 8, 8], strides = [1, 1, 1]} : vector<2x9x8xf32> to vector<1x8x8xf32>
    %345 = vector.shape_cast %344 : vector<1x8x8xf32> to vector<8x8xf32>
    %346 = vector.extract_strided_slice %3 {offsets = [1, 0, 0], sizes = [1, 8, 8], strides = [1, 1, 1]} : vector<9x8x8xf32> to vector<1x8x8xf32>
    %347 = vector.shape_cast %346 : vector<1x8x8xf32> to vector<8x8xf32>
    %cst_140 = arith.constant dense<0.000000e+00> : vector<8x8xf32>
    %348 = tpu.matmul %345, %347, %cst_140 {dimension_numbers = #tpu.dot_dimension_numbers<[1], [0], [0], [1], [0, 0, 1, 1], [], []>} : vector<8x8xf32>, vector<8x8xf32>, vector<8x8xf32> -> vector<8x8xf32>
    %349 = arith.addf %343, %348 : vector<8x8xf32>
    %350 = vector.extract_strided_slice %337 {offsets = [0, 1, 0], sizes = [1, 8, 8], strides = [1, 1, 1]} : vector<2x9x8xf32> to vector<1x8x8xf32>
    %351 = vector.shape_cast %350 : vector<1x8x8xf32> to vector<8x8xf32>
    %352 = vector.extract_strided_slice %3 {offsets = [2, 0, 0], sizes = [1, 8, 8], strides = [1, 1, 1]} : vector<9x8x8xf32> to vector<1x8x8xf32>
    %353 = vector.shape_cast %352 : vector<1x8x8xf32> to vector<8x8xf32>
    %cst_141 = arith.constant dense<0.000000e+00> : vector<8x8xf32>
    %354 = tpu.matmul %351, %353, %cst_141 {dimension_numbers = #tpu.dot_dimension_numbers<[1], [0], [0], [1], [0, 0, 1, 1], [], []>} : vector<8x8xf32>, vector<8x8xf32>, vector<8x8xf32> -> vector<8x8xf32>
    %355 = arith.addf %349, %354 : vector<8x8xf32>
    %c8_i32_142 = arith.constant 8 : i32
    %356 = arith.muli %arg1, %c8_i32_142 : i32
    %c4_i32_143 = arith.constant 4 : i32
    %357 = arith.addi %356, %c4_i32_143 : i32
    %c2_i32_144 = arith.constant 2 : i32
    %358 = arith.muli %357, %c2_i32_144 : i32
    %c1_i32_145 = arith.constant 1 : i32
    %359 = arith.addi %358, %c1_i32_145 : i32
    %360 = arith.index_cast %359 : i32 to index
    %c0_146 = arith.constant 0 : index
    %c0_147 = arith.constant 0 : index
    %c0_148 = arith.constant 0 : index
    %361 = vector.load %arg2[%360, %c0_146, %c0_147, %c0_148] : memref<18x2x9x8xf32, #tpu.memory_space<vmem>>, vector<1x2x9x8xf32>
    %362 = vector.shape_cast %361 : vector<1x2x9x8xf32> to vector<2x9x8xf32>
    %363 = vector.extract_strided_slice %362 {offsets = [0, 0, 0], sizes = [1, 8, 8], strides = [1, 1, 1]} : vector<2x9x8xf32> to vector<1x8x8xf32>
    %364 = vector.shape_cast %363 : vector<1x8x8xf32> to vector<8x8xf32>
    %365 = vector.extract_strided_slice %3 {offsets = [3, 0, 0], sizes = [1, 8, 8], strides = [1, 1, 1]} : vector<9x8x8xf32> to vector<1x8x8xf32>
    %366 = vector.shape_cast %365 : vector<1x8x8xf32> to vector<8x8xf32>
    %cst_149 = arith.constant dense<0.000000e+00> : vector<8x8xf32>
    %367 = tpu.matmul %364, %366, %cst_149 {dimension_numbers = #tpu.dot_dimension_numbers<[1], [0], [0], [1], [0, 0, 1, 1], [], []>} : vector<8x8xf32>, vector<8x8xf32>, vector<8x8xf32> -> vector<8x8xf32>
    %368 = arith.addf %355, %367 : vector<8x8xf32>
    %369 = vector.extract_strided_slice %362 {offsets = [1, 0, 0], sizes = [1, 8, 8], strides = [1, 1, 1]} : vector<2x9x8xf32> to vector<1x8x8xf32>
    %370 = vector.shape_cast %369 : vector<1x8x8xf32> to vector<8x8xf32>
    %371 = vector.extract_strided_slice %3 {offsets = [4, 0, 0], sizes = [1, 8, 8], strides = [1, 1, 1]} : vector<9x8x8xf32> to vector<1x8x8xf32>
    %372 = vector.shape_cast %371 : vector<1x8x8xf32> to vector<8x8xf32>
    %cst_150 = arith.constant dense<0.000000e+00> : vector<8x8xf32>
    %373 = tpu.matmul %370, %372, %cst_150 {dimension_numbers = #tpu.dot_dimension_numbers<[1], [0], [0], [1], [0, 0, 1, 1], [], []>} : vector<8x8xf32>, vector<8x8xf32>, vector<8x8xf32> -> vector<8x8xf32>
    %374 = arith.addf %368, %373 : vector<8x8xf32>
    %375 = vector.extract_strided_slice %362 {offsets = [0, 1, 0], sizes = [1, 8, 8], strides = [1, 1, 1]} : vector<2x9x8xf32> to vector<1x8x8xf32>
    %376 = vector.shape_cast %375 : vector<1x8x8xf32> to vector<8x8xf32>
    %377 = vector.extract_strided_slice %3 {offsets = [5, 0, 0], sizes = [1, 8, 8], strides = [1, 1, 1]} : vector<9x8x8xf32> to vector<1x8x8xf32>
    %378 = vector.shape_cast %377 : vector<1x8x8xf32> to vector<8x8xf32>
    %cst_151 = arith.constant dense<0.000000e+00> : vector<8x8xf32>
    %379 = tpu.matmul %376, %378, %cst_151 {dimension_numbers = #tpu.dot_dimension_numbers<[1], [0], [0], [1], [0, 0, 1, 1], [], []>} : vector<8x8xf32>, vector<8x8xf32>, vector<8x8xf32> -> vector<8x8xf32>
    %380 = arith.addf %374, %379 : vector<8x8xf32>
    %c8_i32_152 = arith.constant 8 : i32
    %381 = arith.muli %arg1, %c8_i32_152 : i32
    %c4_i32_153 = arith.constant 4 : i32
    %382 = arith.addi %381, %c4_i32_153 : i32
    %c2_i32_154 = arith.constant 2 : i32
    %383 = arith.muli %382, %c2_i32_154 : i32
    %c2_i32_155 = arith.constant 2 : i32
    %384 = arith.addi %383, %c2_i32_155 : i32
    %385 = arith.index_cast %384 : i32 to index
    %c0_156 = arith.constant 0 : index
    %c0_157 = arith.constant 0 : index
    %c0_158 = arith.constant 0 : index
    %386 = vector.load %arg2[%385, %c0_156, %c0_157, %c0_158] : memref<18x2x9x8xf32, #tpu.memory_space<vmem>>, vector<1x2x9x8xf32>
    %387 = vector.shape_cast %386 : vector<1x2x9x8xf32> to vector<2x9x8xf32>
    %388 = vector.extract_strided_slice %387 {offsets = [0, 0, 0], sizes = [1, 8, 8], strides = [1, 1, 1]} : vector<2x9x8xf32> to vector<1x8x8xf32>
    %389 = vector.shape_cast %388 : vector<1x8x8xf32> to vector<8x8xf32>
    %390 = vector.extract_strided_slice %3 {offsets = [6, 0, 0], sizes = [1, 8, 8], strides = [1, 1, 1]} : vector<9x8x8xf32> to vector<1x8x8xf32>
    %391 = vector.shape_cast %390 : vector<1x8x8xf32> to vector<8x8xf32>
    %cst_159 = arith.constant dense<0.000000e+00> : vector<8x8xf32>
    %392 = tpu.matmul %389, %391, %cst_159 {dimension_numbers = #tpu.dot_dimension_numbers<[1], [0], [0], [1], [0, 0, 1, 1], [], []>} : vector<8x8xf32>, vector<8x8xf32>, vector<8x8xf32> -> vector<8x8xf32>
    %393 = arith.addf %380, %392 : vector<8x8xf32>
    %394 = vector.extract_strided_slice %387 {offsets = [1, 0, 0], sizes = [1, 8, 8], strides = [1, 1, 1]} : vector<2x9x8xf32> to vector<1x8x8xf32>
    %395 = vector.shape_cast %394 : vector<1x8x8xf32> to vector<8x8xf32>
    %396 = vector.extract_strided_slice %3 {offsets = [7, 0, 0], sizes = [1, 8, 8], strides = [1, 1, 1]} : vector<9x8x8xf32> to vector<1x8x8xf32>
    %397 = vector.shape_cast %396 : vector<1x8x8xf32> to vector<8x8xf32>
    %cst_160 = arith.constant dense<0.000000e+00> : vector<8x8xf32>
    %398 = tpu.matmul %395, %397, %cst_160 {dimension_numbers = #tpu.dot_dimension_numbers<[1], [0], [0], [1], [0, 0, 1, 1], [], []>} : vector<8x8xf32>, vector<8x8xf32>, vector<8x8xf32> -> vector<8x8xf32>
    %399 = arith.addf %393, %398 : vector<8x8xf32>
    %400 = vector.extract_strided_slice %387 {offsets = [0, 1, 0], sizes = [1, 8, 8], strides = [1, 1, 1]} : vector<2x9x8xf32> to vector<1x8x8xf32>
    %401 = vector.shape_cast %400 : vector<1x8x8xf32> to vector<8x8xf32>
    %402 = vector.extract_strided_slice %3 {offsets = [8, 0, 0], sizes = [1, 8, 8], strides = [1, 1, 1]} : vector<9x8x8xf32> to vector<1x8x8xf32>
    %403 = vector.shape_cast %402 : vector<1x8x8xf32> to vector<8x8xf32>
    %cst_161 = arith.constant dense<0.000000e+00> : vector<8x8xf32>
    %404 = tpu.matmul %401, %403, %cst_161 {dimension_numbers = #tpu.dot_dimension_numbers<[1], [0], [0], [1], [0, 0, 1, 1], [], []>} : vector<8x8xf32>, vector<8x8xf32>, vector<8x8xf32> -> vector<8x8xf32>
    %405 = arith.addf %399, %404 : vector<8x8xf32>
    %cst_162 = arith.constant dense<0.000000e+00> : vector<8xf32>
    %406 = vector.multi_reduction <add>, %405, %cst_162 [0] : vector<8x8xf32> to vector<8xf32>
    %407 = arith.addf %326, %406 : vector<8xf32>
    %408 = arith.mulf %405, %405 : vector<8x8xf32>
    %cst_163 = arith.constant dense<0.000000e+00> : vector<8xf32>
    %409 = vector.multi_reduction <add>, %408, %cst_163 [0] : vector<8x8xf32> to vector<8xf32>
    %410 = arith.addf %329, %409 : vector<8xf32>
    %cst_164 = arith.constant 0.000000e+00 : f32
    %411 = vector.broadcast %cst_164 : f32 to vector<8x8xf32>
    %c8_i32_165 = arith.constant 8 : i32
    %412 = arith.muli %arg1, %c8_i32_165 : i32
    %c5_i32 = arith.constant 5 : i32
    %413 = arith.addi %412, %c5_i32 : i32
    %c2_i32_166 = arith.constant 2 : i32
    %414 = arith.muli %413, %c2_i32_166 : i32
    %c0_i32_167 = arith.constant 0 : i32
    %415 = arith.addi %414, %c0_i32_167 : i32
    %416 = arith.index_cast %415 : i32 to index
    %c0_168 = arith.constant 0 : index
    %c0_169 = arith.constant 0 : index
    %c0_170 = arith.constant 0 : index
    %417 = vector.load %arg2[%416, %c0_168, %c0_169, %c0_170] : memref<18x2x9x8xf32, #tpu.memory_space<vmem>>, vector<1x2x9x8xf32>
    %418 = vector.shape_cast %417 : vector<1x2x9x8xf32> to vector<2x9x8xf32>
    %419 = vector.extract_strided_slice %418 {offsets = [0, 0, 0], sizes = [1, 8, 8], strides = [1, 1, 1]} : vector<2x9x8xf32> to vector<1x8x8xf32>
    %420 = vector.shape_cast %419 : vector<1x8x8xf32> to vector<8x8xf32>
    %421 = vector.extract_strided_slice %3 {offsets = [0, 0, 0], sizes = [1, 8, 8], strides = [1, 1, 1]} : vector<9x8x8xf32> to vector<1x8x8xf32>
    %422 = vector.shape_cast %421 : vector<1x8x8xf32> to vector<8x8xf32>
    %cst_171 = arith.constant dense<0.000000e+00> : vector<8x8xf32>
    %423 = tpu.matmul %420, %422, %cst_171 {dimension_numbers = #tpu.dot_dimension_numbers<[1], [0], [0], [1], [0, 0, 1, 1], [], []>} : vector<8x8xf32>, vector<8x8xf32>, vector<8x8xf32> -> vector<8x8xf32>
    %424 = arith.addf %411, %423 : vector<8x8xf32>
    %425 = vector.extract_strided_slice %418 {offsets = [1, 0, 0], sizes = [1, 8, 8], strides = [1, 1, 1]} : vector<2x9x8xf32> to vector<1x8x8xf32>
    %426 = vector.shape_cast %425 : vector<1x8x8xf32> to vector<8x8xf32>
    %427 = vector.extract_strided_slice %3 {offsets = [1, 0, 0], sizes = [1, 8, 8], strides = [1, 1, 1]} : vector<9x8x8xf32> to vector<1x8x8xf32>
    %428 = vector.shape_cast %427 : vector<1x8x8xf32> to vector<8x8xf32>
    %cst_172 = arith.constant dense<0.000000e+00> : vector<8x8xf32>
    %429 = tpu.matmul %426, %428, %cst_172 {dimension_numbers = #tpu.dot_dimension_numbers<[1], [0], [0], [1], [0, 0, 1, 1], [], []>} : vector<8x8xf32>, vector<8x8xf32>, vector<8x8xf32> -> vector<8x8xf32>
    %430 = arith.addf %424, %429 : vector<8x8xf32>
    %431 = vector.extract_strided_slice %418 {offsets = [0, 1, 0], sizes = [1, 8, 8], strides = [1, 1, 1]} : vector<2x9x8xf32> to vector<1x8x8xf32>
    %432 = vector.shape_cast %431 : vector<1x8x8xf32> to vector<8x8xf32>
    %433 = vector.extract_strided_slice %3 {offsets = [2, 0, 0], sizes = [1, 8, 8], strides = [1, 1, 1]} : vector<9x8x8xf32> to vector<1x8x8xf32>
    %434 = vector.shape_cast %433 : vector<1x8x8xf32> to vector<8x8xf32>
    %cst_173 = arith.constant dense<0.000000e+00> : vector<8x8xf32>
    %435 = tpu.matmul %432, %434, %cst_173 {dimension_numbers = #tpu.dot_dimension_numbers<[1], [0], [0], [1], [0, 0, 1, 1], [], []>} : vector<8x8xf32>, vector<8x8xf32>, vector<8x8xf32> -> vector<8x8xf32>
    %436 = arith.addf %430, %435 : vector<8x8xf32>
    %c8_i32_174 = arith.constant 8 : i32
    %437 = arith.muli %arg1, %c8_i32_174 : i32
    %c5_i32_175 = arith.constant 5 : i32
    %438 = arith.addi %437, %c5_i32_175 : i32
    %c2_i32_176 = arith.constant 2 : i32
    %439 = arith.muli %438, %c2_i32_176 : i32
    %c1_i32_177 = arith.constant 1 : i32
    %440 = arith.addi %439, %c1_i32_177 : i32
    %441 = arith.index_cast %440 : i32 to index
    %c0_178 = arith.constant 0 : index
    %c0_179 = arith.constant 0 : index
    %c0_180 = arith.constant 0 : index
    %442 = vector.load %arg2[%441, %c0_178, %c0_179, %c0_180] : memref<18x2x9x8xf32, #tpu.memory_space<vmem>>, vector<1x2x9x8xf32>
    %443 = vector.shape_cast %442 : vector<1x2x9x8xf32> to vector<2x9x8xf32>
    %444 = vector.extract_strided_slice %443 {offsets = [0, 0, 0], sizes = [1, 8, 8], strides = [1, 1, 1]} : vector<2x9x8xf32> to vector<1x8x8xf32>
    %445 = vector.shape_cast %444 : vector<1x8x8xf32> to vector<8x8xf32>
    %446 = vector.extract_strided_slice %3 {offsets = [3, 0, 0], sizes = [1, 8, 8], strides = [1, 1, 1]} : vector<9x8x8xf32> to vector<1x8x8xf32>
    %447 = vector.shape_cast %446 : vector<1x8x8xf32> to vector<8x8xf32>
    %cst_181 = arith.constant dense<0.000000e+00> : vector<8x8xf32>
    %448 = tpu.matmul %445, %447, %cst_181 {dimension_numbers = #tpu.dot_dimension_numbers<[1], [0], [0], [1], [0, 0, 1, 1], [], []>} : vector<8x8xf32>, vector<8x8xf32>, vector<8x8xf32> -> vector<8x8xf32>
    %449 = arith.addf %436, %448 : vector<8x8xf32>
    %450 = vector.extract_strided_slice %443 {offsets = [1, 0, 0], sizes = [1, 8, 8], strides = [1, 1, 1]} : vector<2x9x8xf32> to vector<1x8x8xf32>
    %451 = vector.shape_cast %450 : vector<1x8x8xf32> to vector<8x8xf32>
    %452 = vector.extract_strided_slice %3 {offsets = [4, 0, 0], sizes = [1, 8, 8], strides = [1, 1, 1]} : vector<9x8x8xf32> to vector<1x8x8xf32>
    %453 = vector.shape_cast %452 : vector<1x8x8xf32> to vector<8x8xf32>
    %cst_182 = arith.constant dense<0.000000e+00> : vector<8x8xf32>
    %454 = tpu.matmul %451, %453, %cst_182 {dimension_numbers = #tpu.dot_dimension_numbers<[1], [0], [0], [1], [0, 0, 1, 1], [], []>} : vector<8x8xf32>, vector<8x8xf32>, vector<8x8xf32> -> vector<8x8xf32>
    %455 = arith.addf %449, %454 : vector<8x8xf32>
    %456 = vector.extract_strided_slice %443 {offsets = [0, 1, 0], sizes = [1, 8, 8], strides = [1, 1, 1]} : vector<2x9x8xf32> to vector<1x8x8xf32>
    %457 = vector.shape_cast %456 : vector<1x8x8xf32> to vector<8x8xf32>
    %458 = vector.extract_strided_slice %3 {offsets = [5, 0, 0], sizes = [1, 8, 8], strides = [1, 1, 1]} : vector<9x8x8xf32> to vector<1x8x8xf32>
    %459 = vector.shape_cast %458 : vector<1x8x8xf32> to vector<8x8xf32>
    %cst_183 = arith.constant dense<0.000000e+00> : vector<8x8xf32>
    %460 = tpu.matmul %457, %459, %cst_183 {dimension_numbers = #tpu.dot_dimension_numbers<[1], [0], [0], [1], [0, 0, 1, 1], [], []>} : vector<8x8xf32>, vector<8x8xf32>, vector<8x8xf32> -> vector<8x8xf32>
    %461 = arith.addf %455, %460 : vector<8x8xf32>
    %c8_i32_184 = arith.constant 8 : i32
    %462 = arith.muli %arg1, %c8_i32_184 : i32
    %c5_i32_185 = arith.constant 5 : i32
    %463 = arith.addi %462, %c5_i32_185 : i32
    %c2_i32_186 = arith.constant 2 : i32
    %464 = arith.muli %463, %c2_i32_186 : i32
    %c2_i32_187 = arith.constant 2 : i32
    %465 = arith.addi %464, %c2_i32_187 : i32
    %466 = arith.index_cast %465 : i32 to index
    %c0_188 = arith.constant 0 : index
    %c0_189 = arith.constant 0 : index
    %c0_190 = arith.constant 0 : index
    %467 = vector.load %arg2[%466, %c0_188, %c0_189, %c0_190] : memref<18x2x9x8xf32, #tpu.memory_space<vmem>>, vector<1x2x9x8xf32>
    %468 = vector.shape_cast %467 : vector<1x2x9x8xf32> to vector<2x9x8xf32>
    %469 = vector.extract_strided_slice %468 {offsets = [0, 0, 0], sizes = [1, 8, 8], strides = [1, 1, 1]} : vector<2x9x8xf32> to vector<1x8x8xf32>
    %470 = vector.shape_cast %469 : vector<1x8x8xf32> to vector<8x8xf32>
    %471 = vector.extract_strided_slice %3 {offsets = [6, 0, 0], sizes = [1, 8, 8], strides = [1, 1, 1]} : vector<9x8x8xf32> to vector<1x8x8xf32>
    %472 = vector.shape_cast %471 : vector<1x8x8xf32> to vector<8x8xf32>
    %cst_191 = arith.constant dense<0.000000e+00> : vector<8x8xf32>
    %473 = tpu.matmul %470, %472, %cst_191 {dimension_numbers = #tpu.dot_dimension_numbers<[1], [0], [0], [1], [0, 0, 1, 1], [], []>} : vector<8x8xf32>, vector<8x8xf32>, vector<8x8xf32> -> vector<8x8xf32>
    %474 = arith.addf %461, %473 : vector<8x8xf32>
    %475 = vector.extract_strided_slice %468 {offsets = [1, 0, 0], sizes = [1, 8, 8], strides = [1, 1, 1]} : vector<2x9x8xf32> to vector<1x8x8xf32>
    %476 = vector.shape_cast %475 : vector<1x8x8xf32> to vector<8x8xf32>
    %477 = vector.extract_strided_slice %3 {offsets = [7, 0, 0], sizes = [1, 8, 8], strides = [1, 1, 1]} : vector<9x8x8xf32> to vector<1x8x8xf32>
    %478 = vector.shape_cast %477 : vector<1x8x8xf32> to vector<8x8xf32>
    %cst_192 = arith.constant dense<0.000000e+00> : vector<8x8xf32>
    %479 = tpu.matmul %476, %478, %cst_192 {dimension_numbers = #tpu.dot_dimension_numbers<[1], [0], [0], [1], [0, 0, 1, 1], [], []>} : vector<8x8xf32>, vector<8x8xf32>, vector<8x8xf32> -> vector<8x8xf32>
    %480 = arith.addf %474, %479 : vector<8x8xf32>
    %481 = vector.extract_strided_slice %468 {offsets = [0, 1, 0], sizes = [1, 8, 8], strides = [1, 1, 1]} : vector<2x9x8xf32> to vector<1x8x8xf32>
    %482 = vector.shape_cast %481 : vector<1x8x8xf32> to vector<8x8xf32>
    %483 = vector.extract_strided_slice %3 {offsets = [8, 0, 0], sizes = [1, 8, 8], strides = [1, 1, 1]} : vector<9x8x8xf32> to vector<1x8x8xf32>
    %484 = vector.shape_cast %483 : vector<1x8x8xf32> to vector<8x8xf32>
    %cst_193 = arith.constant dense<0.000000e+00> : vector<8x8xf32>
    %485 = tpu.matmul %482, %484, %cst_193 {dimension_numbers = #tpu.dot_dimension_numbers<[1], [0], [0], [1], [0, 0, 1, 1], [], []>} : vector<8x8xf32>, vector<8x8xf32>, vector<8x8xf32> -> vector<8x8xf32>
    %486 = arith.addf %480, %485 : vector<8x8xf32>
    %cst_194 = arith.constant dense<0.000000e+00> : vector<8xf32>
    %487 = vector.multi_reduction <add>, %486, %cst_194 [0] : vector<8x8xf32> to vector<8xf32>
    %488 = arith.addf %407, %487 : vector<8xf32>
    %489 = arith.mulf %486, %486 : vector<8x8xf32>
    %cst_195 = arith.constant dense<0.000000e+00> : vector<8xf32>
    %490 = vector.multi_reduction <add>, %489, %cst_195 [0] : vector<8x8xf32> to vector<8xf32>
    %491 = arith.addf %410, %490 : vector<8xf32>
    %cst_196 = arith.constant 0.000000e+00 : f32
    %492 = vector.broadcast %cst_196 : f32 to vector<8x8xf32>
    %c8_i32_197 = arith.constant 8 : i32
    %493 = arith.muli %arg1, %c8_i32_197 : i32
    %c6_i32 = arith.constant 6 : i32
    %494 = arith.addi %493, %c6_i32 : i32
    %c2_i32_198 = arith.constant 2 : i32
    %495 = arith.muli %494, %c2_i32_198 : i32
    %c0_i32_199 = arith.constant 0 : i32
    %496 = arith.addi %495, %c0_i32_199 : i32
    %497 = arith.index_cast %496 : i32 to index
    %c0_200 = arith.constant 0 : index
    %c0_201 = arith.constant 0 : index
    %c0_202 = arith.constant 0 : index
    %498 = vector.load %arg2[%497, %c0_200, %c0_201, %c0_202] : memref<18x2x9x8xf32, #tpu.memory_space<vmem>>, vector<1x2x9x8xf32>
    %499 = vector.shape_cast %498 : vector<1x2x9x8xf32> to vector<2x9x8xf32>
    %500 = vector.extract_strided_slice %499 {offsets = [0, 0, 0], sizes = [1, 8, 8], strides = [1, 1, 1]} : vector<2x9x8xf32> to vector<1x8x8xf32>
    %501 = vector.shape_cast %500 : vector<1x8x8xf32> to vector<8x8xf32>
    %502 = vector.extract_strided_slice %3 {offsets = [0, 0, 0], sizes = [1, 8, 8], strides = [1, 1, 1]} : vector<9x8x8xf32> to vector<1x8x8xf32>
    %503 = vector.shape_cast %502 : vector<1x8x8xf32> to vector<8x8xf32>
    %cst_203 = arith.constant dense<0.000000e+00> : vector<8x8xf32>
    %504 = tpu.matmul %501, %503, %cst_203 {dimension_numbers = #tpu.dot_dimension_numbers<[1], [0], [0], [1], [0, 0, 1, 1], [], []>} : vector<8x8xf32>, vector<8x8xf32>, vector<8x8xf32> -> vector<8x8xf32>
    %505 = arith.addf %492, %504 : vector<8x8xf32>
    %506 = vector.extract_strided_slice %499 {offsets = [1, 0, 0], sizes = [1, 8, 8], strides = [1, 1, 1]} : vector<2x9x8xf32> to vector<1x8x8xf32>
    %507 = vector.shape_cast %506 : vector<1x8x8xf32> to vector<8x8xf32>
    %508 = vector.extract_strided_slice %3 {offsets = [1, 0, 0], sizes = [1, 8, 8], strides = [1, 1, 1]} : vector<9x8x8xf32> to vector<1x8x8xf32>
    %509 = vector.shape_cast %508 : vector<1x8x8xf32> to vector<8x8xf32>
    %cst_204 = arith.constant dense<0.000000e+00> : vector<8x8xf32>
    %510 = tpu.matmul %507, %509, %cst_204 {dimension_numbers = #tpu.dot_dimension_numbers<[1], [0], [0], [1], [0, 0, 1, 1], [], []>} : vector<8x8xf32>, vector<8x8xf32>, vector<8x8xf32> -> vector<8x8xf32>
    %511 = arith.addf %505, %510 : vector<8x8xf32>
    %512 = vector.extract_strided_slice %499 {offsets = [0, 1, 0], sizes = [1, 8, 8], strides = [1, 1, 1]} : vector<2x9x8xf32> to vector<1x8x8xf32>
    %513 = vector.shape_cast %512 : vector<1x8x8xf32> to vector<8x8xf32>
    %514 = vector.extract_strided_slice %3 {offsets = [2, 0, 0], sizes = [1, 8, 8], strides = [1, 1, 1]} : vector<9x8x8xf32> to vector<1x8x8xf32>
    %515 = vector.shape_cast %514 : vector<1x8x8xf32> to vector<8x8xf32>
    %cst_205 = arith.constant dense<0.000000e+00> : vector<8x8xf32>
    %516 = tpu.matmul %513, %515, %cst_205 {dimension_numbers = #tpu.dot_dimension_numbers<[1], [0], [0], [1], [0, 0, 1, 1], [], []>} : vector<8x8xf32>, vector<8x8xf32>, vector<8x8xf32> -> vector<8x8xf32>
    %517 = arith.addf %511, %516 : vector<8x8xf32>
    %c8_i32_206 = arith.constant 8 : i32
    %518 = arith.muli %arg1, %c8_i32_206 : i32
    %c6_i32_207 = arith.constant 6 : i32
    %519 = arith.addi %518, %c6_i32_207 : i32
    %c2_i32_208 = arith.constant 2 : i32
    %520 = arith.muli %519, %c2_i32_208 : i32
    %c1_i32_209 = arith.constant 1 : i32
    %521 = arith.addi %520, %c1_i32_209 : i32
    %522 = arith.index_cast %521 : i32 to index
    %c0_210 = arith.constant 0 : index
    %c0_211 = arith.constant 0 : index
    %c0_212 = arith.constant 0 : index
    %523 = vector.load %arg2[%522, %c0_210, %c0_211, %c0_212] : memref<18x2x9x8xf32, #tpu.memory_space<vmem>>, vector<1x2x9x8xf32>
    %524 = vector.shape_cast %523 : vector<1x2x9x8xf32> to vector<2x9x8xf32>
    %525 = vector.extract_strided_slice %524 {offsets = [0, 0, 0], sizes = [1, 8, 8], strides = [1, 1, 1]} : vector<2x9x8xf32> to vector<1x8x8xf32>
    %526 = vector.shape_cast %525 : vector<1x8x8xf32> to vector<8x8xf32>
    %527 = vector.extract_strided_slice %3 {offsets = [3, 0, 0], sizes = [1, 8, 8], strides = [1, 1, 1]} : vector<9x8x8xf32> to vector<1x8x8xf32>
    %528 = vector.shape_cast %527 : vector<1x8x8xf32> to vector<8x8xf32>
    %cst_213 = arith.constant dense<0.000000e+00> : vector<8x8xf32>
    %529 = tpu.matmul %526, %528, %cst_213 {dimension_numbers = #tpu.dot_dimension_numbers<[1], [0], [0], [1], [0, 0, 1, 1], [], []>} : vector<8x8xf32>, vector<8x8xf32>, vector<8x8xf32> -> vector<8x8xf32>
    %530 = arith.addf %517, %529 : vector<8x8xf32>
    %531 = vector.extract_strided_slice %524 {offsets = [1, 0, 0], sizes = [1, 8, 8], strides = [1, 1, 1]} : vector<2x9x8xf32> to vector<1x8x8xf32>
    %532 = vector.shape_cast %531 : vector<1x8x8xf32> to vector<8x8xf32>
    %533 = vector.extract_strided_slice %3 {offsets = [4, 0, 0], sizes = [1, 8, 8], strides = [1, 1, 1]} : vector<9x8x8xf32> to vector<1x8x8xf32>
    %534 = vector.shape_cast %533 : vector<1x8x8xf32> to vector<8x8xf32>
    %cst_214 = arith.constant dense<0.000000e+00> : vector<8x8xf32>
    %535 = tpu.matmul %532, %534, %cst_214 {dimension_numbers = #tpu.dot_dimension_numbers<[1], [0], [0], [1], [0, 0, 1, 1], [], []>} : vector<8x8xf32>, vector<8x8xf32>, vector<8x8xf32> -> vector<8x8xf32>
    %536 = arith.addf %530, %535 : vector<8x8xf32>
    %537 = vector.extract_strided_slice %524 {offsets = [0, 1, 0], sizes = [1, 8, 8], strides = [1, 1, 1]} : vector<2x9x8xf32> to vector<1x8x8xf32>
    %538 = vector.shape_cast %537 : vector<1x8x8xf32> to vector<8x8xf32>
    %539 = vector.extract_strided_slice %3 {offsets = [5, 0, 0], sizes = [1, 8, 8], strides = [1, 1, 1]} : vector<9x8x8xf32> to vector<1x8x8xf32>
    %540 = vector.shape_cast %539 : vector<1x8x8xf32> to vector<8x8xf32>
    %cst_215 = arith.constant dense<0.000000e+00> : vector<8x8xf32>
    %541 = tpu.matmul %538, %540, %cst_215 {dimension_numbers = #tpu.dot_dimension_numbers<[1], [0], [0], [1], [0, 0, 1, 1], [], []>} : vector<8x8xf32>, vector<8x8xf32>, vector<8x8xf32> -> vector<8x8xf32>
    %542 = arith.addf %536, %541 : vector<8x8xf32>
    %c8_i32_216 = arith.constant 8 : i32
    %543 = arith.muli %arg1, %c8_i32_216 : i32
    %c6_i32_217 = arith.constant 6 : i32
    %544 = arith.addi %543, %c6_i32_217 : i32
    %c2_i32_218 = arith.constant 2 : i32
    %545 = arith.muli %544, %c2_i32_218 : i32
    %c2_i32_219 = arith.constant 2 : i32
    %546 = arith.addi %545, %c2_i32_219 : i32
    %547 = arith.index_cast %546 : i32 to index
    %c0_220 = arith.constant 0 : index
    %c0_221 = arith.constant 0 : index
    %c0_222 = arith.constant 0 : index
    %548 = vector.load %arg2[%547, %c0_220, %c0_221, %c0_222] : memref<18x2x9x8xf32, #tpu.memory_space<vmem>>, vector<1x2x9x8xf32>
    %549 = vector.shape_cast %548 : vector<1x2x9x8xf32> to vector<2x9x8xf32>
    %550 = vector.extract_strided_slice %549 {offsets = [0, 0, 0], sizes = [1, 8, 8], strides = [1, 1, 1]} : vector<2x9x8xf32> to vector<1x8x8xf32>
    %551 = vector.shape_cast %550 : vector<1x8x8xf32> to vector<8x8xf32>
    %552 = vector.extract_strided_slice %3 {offsets = [6, 0, 0], sizes = [1, 8, 8], strides = [1, 1, 1]} : vector<9x8x8xf32> to vector<1x8x8xf32>
    %553 = vector.shape_cast %552 : vector<1x8x8xf32> to vector<8x8xf32>
    %cst_223 = arith.constant dense<0.000000e+00> : vector<8x8xf32>
    %554 = tpu.matmul %551, %553, %cst_223 {dimension_numbers = #tpu.dot_dimension_numbers<[1], [0], [0], [1], [0, 0, 1, 1], [], []>} : vector<8x8xf32>, vector<8x8xf32>, vector<8x8xf32> -> vector<8x8xf32>
    %555 = arith.addf %542, %554 : vector<8x8xf32>
    %556 = vector.extract_strided_slice %549 {offsets = [1, 0, 0], sizes = [1, 8, 8], strides = [1, 1, 1]} : vector<2x9x8xf32> to vector<1x8x8xf32>
    %557 = vector.shape_cast %556 : vector<1x8x8xf32> to vector<8x8xf32>
    %558 = vector.extract_strided_slice %3 {offsets = [7, 0, 0], sizes = [1, 8, 8], strides = [1, 1, 1]} : vector<9x8x8xf32> to vector<1x8x8xf32>
    %559 = vector.shape_cast %558 : vector<1x8x8xf32> to vector<8x8xf32>
    %cst_224 = arith.constant dense<0.000000e+00> : vector<8x8xf32>
    %560 = tpu.matmul %557, %559, %cst_224 {dimension_numbers = #tpu.dot_dimension_numbers<[1], [0], [0], [1], [0, 0, 1, 1], [], []>} : vector<8x8xf32>, vector<8x8xf32>, vector<8x8xf32> -> vector<8x8xf32>
    %561 = arith.addf %555, %560 : vector<8x8xf32>
    %562 = vector.extract_strided_slice %549 {offsets = [0, 1, 0], sizes = [1, 8, 8], strides = [1, 1, 1]} : vector<2x9x8xf32> to vector<1x8x8xf32>
    %563 = vector.shape_cast %562 : vector<1x8x8xf32> to vector<8x8xf32>
    %564 = vector.extract_strided_slice %3 {offsets = [8, 0, 0], sizes = [1, 8, 8], strides = [1, 1, 1]} : vector<9x8x8xf32> to vector<1x8x8xf32>
    %565 = vector.shape_cast %564 : vector<1x8x8xf32> to vector<8x8xf32>
    %cst_225 = arith.constant dense<0.000000e+00> : vector<8x8xf32>
    %566 = tpu.matmul %563, %565, %cst_225 {dimension_numbers = #tpu.dot_dimension_numbers<[1], [0], [0], [1], [0, 0, 1, 1], [], []>} : vector<8x8xf32>, vector<8x8xf32>, vector<8x8xf32> -> vector<8x8xf32>
    %567 = arith.addf %561, %566 : vector<8x8xf32>
    %cst_226 = arith.constant dense<0.000000e+00> : vector<8xf32>
    %568 = vector.multi_reduction <add>, %567, %cst_226 [0] : vector<8x8xf32> to vector<8xf32>
    %569 = arith.addf %488, %568 : vector<8xf32>
    %570 = arith.mulf %567, %567 : vector<8x8xf32>
    %cst_227 = arith.constant dense<0.000000e+00> : vector<8xf32>
    %571 = vector.multi_reduction <add>, %570, %cst_227 [0] : vector<8x8xf32> to vector<8xf32>
    %572 = arith.addf %491, %571 : vector<8xf32>
    %cst_228 = arith.constant 0.000000e+00 : f32
    %573 = vector.broadcast %cst_228 : f32 to vector<8x8xf32>
    %c8_i32_229 = arith.constant 8 : i32
    %574 = arith.muli %arg1, %c8_i32_229 : i32
    %c7_i32 = arith.constant 7 : i32
    %575 = arith.addi %574, %c7_i32 : i32
    %c2_i32_230 = arith.constant 2 : i32
    %576 = arith.muli %575, %c2_i32_230 : i32
    %c0_i32_231 = arith.constant 0 : i32
    %577 = arith.addi %576, %c0_i32_231 : i32
    %578 = arith.index_cast %577 : i32 to index
    %c0_232 = arith.constant 0 : index
    %c0_233 = arith.constant 0 : index
    %c0_234 = arith.constant 0 : index
    %579 = vector.load %arg2[%578, %c0_232, %c0_233, %c0_234] : memref<18x2x9x8xf32, #tpu.memory_space<vmem>>, vector<1x2x9x8xf32>
    %580 = vector.shape_cast %579 : vector<1x2x9x8xf32> to vector<2x9x8xf32>
    %581 = vector.extract_strided_slice %580 {offsets = [0, 0, 0], sizes = [1, 8, 8], strides = [1, 1, 1]} : vector<2x9x8xf32> to vector<1x8x8xf32>
    %582 = vector.shape_cast %581 : vector<1x8x8xf32> to vector<8x8xf32>
    %583 = vector.extract_strided_slice %3 {offsets = [0, 0, 0], sizes = [1, 8, 8], strides = [1, 1, 1]} : vector<9x8x8xf32> to vector<1x8x8xf32>
    %584 = vector.shape_cast %583 : vector<1x8x8xf32> to vector<8x8xf32>
    %cst_235 = arith.constant dense<0.000000e+00> : vector<8x8xf32>
    %585 = tpu.matmul %582, %584, %cst_235 {dimension_numbers = #tpu.dot_dimension_numbers<[1], [0], [0], [1], [0, 0, 1, 1], [], []>} : vector<8x8xf32>, vector<8x8xf32>, vector<8x8xf32> -> vector<8x8xf32>
    %586 = arith.addf %573, %585 : vector<8x8xf32>
    %587 = vector.extract_strided_slice %580 {offsets = [1, 0, 0], sizes = [1, 8, 8], strides = [1, 1, 1]} : vector<2x9x8xf32> to vector<1x8x8xf32>
    %588 = vector.shape_cast %587 : vector<1x8x8xf32> to vector<8x8xf32>
    %589 = vector.extract_strided_slice %3 {offsets = [1, 0, 0], sizes = [1, 8, 8], strides = [1, 1, 1]} : vector<9x8x8xf32> to vector<1x8x8xf32>
    %590 = vector.shape_cast %589 : vector<1x8x8xf32> to vector<8x8xf32>
    %cst_236 = arith.constant dense<0.000000e+00> : vector<8x8xf32>
    %591 = tpu.matmul %588, %590, %cst_236 {dimension_numbers = #tpu.dot_dimension_numbers<[1], [0], [0], [1], [0, 0, 1, 1], [], []>} : vector<8x8xf32>, vector<8x8xf32>, vector<8x8xf32> -> vector<8x8xf32>
    %592 = arith.addf %586, %591 : vector<8x8xf32>
    %593 = vector.extract_strided_slice %580 {offsets = [0, 1, 0], sizes = [1, 8, 8], strides = [1, 1, 1]} : vector<2x9x8xf32> to vector<1x8x8xf32>
    %594 = vector.shape_cast %593 : vector<1x8x8xf32> to vector<8x8xf32>
    %595 = vector.extract_strided_slice %3 {offsets = [2, 0, 0], sizes = [1, 8, 8], strides = [1, 1, 1]} : vector<9x8x8xf32> to vector<1x8x8xf32>
    %596 = vector.shape_cast %595 : vector<1x8x8xf32> to vector<8x8xf32>
    %cst_237 = arith.constant dense<0.000000e+00> : vector<8x8xf32>
    %597 = tpu.matmul %594, %596, %cst_237 {dimension_numbers = #tpu.dot_dimension_numbers<[1], [0], [0], [1], [0, 0, 1, 1], [], []>} : vector<8x8xf32>, vector<8x8xf32>, vector<8x8xf32> -> vector<8x8xf32>
    %598 = arith.addf %592, %597 : vector<8x8xf32>
    %c8_i32_238 = arith.constant 8 : i32
    %599 = arith.muli %arg1, %c8_i32_238 : i32
    %c7_i32_239 = arith.constant 7 : i32
    %600 = arith.addi %599, %c7_i32_239 : i32
    %c2_i32_240 = arith.constant 2 : i32
    %601 = arith.muli %600, %c2_i32_240 : i32
    %c1_i32_241 = arith.constant 1 : i32
    %602 = arith.addi %601, %c1_i32_241 : i32
    %603 = arith.index_cast %602 : i32 to index
    %c0_242 = arith.constant 0 : index
    %c0_243 = arith.constant 0 : index
    %c0_244 = arith.constant 0 : index
    %604 = vector.load %arg2[%603, %c0_242, %c0_243, %c0_244] : memref<18x2x9x8xf32, #tpu.memory_space<vmem>>, vector<1x2x9x8xf32>
    %605 = vector.shape_cast %604 : vector<1x2x9x8xf32> to vector<2x9x8xf32>
    %606 = vector.extract_strided_slice %605 {offsets = [0, 0, 0], sizes = [1, 8, 8], strides = [1, 1, 1]} : vector<2x9x8xf32> to vector<1x8x8xf32>
    %607 = vector.shape_cast %606 : vector<1x8x8xf32> to vector<8x8xf32>
    %608 = vector.extract_strided_slice %3 {offsets = [3, 0, 0], sizes = [1, 8, 8], strides = [1, 1, 1]} : vector<9x8x8xf32> to vector<1x8x8xf32>
    %609 = vector.shape_cast %608 : vector<1x8x8xf32> to vector<8x8xf32>
    %cst_245 = arith.constant dense<0.000000e+00> : vector<8x8xf32>
    %610 = tpu.matmul %607, %609, %cst_245 {dimension_numbers = #tpu.dot_dimension_numbers<[1], [0], [0], [1], [0, 0, 1, 1], [], []>} : vector<8x8xf32>, vector<8x8xf32>, vector<8x8xf32> -> vector<8x8xf32>
    %611 = arith.addf %598, %610 : vector<8x8xf32>
    %612 = vector.extract_strided_slice %605 {offsets = [1, 0, 0], sizes = [1, 8, 8], strides = [1, 1, 1]} : vector<2x9x8xf32> to vector<1x8x8xf32>
    %613 = vector.shape_cast %612 : vector<1x8x8xf32> to vector<8x8xf32>
    %614 = vector.extract_strided_slice %3 {offsets = [4, 0, 0], sizes = [1, 8, 8], strides = [1, 1, 1]} : vector<9x8x8xf32> to vector<1x8x8xf32>
    %615 = vector.shape_cast %614 : vector<1x8x8xf32> to vector<8x8xf32>
    %cst_246 = arith.constant dense<0.000000e+00> : vector<8x8xf32>
    %616 = tpu.matmul %613, %615, %cst_246 {dimension_numbers = #tpu.dot_dimension_numbers<[1], [0], [0], [1], [0, 0, 1, 1], [], []>} : vector<8x8xf32>, vector<8x8xf32>, vector<8x8xf32> -> vector<8x8xf32>
    %617 = arith.addf %611, %616 : vector<8x8xf32>
    %618 = vector.extract_strided_slice %605 {offsets = [0, 1, 0], sizes = [1, 8, 8], strides = [1, 1, 1]} : vector<2x9x8xf32> to vector<1x8x8xf32>
    %619 = vector.shape_cast %618 : vector<1x8x8xf32> to vector<8x8xf32>
    %620 = vector.extract_strided_slice %3 {offsets = [5, 0, 0], sizes = [1, 8, 8], strides = [1, 1, 1]} : vector<9x8x8xf32> to vector<1x8x8xf32>
    %621 = vector.shape_cast %620 : vector<1x8x8xf32> to vector<8x8xf32>
    %cst_247 = arith.constant dense<0.000000e+00> : vector<8x8xf32>
    %622 = tpu.matmul %619, %621, %cst_247 {dimension_numbers = #tpu.dot_dimension_numbers<[1], [0], [0], [1], [0, 0, 1, 1], [], []>} : vector<8x8xf32>, vector<8x8xf32>, vector<8x8xf32> -> vector<8x8xf32>
    %623 = arith.addf %617, %622 : vector<8x8xf32>
    %c8_i32_248 = arith.constant 8 : i32
    %624 = arith.muli %arg1, %c8_i32_248 : i32
    %c7_i32_249 = arith.constant 7 : i32
    %625 = arith.addi %624, %c7_i32_249 : i32
    %c2_i32_250 = arith.constant 2 : i32
    %626 = arith.muli %625, %c2_i32_250 : i32
    %c2_i32_251 = arith.constant 2 : i32
    %627 = arith.addi %626, %c2_i32_251 : i32
    %628 = arith.index_cast %627 : i32 to index
    %c0_252 = arith.constant 0 : index
    %c0_253 = arith.constant 0 : index
    %c0_254 = arith.constant 0 : index
    %629 = vector.load %arg2[%628, %c0_252, %c0_253, %c0_254] : memref<18x2x9x8xf32, #tpu.memory_space<vmem>>, vector<1x2x9x8xf32>
    %630 = vector.shape_cast %629 : vector<1x2x9x8xf32> to vector<2x9x8xf32>
    %631 = vector.extract_strided_slice %630 {offsets = [0, 0, 0], sizes = [1, 8, 8], strides = [1, 1, 1]} : vector<2x9x8xf32> to vector<1x8x8xf32>
    %632 = vector.shape_cast %631 : vector<1x8x8xf32> to vector<8x8xf32>
    %633 = vector.extract_strided_slice %3 {offsets = [6, 0, 0], sizes = [1, 8, 8], strides = [1, 1, 1]} : vector<9x8x8xf32> to vector<1x8x8xf32>
    %634 = vector.shape_cast %633 : vector<1x8x8xf32> to vector<8x8xf32>
    %cst_255 = arith.constant dense<0.000000e+00> : vector<8x8xf32>
    %635 = tpu.matmul %632, %634, %cst_255 {dimension_numbers = #tpu.dot_dimension_numbers<[1], [0], [0], [1], [0, 0, 1, 1], [], []>} : vector<8x8xf32>, vector<8x8xf32>, vector<8x8xf32> -> vector<8x8xf32>
    %636 = arith.addf %623, %635 : vector<8x8xf32>
    %637 = vector.extract_strided_slice %630 {offsets = [1, 0, 0], sizes = [1, 8, 8], strides = [1, 1, 1]} : vector<2x9x8xf32> to vector<1x8x8xf32>
    %638 = vector.shape_cast %637 : vector<1x8x8xf32> to vector<8x8xf32>
    %639 = vector.extract_strided_slice %3 {offsets = [7, 0, 0], sizes = [1, 8, 8], strides = [1, 1, 1]} : vector<9x8x8xf32> to vector<1x8x8xf32>
    %640 = vector.shape_cast %639 : vector<1x8x8xf32> to vector<8x8xf32>
    %cst_256 = arith.constant dense<0.000000e+00> : vector<8x8xf32>
    %641 = tpu.matmul %638, %640, %cst_256 {dimension_numbers = #tpu.dot_dimension_numbers<[1], [0], [0], [1], [0, 0, 1, 1], [], []>} : vector<8x8xf32>, vector<8x8xf32>, vector<8x8xf32> -> vector<8x8xf32>
    %642 = arith.addf %636, %641 : vector<8x8xf32>
    %643 = vector.extract_strided_slice %630 {offsets = [0, 1, 0], sizes = [1, 8, 8], strides = [1, 1, 1]} : vector<2x9x8xf32> to vector<1x8x8xf32>
    %644 = vector.shape_cast %643 : vector<1x8x8xf32> to vector<8x8xf32>
    %645 = vector.extract_strided_slice %3 {offsets = [8, 0, 0], sizes = [1, 8, 8], strides = [1, 1, 1]} : vector<9x8x8xf32> to vector<1x8x8xf32>
    %646 = vector.shape_cast %645 : vector<1x8x8xf32> to vector<8x8xf32>
    %cst_257 = arith.constant dense<0.000000e+00> : vector<8x8xf32>
    %647 = tpu.matmul %644, %646, %cst_257 {dimension_numbers = #tpu.dot_dimension_numbers<[1], [0], [0], [1], [0, 0, 1, 1], [], []>} : vector<8x8xf32>, vector<8x8xf32>, vector<8x8xf32> -> vector<8x8xf32>
    %648 = arith.addf %642, %647 : vector<8x8xf32>
    %cst_258 = arith.constant dense<0.000000e+00> : vector<8xf32>
    %649 = vector.multi_reduction <add>, %648, %cst_258 [0] : vector<8x8xf32> to vector<8xf32>
    %650 = arith.addf %569, %649 : vector<8xf32>
    %651 = arith.mulf %648, %648 : vector<8x8xf32>
    %cst_259 = arith.constant dense<0.000000e+00> : vector<8xf32>
    %652 = vector.multi_reduction <add>, %651, %cst_259 [0] : vector<8x8xf32> to vector<8xf32>
    %653 = arith.addf %572, %652 : vector<8xf32>
    %654 = vector.shape_cast %81 : vector<8x8xf32> to vector<1x8x8xf32>
    %655 = vector.shape_cast %162 : vector<8x8xf32> to vector<1x8x8xf32>
    %656 = vector.shape_cast %243 : vector<8x8xf32> to vector<1x8x8xf32>
    %657 = vector.shape_cast %324 : vector<8x8xf32> to vector<1x8x8xf32>
    %658 = vector.shape_cast %405 : vector<8x8xf32> to vector<1x8x8xf32>
    %659 = vector.shape_cast %486 : vector<8x8xf32> to vector<1x8x8xf32>
    %660 = vector.shape_cast %567 : vector<8x8xf32> to vector<1x8x8xf32>
    %661 = vector.shape_cast %648 : vector<8x8xf32> to vector<1x8x8xf32>
    %662 = tpu.concatenate %654, %655, %656, %657, %658, %659, %660, %661 in 0 : vector<1x8x8xf32>, vector<1x8x8xf32>, vector<1x8x8xf32>, vector<1x8x8xf32>, vector<1x8x8xf32>, vector<1x8x8xf32>, vector<1x8x8xf32>, vector<1x8x8xf32> -> vector<8x8x8xf32>
    %663 = vector.shape_cast %662 : vector<8x8x8xf32> to vector<1x8x8x8xf32>
    %c0_260 = arith.constant 0 : index
    %c0_261 = arith.constant 0 : index
    %c0_262 = arith.constant 0 : index
    %c0_263 = arith.constant 0 : index
    %664 = vector.load %arg4[%c0_260, %c0_261, %c0_262, %c0_263] : memref<1x8x8x8xf32, #tpu.memory_space<vmem>>, vector<1x8x8x8xf32>
    tpu.vector_store %arg4[%c0_260, %c0_261, %c0_262, %c0_263], %663 {strides = array<i32>} : memref<1x8x8x8xf32, #tpu.memory_space<vmem>>, vector<1x8x8x8xf32>,
    %c0_264 = arith.constant 0 : index
    %c0_265 = arith.constant 0 : index
    %c0_266 = arith.constant 0 : index
    %665 = vector.load %arg5[%c0_264, %c0_265, %c0_266] : memref<1x1x8xf32, #tpu.memory_space<vmem>>, vector<1x1x8xf32>
    %666 = vector.shape_cast %650 : vector<8xf32> to vector<1x1x8xf32>
    %667 = arith.addf %665, %666 : vector<1x1x8xf32>
    %c0_267 = arith.constant 0 : index
    %c0_268 = arith.constant 0 : index
    %c0_269 = arith.constant 0 : index
    %668 = vector.load %arg5[%c0_267, %c0_268, %c0_269] : memref<1x1x8xf32, #tpu.memory_space<vmem>>, vector<1x1x8xf32>
    tpu.vector_store %arg5[%c0_267, %c0_268, %c0_269], %667 {strides = array<i32>} : memref<1x1x8xf32, #tpu.memory_space<vmem>>, vector<1x1x8xf32>,
    %c0_270 = arith.constant 0 : index
    %c0_271 = arith.constant 0 : index
    %c0_272 = arith.constant 0 : index
    %669 = vector.load %arg6[%c0_270, %c0_271, %c0_272] : memref<1x1x8xf32, #tpu.memory_space<vmem>>, vector<1x1x8xf32>
    %670 = vector.shape_cast %653 : vector<8xf32> to vector<1x1x8xf32>
    %671 = arith.addf %669, %670 : vector<1x1x8xf32>
    %c0_273 = arith.constant 0 : index
    %c0_274 = arith.constant 0 : index
    %c0_275 = arith.constant 0 : index
    %672 = vector.load %arg6[%c0_273, %c0_274, %c0_275] : memref<1x1x8xf32, #tpu.memory_space<vmem>>, vector<1x1x8xf32>
    tpu.vector_store %arg6[%c0_273, %c0_274, %c0_275], %671 {strides = array<i32>} : memref<1x1x8xf32, #tpu.memory_space<vmem>>, vector<1x1x8xf32>,
    return
  }
  func.func @transform_0(%arg0: i32, %arg1: i32) -> (i32, i32, i32, i32) {
    %c0_i32 = arith.constant 0 : i32
    %c0_i32_0 = arith.constant 0 : i32
    %c0_i32_1 = arith.constant 0 : i32
    %c0_i32_2 = arith.constant 0 : i32
    return %arg0, %c0_i32, %c0_i32_0, %c0_i32_1 : i32, i32, i32, i32
  }
  func.func @transform_1(%arg0: i32, %arg1: i32) -> (i32, i32, i32) {
    %c0_i32 = arith.constant 0 : i32
    %c0_i32_0 = arith.constant 0 : i32
    %c0_i32_1 = arith.constant 0 : i32
    %c0_i32_2 = arith.constant 0 : i32
    return %c0_i32, %c0_i32_0, %c0_i32_1 : i32, i32, i32
  }
  func.func @transform_2(%arg0: i32, %arg1: i32) -> (i32, i32, i32, i32) {
    %c0_i32 = arith.constant 0 : i32
    %c0_i32_0 = arith.constant 0 : i32
    %c0_i32_1 = arith.constant 0 : i32
    return %arg0, %arg1, %c0_i32, %c0_i32_0 : i32, i32, i32, i32
  }
  func.func @transform_3(%arg0: i32, %arg1: i32) -> (i32, i32, i32) {
    %c0_i32 = arith.constant 0 : i32
    %c0_i32_0 = arith.constant 0 : i32
    %c0_i32_1 = arith.constant 0 : i32
    return %arg0, %c0_i32, %c0_i32_0 : i32, i32, i32
  }
  func.func @transform_4(%arg0: i32, %arg1: i32) -> (i32, i32, i32) {
    %c0_i32 = arith.constant 0 : i32
    %c0_i32_0 = arith.constant 0 : i32
    %c0_i32_1 = arith.constant 0 : i32
    return %arg0, %c0_i32, %c0_i32_0 : i32, i32, i32
  }
}

module attributes {stable_mosaic.version = 11 : i64} {
  func.func @_stage3_kernel(%arg0: i32, %arg1: memref<64x8xf32, #tpu.memory_space<vmem>>, %arg2: memref<1x8xf32, #tpu.memory_space<vmem>>, %arg3: memref<1x8xf32, #tpu.memory_space<vmem>>, %arg4: memref<8x16xf32, #tpu.memory_space<vmem>>, %arg5: memref<64x4xf32, #tpu.memory_space<vmem>>, %arg6: memref<4x16xf32, #tpu.memory_space<vmem>>, %arg7: memref<64x16xf32, #tpu.memory_space<vmem>>, %arg8: memref<64x16xf32, #tpu.memory_space<vmem>>, %arg9: memref<1x1x16xf32, #tpu.memory_space<vmem>>, %arg10: memref<1x1x16xf32, #tpu.memory_space<vmem>>, %arg11: memref<1x1x16xf32, #tpu.memory_space<vmem>>, %arg12: memref<1x1x16xf32, #tpu.memory_space<vmem>>) attributes {dimension_semantics = [#tpu.dimension_semantics<parallel>], iteration_bounds = array<i64: 2>, scalar_prefetch = 0 : i64, scratch_operands = 0 : i64, tpu.core_type = #tpu.core_type<tc>, window_params = [{transform_indices = @transform_0, window_bounds = array<i64: 64, 8>}, {pipeline_mode = #tpu.pipeline_mode<synchronous>, transform_indices = @transform_1, window_bounds = array<i64: 1, 8>}, {pipeline_mode = #tpu.pipeline_mode<synchronous>, transform_indices = @transform_2, window_bounds = array<i64: 1, 8>}, {pipeline_mode = #tpu.pipeline_mode<synchronous>, transform_indices = @transform_3, window_bounds = array<i64: 8, 16>}, {transform_indices = @transform_4, window_bounds = array<i64: 64, 4>}, {pipeline_mode = #tpu.pipeline_mode<synchronous>, transform_indices = @transform_5, window_bounds = array<i64: 4, 16>}, {transform_indices = @transform_6, window_bounds = array<i64: 64, 16>}, {transform_indices = @transform_7, window_bounds = array<i64: 64, 16>}, {transform_indices = @transform_8, window_bounds = array<i64: 1, 1, 16>}, {transform_indices = @transform_9, window_bounds = array<i64: 1, 1, 16>}, {transform_indices = @transform_10, window_bounds = array<i64: 1, 1, 16>}, {transform_indices = @transform_11, window_bounds = array<i64: 1, 1, 16>}]} {
    %c0 = arith.constant 0 : index
    %c0_0 = arith.constant 0 : index
    %0 = vector.load %arg1[%c0, %c0_0] : memref<64x8xf32, #tpu.memory_space<vmem>>, vector<64x8xf32>
    %c0_1 = arith.constant 0 : index
    %c0_2 = arith.constant 0 : index
    %1 = vector.load %arg2[%c0_1, %c0_2] : memref<1x8xf32, #tpu.memory_space<vmem>>, vector<1x8xf32>
    %2 = vector.broadcast %1 : vector<1x8xf32> to vector<64x8xf32>
    %3 = arith.mulf %0, %2 : vector<64x8xf32>
    %c0_3 = arith.constant 0 : index
    %c0_4 = arith.constant 0 : index
    %4 = vector.load %arg3[%c0_3, %c0_4] : memref<1x8xf32, #tpu.memory_space<vmem>>, vector<1x8xf32>
    %5 = vector.broadcast %4 : vector<1x8xf32> to vector<64x8xf32>
    %6 = arith.addf %3, %5 : vector<64x8xf32>
    %cst = arith.constant 0.000000e+00 : f32
    %7 = vector.broadcast %cst : f32 to vector<64x8xf32>
    %8 = arith.maximumf %6, %7 : vector<64x8xf32>
    %c0_5 = arith.constant 0 : index
    %c0_6 = arith.constant 0 : index
    %9 = vector.load %arg4[%c0_5, %c0_6] : memref<8x16xf32, #tpu.memory_space<vmem>>, vector<8x16xf32>
    %cst_7 = arith.constant dense<0.000000e+00> : vector<64x16xf32>
    %10 = tpu.matmul %8, %9, %cst_7 {dimension_numbers = #tpu.dot_dimension_numbers<[1], [0], [0], [1], [0, 0, 1, 1], [], []>} : vector<64x8xf32>, vector<8x16xf32>, vector<64x16xf32> -> vector<64x16xf32>
    %c0_8 = arith.constant 0 : index
    %c0_9 = arith.constant 0 : index
    %11 = vector.load %arg5[%c0_8, %c0_9] : memref<64x4xf32, #tpu.memory_space<vmem>>, vector<64x4xf32>
    %c0_10 = arith.constant 0 : index
    %c0_11 = arith.constant 0 : index
    %12 = vector.load %arg6[%c0_10, %c0_11] : memref<4x16xf32, #tpu.memory_space<vmem>>, vector<4x16xf32>
    %cst_12 = arith.constant dense<0.000000e+00> : vector<64x16xf32>
    %13 = tpu.matmul %11, %12, %cst_12 {dimension_numbers = #tpu.dot_dimension_numbers<[1], [0], [0], [1], [0, 0, 1, 1], [], []>} : vector<64x4xf32>, vector<4x16xf32>, vector<64x16xf32> -> vector<64x16xf32>
    %c0_13 = arith.constant 0 : index
    %c0_14 = arith.constant 0 : index
    %14 = vector.load %arg7[%c0_13, %c0_14] : memref<64x16xf32, #tpu.memory_space<vmem>>, vector<64x16xf32>
    tpu.vector_store %arg7[%c0_13, %c0_14], %10 {strides = array<i32>} : memref<64x16xf32, #tpu.memory_space<vmem>>, vector<64x16xf32>,
    %c0_15 = arith.constant 0 : index
    %c0_16 = arith.constant 0 : index
    %15 = vector.load %arg8[%c0_15, %c0_16] : memref<64x16xf32, #tpu.memory_space<vmem>>, vector<64x16xf32>
    tpu.vector_store %arg8[%c0_15, %c0_16], %13 {strides = array<i32>} : memref<64x16xf32, #tpu.memory_space<vmem>>, vector<64x16xf32>,
    %cst_17 = arith.constant dense<0.000000e+00> : vector<16xf32>
    %16 = vector.multi_reduction <add>, %10, %cst_17 [0] : vector<64x16xf32> to vector<16xf32>
    %17 = vector.shape_cast %16 : vector<16xf32> to vector<1x1x16xf32>
    %c0_18 = arith.constant 0 : index
    %c0_19 = arith.constant 0 : index
    %c0_20 = arith.constant 0 : index
    %18 = vector.load %arg9[%c0_18, %c0_19, %c0_20] : memref<1x1x16xf32, #tpu.memory_space<vmem>>, vector<1x1x16xf32>
    tpu.vector_store %arg9[%c0_18, %c0_19, %c0_20], %17 {strides = array<i32>} : memref<1x1x16xf32, #tpu.memory_space<vmem>>, vector<1x1x16xf32>,
    %19 = arith.mulf %10, %10 : vector<64x16xf32>
    %cst_21 = arith.constant dense<0.000000e+00> : vector<16xf32>
    %20 = vector.multi_reduction <add>, %19, %cst_21 [0] : vector<64x16xf32> to vector<16xf32>
    %21 = vector.shape_cast %20 : vector<16xf32> to vector<1x1x16xf32>
    %c0_22 = arith.constant 0 : index
    %c0_23 = arith.constant 0 : index
    %c0_24 = arith.constant 0 : index
    %22 = vector.load %arg10[%c0_22, %c0_23, %c0_24] : memref<1x1x16xf32, #tpu.memory_space<vmem>>, vector<1x1x16xf32>
    tpu.vector_store %arg10[%c0_22, %c0_23, %c0_24], %21 {strides = array<i32>} : memref<1x1x16xf32, #tpu.memory_space<vmem>>, vector<1x1x16xf32>,
    %cst_25 = arith.constant dense<0.000000e+00> : vector<16xf32>
    %23 = vector.multi_reduction <add>, %13, %cst_25 [0] : vector<64x16xf32> to vector<16xf32>
    %24 = vector.shape_cast %23 : vector<16xf32> to vector<1x1x16xf32>
    %c0_26 = arith.constant 0 : index
    %c0_27 = arith.constant 0 : index
    %c0_28 = arith.constant 0 : index
    %25 = vector.load %arg11[%c0_26, %c0_27, %c0_28] : memref<1x1x16xf32, #tpu.memory_space<vmem>>, vector<1x1x16xf32>
    tpu.vector_store %arg11[%c0_26, %c0_27, %c0_28], %24 {strides = array<i32>} : memref<1x1x16xf32, #tpu.memory_space<vmem>>, vector<1x1x16xf32>,
    %26 = arith.mulf %13, %13 : vector<64x16xf32>
    %cst_29 = arith.constant dense<0.000000e+00> : vector<16xf32>
    %27 = vector.multi_reduction <add>, %26, %cst_29 [0] : vector<64x16xf32> to vector<16xf32>
    %28 = vector.shape_cast %27 : vector<16xf32> to vector<1x1x16xf32>
    %c0_30 = arith.constant 0 : index
    %c0_31 = arith.constant 0 : index
    %c0_32 = arith.constant 0 : index
    %29 = vector.load %arg12[%c0_30, %c0_31, %c0_32] : memref<1x1x16xf32, #tpu.memory_space<vmem>>, vector<1x1x16xf32>
    tpu.vector_store %arg12[%c0_30, %c0_31, %c0_32], %28 {strides = array<i32>} : memref<1x1x16xf32, #tpu.memory_space<vmem>>, vector<1x1x16xf32>,
    return
  }
  func.func @transform_0(%arg0: i32) -> (i32, i32) {
    %c0_i32 = arith.constant 0 : i32
    %c0_i32_0 = arith.constant 0 : i32
    return %arg0, %c0_i32 : i32, i32
  }
  func.func @transform_1(%arg0: i32) -> (i32, i32) {
    %c0_i32 = arith.constant 0 : i32
    %c0_i32_0 = arith.constant 0 : i32
    %c0_i32_1 = arith.constant 0 : i32
    return %c0_i32, %c0_i32_0 : i32, i32
  }
  func.func @transform_2(%arg0: i32) -> (i32, i32) {
    %c0_i32 = arith.constant 0 : i32
    %c0_i32_0 = arith.constant 0 : i32
    %c0_i32_1 = arith.constant 0 : i32
    return %c0_i32, %c0_i32_0 : i32, i32
  }
  func.func @transform_3(%arg0: i32) -> (i32, i32) {
    %c0_i32 = arith.constant 0 : i32
    %c0_i32_0 = arith.constant 0 : i32
    %c0_i32_1 = arith.constant 0 : i32
    return %c0_i32, %c0_i32_0 : i32, i32
  }
  func.func @transform_4(%arg0: i32) -> (i32, i32) {
    %c0_i32 = arith.constant 0 : i32
    %c0_i32_0 = arith.constant 0 : i32
    return %arg0, %c0_i32 : i32, i32
  }
  func.func @transform_5(%arg0: i32) -> (i32, i32) {
    %c0_i32 = arith.constant 0 : i32
    %c0_i32_0 = arith.constant 0 : i32
    %c0_i32_1 = arith.constant 0 : i32
    return %c0_i32, %c0_i32_0 : i32, i32
  }
  func.func @transform_6(%arg0: i32) -> (i32, i32) {
    %c0_i32 = arith.constant 0 : i32
    %c0_i32_0 = arith.constant 0 : i32
    return %arg0, %c0_i32 : i32, i32
  }
  func.func @transform_7(%arg0: i32) -> (i32, i32) {
    %c0_i32 = arith.constant 0 : i32
    %c0_i32_0 = arith.constant 0 : i32
    return %arg0, %c0_i32 : i32, i32
  }
  func.func @transform_8(%arg0: i32) -> (i32, i32, i32) {
    %c0_i32 = arith.constant 0 : i32
    %c0_i32_0 = arith.constant 0 : i32
    %c0_i32_1 = arith.constant 0 : i32
    return %arg0, %c0_i32, %c0_i32_0 : i32, i32, i32
  }
  func.func @transform_9(%arg0: i32) -> (i32, i32, i32) {
    %c0_i32 = arith.constant 0 : i32
    %c0_i32_0 = arith.constant 0 : i32
    %c0_i32_1 = arith.constant 0 : i32
    return %arg0, %c0_i32, %c0_i32_0 : i32, i32, i32
  }
  func.func @transform_10(%arg0: i32) -> (i32, i32, i32) {
    %c0_i32 = arith.constant 0 : i32
    %c0_i32_0 = arith.constant 0 : i32
    %c0_i32_1 = arith.constant 0 : i32
    return %arg0, %c0_i32, %c0_i32_0 : i32, i32, i32
  }
  func.func @transform_11(%arg0: i32) -> (i32, i32, i32) {
    %c0_i32 = arith.constant 0 : i32
    %c0_i32_0 = arith.constant 0 : i32
    %c0_i32_1 = arith.constant 0 : i32
    return %arg0, %c0_i32, %c0_i32_0 : i32, i32, i32
  }
}

module attributes {stable_mosaic.version = 11 : i64} {
  func.func @_bn_add_relu_kernel(%arg0: i32, %arg1: memref<64x16xf32, #tpu.memory_space<vmem>>, %arg2: memref<1x16xf32, #tpu.memory_space<vmem>>, %arg3: memref<1x16xf32, #tpu.memory_space<vmem>>, %arg4: memref<64x16xf32, #tpu.memory_space<vmem>>, %arg5: memref<1x16xf32, #tpu.memory_space<vmem>>, %arg6: memref<1x16xf32, #tpu.memory_space<vmem>>, %arg7: memref<64x16xf32, #tpu.memory_space<vmem>>) attributes {dimension_semantics = [#tpu.dimension_semantics<parallel>], iteration_bounds = array<i64: 2>, scalar_prefetch = 0 : i64, scratch_operands = 0 : i64, tpu.core_type = #tpu.core_type<tc>, window_params = [{transform_indices = @transform_0, window_bounds = array<i64: 64, 16>}, {pipeline_mode = #tpu.pipeline_mode<synchronous>, transform_indices = @transform_1, window_bounds = array<i64: 1, 16>}, {pipeline_mode = #tpu.pipeline_mode<synchronous>, transform_indices = @transform_2, window_bounds = array<i64: 1, 16>}, {transform_indices = @transform_3, window_bounds = array<i64: 64, 16>}, {pipeline_mode = #tpu.pipeline_mode<synchronous>, transform_indices = @transform_4, window_bounds = array<i64: 1, 16>}, {pipeline_mode = #tpu.pipeline_mode<synchronous>, transform_indices = @transform_5, window_bounds = array<i64: 1, 16>}, {transform_indices = @transform_6, window_bounds = array<i64: 64, 16>}]} {
    %c0 = arith.constant 0 : index
    %c0_0 = arith.constant 0 : index
    %0 = vector.load %arg1[%c0, %c0_0] : memref<64x16xf32, #tpu.memory_space<vmem>>, vector<64x16xf32>
    %c0_1 = arith.constant 0 : index
    %c0_2 = arith.constant 0 : index
    %1 = vector.load %arg2[%c0_1, %c0_2] : memref<1x16xf32, #tpu.memory_space<vmem>>, vector<1x16xf32>
    %2 = vector.broadcast %1 : vector<1x16xf32> to vector<64x16xf32>
    %3 = arith.mulf %0, %2 : vector<64x16xf32>
    %c0_3 = arith.constant 0 : index
    %c0_4 = arith.constant 0 : index
    %4 = vector.load %arg3[%c0_3, %c0_4] : memref<1x16xf32, #tpu.memory_space<vmem>>, vector<1x16xf32>
    %5 = vector.broadcast %4 : vector<1x16xf32> to vector<64x16xf32>
    %6 = arith.addf %3, %5 : vector<64x16xf32>
    %c0_5 = arith.constant 0 : index
    %c0_6 = arith.constant 0 : index
    %7 = vector.load %arg4[%c0_5, %c0_6] : memref<64x16xf32, #tpu.memory_space<vmem>>, vector<64x16xf32>
    %c0_7 = arith.constant 0 : index
    %c0_8 = arith.constant 0 : index
    %8 = vector.load %arg5[%c0_7, %c0_8] : memref<1x16xf32, #tpu.memory_space<vmem>>, vector<1x16xf32>
    %9 = vector.broadcast %8 : vector<1x16xf32> to vector<64x16xf32>
    %10 = arith.mulf %7, %9 : vector<64x16xf32>
    %11 = arith.addf %6, %10 : vector<64x16xf32>
    %c0_9 = arith.constant 0 : index
    %c0_10 = arith.constant 0 : index
    %12 = vector.load %arg6[%c0_9, %c0_10] : memref<1x16xf32, #tpu.memory_space<vmem>>, vector<1x16xf32>
    %13 = vector.broadcast %12 : vector<1x16xf32> to vector<64x16xf32>
    %14 = arith.addf %11, %13 : vector<64x16xf32>
    %cst = arith.constant 0.000000e+00 : f32
    %15 = vector.broadcast %cst : f32 to vector<64x16xf32>
    %16 = arith.maximumf %14, %15 : vector<64x16xf32>
    %c0_11 = arith.constant 0 : index
    %c0_12 = arith.constant 0 : index
    %17 = vector.load %arg7[%c0_11, %c0_12] : memref<64x16xf32, #tpu.memory_space<vmem>>, vector<64x16xf32>
    tpu.vector_store %arg7[%c0_11, %c0_12], %16 {strides = array<i32>} : memref<64x16xf32, #tpu.memory_space<vmem>>, vector<64x16xf32>,
    return
  }
  func.func @transform_0(%arg0: i32) -> (i32, i32) {
    %c0_i32 = arith.constant 0 : i32
    %c0_i32_0 = arith.constant 0 : i32
    return %arg0, %c0_i32 : i32, i32
  }
  func.func @transform_1(%arg0: i32) -> (i32, i32) {
    %c0_i32 = arith.constant 0 : i32
    %c0_i32_0 = arith.constant 0 : i32
    %c0_i32_1 = arith.constant 0 : i32
    return %c0_i32, %c0_i32_0 : i32, i32
  }
  func.func @transform_2(%arg0: i32) -> (i32, i32) {
    %c0_i32 = arith.constant 0 : i32
    %c0_i32_0 = arith.constant 0 : i32
    %c0_i32_1 = arith.constant 0 : i32
    return %c0_i32, %c0_i32_0 : i32, i32
  }
  func.func @transform_3(%arg0: i32) -> (i32, i32) {
    %c0_i32 = arith.constant 0 : i32
    %c0_i32_0 = arith.constant 0 : i32
    return %arg0, %c0_i32 : i32, i32
  }
  func.func @transform_4(%arg0: i32) -> (i32, i32) {
    %c0_i32 = arith.constant 0 : i32
    %c0_i32_0 = arith.constant 0 : i32
    %c0_i32_1 = arith.constant 0 : i32
    return %c0_i32, %c0_i32_0 : i32, i32
  }
  func.func @transform_5(%arg0: i32) -> (i32, i32) {
    %c0_i32 = arith.constant 0 : i32
    %c0_i32_0 = arith.constant 0 : i32
    %c0_i32_1 = arith.constant 0 : i32
    return %c0_i32, %c0_i32_0 : i32, i32
  }
  func.func @transform_6(%arg0: i32) -> (i32, i32) {
    %c0_i32 = arith.constant 0 : i32
    %c0_i32_0 = arith.constant 0 : i32
    return %arg0, %c0_i32 : i32, i32
  }
}

</mosaic_0001>

<bundles_post_ra>
// kernel: conv_block_forward.4
= control target key start
LH: loop header
LB: loop body
LE: loop exit
PB: predicated region body
PF: predicated region fallthrough
CT: control target
= control target key end

     0   :  { %10 = vsyncpa [#allocation3], 0  ;;  %s2001_s0 = inlined_call_operand.hbm [shape: f32[512,4], index: 0, kind: input, shape index: {}]   ;;  %s2002_s1 = inlined_call_operand.hbm [shape: f32[4,8], index: 1, kind: input, shape index: {}]   ;;  %s2003_s2 = inlined_call_operand.hbm [shape: f32[512,8], index: 2, kind: output, shape index: {0}]   ;;  %s2004_s3 = inlined_call_operand.hbm [shape: f32[2,1,8], index: 3, kind: output, shape index: {1}]   ;;  %s2005_s4 = inlined_call_operand.hbm [shape: f32[2,1,8], index: 4, kind: output, shape index: {2}]  }
   0x1   :  { %12 = vsyncpa [#allocation3 + $0x1], 0 }
   0x2   :  { %13 = vsyncpa [#allocation6], 0 }
   0x3   :  { %14 = vsyncpa [#allocation4], 0 }
   0x4   :  { %16 = vsyncpa [#allocation4 + $0x1], 0 }
   0x5   :  { %17 = vsyncpa [#allocation9], 0 }
   0x6   :  { %19 = vsyncpa [#allocation9 + $0x1], 0  ;;  %s1429_s15 = smov 0   ;;  %s1431_s16 = smov 0  }
   0x7   :  { %s1433_s17 = smov 0   ;;  %s1435_s18 = smov 0  }
   0x8 LB: > { %s1450_s19 = sadd.s32 4294967295, %s1393_s18   ;;  %s996_s20 = sadd.s32 4294967294, %s1393_s18   ;;  %s1393_s18 = sphi %s1435_s18, %s2030_s18   ;;  %s1389_s17 = sphi %s1433_s17, %s2029_s17   ;;  %s1385_s16 = sphi %s1431_s16, %s2028_s16   ;;  %s1381_s15 = sphi %s1429_s15, %s2027_s15  }
   0x9   : > { %s1454_s21 = sadd.s32 1, %s1393_s18   ;;  %s32_s22 = sadd.s32 1, %s1389_s17 }
   0xa   : > { %s29_s23 = ssub.s32 %s1393_s18, %s1454_s21  ;;  %p39_p0 = scmp.ne.s32.totalorder %s1389_s17, %s1385_s16 }
   0xb   : > { %p30_p1 = scmp.eq.s32.totalorder %s29_s23, 0  ;;  %p40_p2 = scmp.eq.s32.totalorder %s1393_s18, 0 }
   0xc   : > { %p45_p3 = scmp.ne.s32.totalorder %s1385_s16, %s1381_s15  ;;  %p2006_p4 = scmp.eq.s32.totalorder %s1450_s19, 0 }
   0xd   : > { %s1466_s24 = scalar_select %p30_p1, %s1389_s17, %s32_s22  }
   0xe   : > { %p1468_p5 = por %p40_p2, %p39_p0  ;;  %p1474_p6 = por %p2006_p4, %p45_p3 }
   0xf   : > { %p90_p7 = scmp.eq.s32.totalorder %s1450_s19, 1  ;;  %p96_p8 = scmp.eq.s32.totalorder %s996_s20, 1 }
  0x10   : > { %s2012_s26 = scalar_select %p1474_p6, 1, 0 }
  0x11   : > { %p997_p9 = scmp.ge.s32.totalorder %s1393_s18, 1  ;;  %p155_p10 = scmp.lt.s32.totalorder %s1393_s18, 3 }
  0x12   : > { %p1483_p11 = por %p90_p7, %p39_p0  ;;  %p1487_p12 = por %p96_p8, %p45_p3 }
  0x13   : > { %p1491_p13 = pnand %p997_p9, %p155_p10  ;;  %s1395_s30 = smov [#allocation5]  }
  0x14   : > { %s2013_s27 = scalar_select %p1483_p11, 1, 0 }
  0x15   : > { %s2014_s28 = scalar_select %p1487_p12, 1, 0 }
  0x16   : > { %s2015_s29 = scalar_select %p1491_p13, 1, 0 }
  0x17   : > { %p1146_p2 = pneg %p1491_p13  ;;  %s168_s5 = sshll.u32 %s1395_s30, 4  ;;  %s169_s5 = int_to_ptr.vmem [resolvable:$true] %s168_s5 }
  0x18   : > { %p1165_p4 = scmp.lt.s32.totalorder %s1393_s18, 2  ;;  %p2016_p0 = scmp.eq.s32.totalorder %s1450_s19, 0 }
  0x19   : > { %s179_s7 = sand.u32 1, %s1389_s17   ;;  %s1205_s12 = scalar_lea.hbm %s2002_s1, 64 }
  0x1a   : > { %p1501_p7 = pnand %p1146_p2, %p2016_p0  ;;  %p1508_p3 = pnand %p1165_p4, %p1468_p5 }
  0x1b   : > { %s1000_s9 = sshll.u32 %s179_s7, 8  ;;  %p1206_p8 = scmp.ne.s32.totalorder %s2002_s1, %s1205_s12 }
  0x1c   : > { %s2018_s8 = scalar_select %p1508_p3, 1, 0 }
  0x1d   : > { %p1207_p9 = pneg %p1501_p7  ;;  %p1212_p4 = scmp.lt.u32.totalorder %s1205_s12, %s2002_s1 }
  0x1f   : > { %p1208_p10 = pnand %p1207_p9, %p1206_p8 }
  0x21   : > { %p1209_p2 = pneg %p1208_p10 }
  0x23   : > { %p1214_p5 = pnand %p1212_p4, %p1209_p2 }
  0x25   : > { %1217 = shalt.err (!%p1214_p5)
}
  0x26   : > { %s1218_s25 = scalar_lea.vmem %s169_s5, 64  ;;  %p1226_p11 = scmp.lt.s32.totalorder %s169_s5, %s169_s5 }
  0x27   : > { %p1219_p0 = scmp.ne.s32.totalorder %s169_s5, %s1218_s25  ;;  %p1227_p6 = scmp.lt.s32.totalorder %s1218_s25, %s1218_s25 }
  0x29   : > { %p1221_p1 = pnand %p1219_p0, %p1207_p9  ;;  %p1228_p13 = por %p1227_p6, %p1226_p11 }
  0x2b   : > { %p1222_p12 = pneg %p1221_p1 }
  0x2d   : > { %p1229_p3 = pnand %p1228_p13, %p1222_p12 }
  0x2f   : > { %1232 = shalt.err (!%p1229_p3)
}
  0x30   : > { %1149 = dma.hbm_to_vmem [thread:$0]  (!%p1501_p7), %s2002_s1, 64, %s169_s5, [#allocation6]  }
  0x31   : > { %s1047_s11 = sshll.u32 %s1393_s18, 12  ;;  %s183_s12 = scalar_lea.vmem [#allocation2], %s1000_s9 }
  0x32   : > { %s190_s13 = sshll.u32 %s183_s12, 4  ;;  %s1532_s23 = scalar_lea.hbm %s2001_s0, %s1047_s11  ;;  %s1534_s13 = int_to_ptr.vmem [resolvable:$true] %s190_s13 }
  0x33   : > { %s1536_s6 = scalar_lea.sflag [#allocation3], %s179_s7  ;;  %s1233_s25 = scalar_lea.hbm %s1532_s23, 4096 }
  0x34   : > { %p1234_p6 = scmp.ne.s32.totalorder %s1532_s23, %s1233_s25  ;;  %p2019_p11 = scmp.ne.s32.totalorder %s2018_s8, 0 }
  0x35   : > { %s1238_s30 = scalar_lea.hbm %s2001_s0, 8192  ;;  %p1239_p7 = scmp.lt.u32.totalorder %s1532_s23, %s2001_s0 }
  0x36   : > { %p1235_p12 = pneg %p2019_p11  ;;  %p1240_p3 = scmp.lt.u32.totalorder %s1238_s30, %s1233_s25 }
  0x37   : > { %p1242_p9 = scmp.lt.u32.totalorder %s1233_s25, %s1532_s23 }
  0x38   : > { %p1236_p13 = pnand %p1235_p12, %p1234_p6  ;;  %p1241_p8 = por %p1240_p3, %p1239_p7 }
  0x3a   : > { %p1237_p1 = pneg %p1236_p13  ;;  %p1243_p10 = por %p1242_p9, %p1241_p8 }
  0x3c   : > { %p1244_p2 = pnand %p1243_p10, %p1237_p1 }
  0x3e   : > { %1247 = shalt.err (!%p1244_p2)
}
  0x3f   : > { %s1248_s7 = scalar_lea.vmem %s1534_s13, 4096  ;;  %s1396_s12 = smov [#allocation2]  }
  0x40   : > { %p1249_p4 = scmp.ne.s32.totalorder %s1534_s13, %s1248_s7  ;;  %s1253_s14 = sshll.u32 %s1396_s12, 4  ;;  %s1254_s14 = int_to_ptr.vmem [resolvable:$false] %s1253_s14 }
  0x41   : > { %s1255_s22 = scalar_lea.vmem %s1254_s14, 8192  ;;  %p1256_p6 = scmp.lt.s32.totalorder %s1534_s13, %s1254_s14 }
  0x42   : > { %p1251_p5 = pnand %p1249_p4, %p1235_p12  ;;  %p1257_p13 = scmp.lt.s32.totalorder %s1255_s22, %s1248_s7 }
  0x44   : > { %p1252_p0 = pneg %p1251_p5  ;;  %p1258_p7 = por %p1257_p13, %p1256_p6 }
  0x46   : > { %p1259_p3 = pnand %p1258_p7, %p1252_p0 }
  0x48   : > { %1262 = shalt.err (!%p1259_p3)
}
  0x49   : > { %s1397_s25 = smov 128   ;;  %s1398_s5 = smov 8  }
  0x4a   : > { %1153 = dma.hbm_to_vmem [thread:$0]  (!%p2019_p11), %s1532_s23, 4096, %s1534_s13, %s1536_s6, %s1397_s25, %s1397_s25, %s1398_s5  }
  0x4b   : > { %p2020_p12 = scmp.ne.s32.totalorder %s2015_s29, 0 }
  0x4c   : > { %s1567_s9 = sand.u32 (!%p2020_p12), 1, %s1385_s16   ;;  %p2021_p1 = scmp.ne.s32.totalorder (!%p2020_p12), %s2012_s26, 0 }
  0x4d   : > { %202 = sbr.rel (%p2020_p12) target bundleno = 429 (0x1ad), region = 28  ;;  %s1004_s30 = sshll.u32 (!%p2020_p12), %s1567_s9, 8 }
  0x4e   : > { %s205_s10 = scalar_lea.sflag (!%p2020_p12), [#allocation3], %s1567_s9  ;;  %s1573_s11 = scalar_lea.vmem (!%p2020_p12), [#allocation2], %s1004_s30 }
  0x54   : > { %1364 = dma.done.wait (%p2021_p1), %s205_s10, 4096  }
  0x55   : > { %1366 = vsyncadd (%p2021_p1), %s205_s10, 4294963200  ;;  %p2022_p11 = scmp.eq.s32.totalorder %s1450_s19, 0 }
  0x57   : > { %1368 = dma.done.wait (%p2022_p11), [#allocation6], 64   ;;  %p2023_p8 = pmov %p2022_p11 }
  0x58   : > { %vm377_vm0 = vcmask 1043456   ;;  %vm280_vm1 = vcmask 31744   ;;  %v279_v0 = vld [vmem:[#allocation5] sm:$0xf]  ;;  %v248_v2 = vld [vmem:[%s1573_s11 + $0x8] sm:$0xff]  ;;  %v249_v3 = vld [vmem:[%s1573_s11 + $0x10] sm:$0xff] }
  0x59   : > { %1370 = vsyncadd (%p2023_p8), [#allocation6], 4294967232  ;;  %v247_v1 = vld [vmem:[%s1573_s11] sm:$0xff]  ;;  %1082 = vmatprep.subr.msk.mxu0 %vm377_vm0, %v279_v0  ;;  %1132 = vmatprep.subr.msk.mxu1 %vm377_vm0, %v279_v0  ;;  %v250_v4 = vld [vmem:[%s1573_s11 + $0x18] sm:$0xff]  ;;  %vm606_vm2 = vcmask 64512   ;;  %s1649_s26 = scalar_lea.vmem [#allocation7], %s1004_s30 }
  0x5a   : > { %1084 = vmatprep.mubr.msk.f32.mxu0 %vm280_vm1, %v247_v1  ;;  %1083 = vmatpush3.msk.msra.mxu0 %vm377_vm0, %v279_v0  ;;  %v251_v5 = vld [vmem:[%s1573_s11 + $0x20] sm:$0xff]  ;;  %v264_v7 = vld [vmem:[%s1573_s11 + $0x88] sm:$0xff]  ;;  %v265_v8 = vld [vmem:[%s1573_s11 + $0x90] sm:$0xff]  ;;  %s1048_s29 = sshll.u32 %s1450_s19, 12  ;;  %s834_s8 = sshll.u32 %s1649_s26, 4  ;;  %s1791_s8 = int_to_ptr.vmem [resolvable:$true] %s834_s8 }
  0x5b   : > { %1085 = vmatmul.mubr.msk.f32.vlgmr.msra.gmra.mrb[0].mxu0 %vm280_vm1, %v248_v2  ;;  %1133 = vmatpush3.msk.msra.mxu1 %vm377_vm0, %v279_v0  ;;  %v263_v6 = vld [vmem:[%s1573_s11 + $0x80] sm:$0xff]  ;;  %v252_v9 = vld [vmem:[%s1573_s11 + $0x28] sm:$0xff]  ;;  %v266_v10 = vld [vmem:[%s1573_s11 + $0x98] sm:$0xff]  ;;  %s1789_s6 = scalar_lea.hbm %s2003_s2, %s1048_s29  ;;  %s813_s7 = scalar_lea.sflag [#allocation4], %s1567_s9 }
  0x5c   : > { %1087 = vmatprep.mubr.msk.f32.mxu0 %vm280_vm1, %v249_v3  ;;  %1108 = vmatprep.mubr.msk.f32.mxu1 %vm280_vm1, %v263_v6  ;;  %v253_v11 = vld [vmem:[%s1573_s11 + $0x30] sm:$0xff]  ;;  %v267_v12 = vld [vmem:[%s1573_s11 + $0xa0] sm:$0xff]  ;;  %v254_v13 = vld [vmem:[%s1573_s11 + $0x38] sm:$0xff]  ;;  %s1263_s12 = scalar_lea.vmem %s1791_s8, 4096  ;;  %p2024_p10 = scmp.ne.s32.totalorder %s2013_s27, 0 }
  0x5d   : > { %1109 = vmatmul.mubr.msk.f32.vlgmr.msra.gmra.mrb[0].mxu1 %vm280_vm1, %v264_v7  ;;  %v268_v14 = vld [vmem:[%s1573_s11 + $0xa8] sm:$0xff]  ;;  %v255_v15 = vld [vmem:[%s1573_s11 + $0x40] sm:$0xff]  ;;  %v269_v16 = vld [vmem:[%s1573_s11 + $0xb0] sm:$0xff]  ;;  %p1264_p9 = scmp.ne.s32.totalorder %s1791_s8, %s1263_s12  ;;  %s1399_s14 = smov [#allocation7]  }
  0x5e   : > { %1111 = vmatprep.mubr.msk.f32.mxu1 %vm280_vm1, %v265_v8  ;;  %v256_v17 = vld [vmem:[%s1573_s11 + $0x48] sm:$0xff]  ;;  %v270_v18 = vld [vmem:[%s1573_s11 + $0xb8] sm:$0xff]  ;;  %v257_v19 = vld [vmem:[%s1573_s11 + $0x50] sm:$0xff]  ;;  %s1267_s22 = sshll.u32 %s1399_s14, 4  ;;  %s1268_s22 = int_to_ptr.vmem [resolvable:$false] %s1267_s22 }
  0x5f   : > { %1088 = vmatmul.mubr.msk.f32.gmra.mrb[2].mxu0 %vm280_vm1, %v250_v4  ;;  %v271_v20 = vld [vmem:[%s1573_s11 + $0xc0] sm:$0xff]  ;;  %v258_v21 = vld [vmem:[%s1573_s11 + $0x58] sm:$0xff]  ;;  %v272_v22 = vld [vmem:[%s1573_s11 + $0xc8] sm:$0xff]  ;;  %p1265_p2 = pnand %p1264_p9, %p2024_p10  ;;  %s1269_s25 = scalar_lea.vmem %s1268_s22, 8192 }
  0x60   : > { %1090 = vmatprep.mubr.msk.f32.mxu0 %vm280_vm1, %v251_v5  ;;  %v259_v23 = vld [vmem:[%s1573_s11 + $0x60] sm:$0xff]  ;;  %v273_v24 = vld [vmem:[%s1573_s11 + $0xd0] sm:$0xff]  ;;  %v260_v25 = vld [vmem:[%s1573_s11 + $0x68] sm:$0xff]  ;;  %p1270_p5 = scmp.lt.s32.totalorder %s1791_s8, %s1268_s22  ;;  %p1271_p0 = scmp.lt.s32.totalorder %s1269_s25, %s1263_s12 }
  0x61   : > { %1112 = vmatmul.mubr.msk.f32.gmra.mrb[2].mxu1 %vm280_vm1, %v266_v10  ;;  %v274_v26 = vld [vmem:[%s1573_s11 + $0xd8] sm:$0xff]  ;;  %v261_v27 = vld [vmem:[%s1573_s11 + $0x70] sm:$0xff]  ;;  %v275_v28 = vld [vmem:[%s1573_s11 + $0xe0] sm:$0xff]  ;;  %p1266_p4 = pneg %p1265_p2 }
  0x62   : > { %1114 = vmatprep.mubr.msk.f32.mxu1 %vm280_vm1, %v267_v12  ;;  %v262_v29 = vld [vmem:[%s1573_s11 + $0x78] sm:$0xff]  ;;  %v276_v30 = vld [vmem:[%s1573_s11 + $0xe8] sm:$0xff]  ;;  %v277_v31 = vld [vmem:[%s1573_s11 + $0xf0] sm:$0xff]  ;;  %p1272_p6 = por %p1271_p0, %p1270_p5 }
  0x63   : > { %1091 = vmatmul.mubr.msk.f32.gmra.mrb[4].mxu0 %vm280_vm1, %v252_v9  ;;  %v278_v32 = vld [vmem:[%s1573_s11 + $0xf8] sm:$0xff] }
  0x64   : > { %1093 = vmatprep.mubr.msk.f32.mxu0 %vm280_vm1, %v253_v11  ;;  %p1273_p13 = pnand %p1272_p6, %p1266_p4 }
  0x65   : > { %1115 = vmatmul.mubr.msk.f32.gmra.mrb[4].mxu1 %vm280_vm1, %v268_v14 }
  0x66   : > { %1117 = vmatprep.mubr.msk.f32.mxu1 %vm280_vm1, %v269_v16 }
  0x67   : > { %1094 = vmatmul.mubr.msk.f32.gmra.mrb[6].mxu0 %vm280_vm1, %v254_v13 }
  0x68   : > { %1096 = vmatprep.mubr.msk.f32.mxu0 %vm280_vm1, %v255_v15 }
  0x69   : > { %1118 = vmatmul.mubr.msk.f32.gmra.mrb[6].mxu1 %vm280_vm1, %v270_v18 }
  0x6a   : > { %1120 = vmatprep.mubr.msk.f32.mxu1 %vm280_vm1, %v271_v20 }
  0x6b   : > { %1097 = vmatmul.mubr.msk.f32.gmra.mrb[8].mxu0 %vm280_vm1, %v256_v17 }
  0x6c   : > { %1099 = vmatprep.mubr.msk.f32.mxu0 %vm280_vm1, %v257_v19 }
  0x6d   : > { %1121 = vmatmul.mubr.msk.f32.gmra.mrb[8].mxu1 %vm280_vm1, %v272_v22 }
  0x6e   : > { %1123 = vmatprep.mubr.msk.f32.mxu1 %vm280_vm1, %v273_v24 }
  0x6f   : > { %1100 = vmatmul.mubr.msk.f32.gmra.mrb[10].mxu0 %vm280_vm1, %v258_v21 }
  0x70   : > { %1102 = vmatprep.mubr.msk.f32.mxu0 %vm280_vm1, %v259_v23 }
  0x71   : > { %1124 = vmatmul.mubr.msk.f32.gmra.mrb[10].mxu1 %vm280_vm1, %v274_v26 }
  0x72   : > { %1126 = vmatprep.mubr.msk.f32.mxu1 %vm280_vm1, %v275_v28 }
  0x73   : > { %1103 = vmatmul.mubr.msk.f32.gmra.mrb[12].mxu0 %vm280_vm1, %v260_v25 }
  0x74   : > { %1105 = vmatprep.mubr.msk.f32.mxu0 %vm280_vm1, %v261_v27 }
  0x75   : > { %1127 = vmatmul.mubr.msk.f32.gmra.mrb[12].mxu1 %vm280_vm1, %v276_v30 }
  0x76   : > { %1129 = vmatprep.mubr.msk.f32.mxu1 %vm280_vm1, %v277_v31 }
  0x77   : > { %1106 = vmatmul.mubr.msk.f32.gmra.mrb[14].mxu0 %vm280_vm1, %v262_v29 }
  0x79   : > { %1130 = vmatmul.mubr.msk.f32.gmra.mrb[14].mxu1 %vm280_vm1, %v278_v32 }
 0x12e   : > { %v1086_v33 = vpop.f32.mrb[0].mxu0 }
 0x12f   : > { %608 = vst.msk [vmem:[%s1649_s26 + $0x8] sm:$0xff] %vm606_vm2, %v1086_v33  ;;  %v640_v34 = vsel %vm606_vm2, %v1086_v33, 0.0  ;;  %v711_v35 = vmul.f32 %v1086_v33, %v1086_v33  ;;  %v447_v36 = vpop.f32.mrb[1].mxu0 }
 0x130   : > { %607 = vst.msk [vmem:[%s1649_s26] sm:$0xff] %vm606_vm2, %v447_v36  ;;  %v639_v37 = vsel %vm606_vm2, %v447_v36, 0.0  ;;  %v710_v38 = vmul.f32 %v447_v36, %v447_v36  ;;  %v1659_v43 = vpop.f32.mrb[0].mxu1 }
 0x131   : > { %v743_v39 = vsel %vm606_vm2, %v711_v35, 0.0  ;;  %v641_v40 = vadd.f32 %v640_v34, %v639_v37  ;;  %624 = vst.msk [vmem:[%s1649_s26 + $0x88] sm:$0xff] %vm606_vm2, %v1659_v43  ;;  %v1666_v46 = vpop.f32.mrb[1].mxu1 }
 0x132   : > { %v742_v41 = vsel %vm606_vm2, %v710_v38, 0.0  ;;  %v1089_v42 = vpop.f32.mrb[2].mxu0  ;;  %623 = vst.msk [vmem:[%s1649_s26 + $0x80] sm:$0xff] %vm606_vm2, %v1666_v46 }
 0x133   : > { %v744_v44 = vadd.f32 %v743_v39, %v742_v41  ;;  %610 = vst.msk [vmem:[%s1649_s26 + $0x18] sm:$0xff] %vm606_vm2, %v1089_v42  ;;  %v457_v45 = vpop.f32.mrb[3].mxu0  ;;  %v713_v47 = vmul.f32 %v1089_v42, %v1089_v42  ;;  %v644_v51 = vsel %vm606_vm2, %v1089_v42, 0.0 }
 0x134   : > { %609 = vst.msk [vmem:[%s1649_s26 + $0x10] sm:$0xff] %vm606_vm2, %v457_v45  ;;  %v642_v48 = vsel %vm606_vm2, %v457_v45, 0.0  ;;  %v712_v49 = vmul.f32 %v457_v45, %v457_v45  ;;  %v1676_v54 = vpop.f32.mrb[2].mxu1 }
 0x135   : > { %v643_v50 = vadd.f32 %v642_v48, %v641_v40  ;;  %626 = vst.msk [vmem:[%s1649_s26 + $0x98] sm:$0xff] %vm606_vm2, %v1676_v54  ;;  %v1683_v58 = vpop.f32.mrb[3].mxu1  ;;  %v747_v59 = vsel %vm606_vm2, %v713_v47, 0.0 }
 0x136   : > { %v745_v52 = vsel %vm606_vm2, %v712_v49, 0.0  ;;  %v1092_v53 = vpop.f32.mrb[4].mxu0  ;;  %625 = vst.msk [vmem:[%s1649_s26 + $0x90] sm:$0xff] %vm606_vm2, %v1683_v58 }
 0x137   : > { %v746_v55 = vadd.f32 %v745_v52, %v744_v44  ;;  %612 = vst.msk [vmem:[%s1649_s26 + $0x28] sm:$0xff] %vm606_vm2, %v1092_v53  ;;  %v467_v56 = vpop.f32.mrb[5].mxu0  ;;  %v645_v57 = vadd.f32 %v644_v51, %v643_v50  ;;  %v715_v60 = vmul.f32 %v1092_v53, %v1092_v53  ;;  %v648_v1 = vsel %vm606_vm2, %v1092_v53, 0.0 }
 0x138   : > { %611 = vst.msk [vmem:[%s1649_s26 + $0x20] sm:$0xff] %vm606_vm2, %v467_v56  ;;  %v646_v61 = vsel %vm606_vm2, %v467_v56, 0.0  ;;  %v714_v62 = vmul.f32 %v467_v56, %v467_v56  ;;  %v1694_v4 = vpop.f32.mrb[4].mxu1 }
 0x139   : > { %v647_v63 = vadd.f32 %v646_v61, %v645_v57  ;;  %v748_v0 = vadd.f32 %v747_v59, %v746_v55  ;;  %628 = vst.msk [vmem:[%s1649_s26 + $0xa8] sm:$0xff] %vm606_vm2, %v1694_v4  ;;  %v1701_v8 = vpop.f32.mrb[5].mxu1  ;;  %v751_v9 = vsel %vm606_vm2, %v715_v60, 0.0 }
 0x13a   : > { %v749_v2 = vsel %vm606_vm2, %v714_v62, 0.0  ;;  %v1095_v3 = vpop.f32.mrb[6].mxu0  ;;  %627 = vst.msk [vmem:[%s1649_s26 + $0xa0] sm:$0xff] %vm606_vm2, %v1701_v8 }
 0x13b   : > { %v750_v5 = vadd.f32 %v749_v2, %v748_v0  ;;  %614 = vst.msk [vmem:[%s1649_s26 + $0x38] sm:$0xff] %vm606_vm2, %v1095_v3  ;;  %v477_v6 = vpop.f32.mrb[7].mxu0  ;;  %v649_v7 = vadd.f32 %v648_v1, %v647_v63  ;;  %v717_v10 = vmul.f32 %v1095_v3, %v1095_v3  ;;  %v652_v15 = vsel %vm606_vm2, %v1095_v3, 0.0 }
 0x13c   : > { %613 = vst.msk [vmem:[%s1649_s26 + $0x30] sm:$0xff] %vm606_vm2, %v477_v6  ;;  %v650_v11 = vsel %vm606_vm2, %v477_v6, 0.0  ;;  %v716_v12 = vmul.f32 %v477_v6, %v477_v6  ;;  %v1712_v18 = vpop.f32.mrb[6].mxu1 }
 0x13d   : > { %v651_v13 = vadd.f32 %v650_v11, %v649_v7  ;;  %v752_v14 = vadd.f32 %v751_v9, %v750_v5  ;;  %630 = vst.msk [vmem:[%s1649_s26 + $0xb8] sm:$0xff] %vm606_vm2, %v1712_v18  ;;  %v1719_v22 = vpop.f32.mrb[7].mxu1  ;;  %v755_v23 = vsel %vm606_vm2, %v717_v10, 0.0  ;;  %v726_v5 = vmul.f32 %v1666_v46, %v1666_v46 }
 0x13e   : > { %v753_v16 = vsel %vm606_vm2, %v716_v12, 0.0  ;;  %v1098_v17 = vpop.f32.mrb[8].mxu0  ;;  %629 = vst.msk [vmem:[%s1649_s26 + $0xb0] sm:$0xff] %vm606_vm2, %v1719_v22 }
 0x13f   : > { %v754_v19 = vadd.f32 %v753_v16, %v752_v14  ;;  %616 = vst.msk [vmem:[%s1649_s26 + $0x48] sm:$0xff] %vm606_vm2, %v1098_v17  ;;  %v487_v20 = vpop.f32.mrb[9].mxu0  ;;  %v653_v21 = vadd.f32 %v652_v15, %v651_v13  ;;  %v719_v24 = vmul.f32 %v1098_v17, %v1098_v17  ;;  %v656_v29 = vsel %vm606_vm2, %v1098_v17, 0.0 }
 0x140   : > { %615 = vst.msk [vmem:[%s1649_s26 + $0x40] sm:$0xff] %vm606_vm2, %v487_v20  ;;  %v654_v25 = vsel %vm606_vm2, %v487_v20, 0.0  ;;  %v718_v26 = vmul.f32 %v487_v20, %v487_v20  ;;  %v1730_v32 = vpop.f32.mrb[8].mxu1  ;;  %v670_v16 = vsel %vm606_vm2, %v1666_v46, 0.0  ;;  %v727_v46 = vmul.f32 %v1659_v43, %v1659_v43 }
 0x141   : > { %v655_v27 = vadd.f32 %v654_v25, %v653_v21  ;;  %v756_v28 = vadd.f32 %v755_v23, %v754_v19  ;;  %632 = vst.msk [vmem:[%s1649_s26 + $0xc8] sm:$0xff] %vm606_vm2, %v1730_v32  ;;  %v1737_v36 = vpop.f32.mrb[9].mxu1  ;;  %v759_v37 = vsel %vm606_vm2, %v719_v24, 0.0  ;;  %v773_v25 = vsel %vm606_vm2, %v726_v5, 0.0 }
 0x142   : > { %v757_v30 = vsel %vm606_vm2, %v718_v26, 0.0  ;;  %v1101_v31 = vpop.f32.mrb[10].mxu0  ;;  %631 = vst.msk [vmem:[%s1649_s26 + $0xc0] sm:$0xff] %vm606_vm2, %v1737_v36  ;;  %v728_v26 = vmul.f32 %v1683_v58, %v1683_v58 }
 0x143   : > { %v758_v33 = vadd.f32 %v757_v30, %v756_v28  ;;  %618 = vst.msk [vmem:[%s1649_s26 + $0x58] sm:$0xff] %vm606_vm2, %v1101_v31  ;;  %v497_v34 = vpop.f32.mrb[11].mxu0  ;;  %v657_v35 = vadd.f32 %v656_v29, %v655_v27  ;;  %v721_v38 = vmul.f32 %v1101_v31, %v1101_v31  ;;  %v660_v44 = vsel %vm606_vm2, %v1101_v31, 0.0 }
 0x144   : > { %617 = vst.msk [vmem:[%s1649_s26 + $0x50] sm:$0xff] %vm606_vm2, %v497_v34  ;;  %v658_v39 = vsel %vm606_vm2, %v497_v34, 0.0  ;;  %v720_v40 = vmul.f32 %v497_v34, %v497_v34  ;;  %v1748_v48 = vpop.f32.mrb[10].mxu1 }
 0x145   : > { %v659_v41 = vadd.f32 %v658_v39, %v657_v35  ;;  %v760_v42 = vadd.f32 %v759_v37, %v758_v33  ;;  %634 = vst.msk [vmem:[%s1649_s26 + $0xd8] sm:$0xff] %vm606_vm2, %v1748_v48  ;;  %v1755_v52 = vpop.f32.mrb[11].mxu1  ;;  %v763_v53 = vsel %vm606_vm2, %v721_v38, 0.0 }
 0x146   : > { %v761_v45 = vsel %vm606_vm2, %v720_v40, 0.0  ;;  %v1104_v47 = vpop.f32.mrb[12].mxu0  ;;  %633 = vst.msk [vmem:[%s1649_s26 + $0xd0] sm:$0xff] %vm606_vm2, %v1755_v52 }
 0x147   : > { %v762_v49 = vadd.f32 %v761_v45, %v760_v42  ;;  %620 = vst.msk [vmem:[%s1649_s26 + $0x68] sm:$0xff] %vm606_vm2, %v1104_v47  ;;  %v507_v50 = vpop.f32.mrb[13].mxu0  ;;  %v661_v51 = vadd.f32 %v660_v44, %v659_v41  ;;  %v723_v55 = vmul.f32 %v1104_v47, %v1104_v47  ;;  %v664_v61 = vsel %vm606_vm2, %v1104_v47, 0.0 }
 0x148   : > { %619 = vst.msk [vmem:[%s1649_s26 + $0x60] sm:$0xff] %vm606_vm2, %v507_v50  ;;  %v662_v56 = vsel %vm606_vm2, %v507_v50, 0.0  ;;  %v722_v57 = vmul.f32 %v507_v50, %v507_v50  ;;  %v1766_v0 = vpop.f32.mrb[12].mxu1 }
 0x149   : > { %v663_v59 = vadd.f32 %v662_v56, %v661_v51  ;;  %v764_v60 = vadd.f32 %v763_v53, %v762_v49  ;;  %636 = vst.msk [vmem:[%s1649_s26 + $0xe8] sm:$0xff] %vm606_vm2, %v1766_v0  ;;  %v1777_v6 = vpop.f32.mrb[13].mxu1  ;;  %v767_v7 = vsel %vm606_vm2, %v723_v55, 0.0 }
 0x14a   : > { %v765_v62 = vsel %vm606_vm2, %v722_v57, 0.0  ;;  %v1107_v63 = vpop.f32.mrb[14].mxu0  ;;  %635 = vst.msk [vmem:[%s1649_s26 + $0xe0] sm:$0xff] %vm606_vm2, %v1777_v6 }
 0x14b   : > { %v766_v1 = vadd.f32 %v765_v62, %v764_v60  ;;  %622 = vst.msk [vmem:[%s1649_s26 + $0x78] sm:$0xff] %vm606_vm2, %v1107_v63  ;;  %v517_v2 = vpop.f32.mrb[15].mxu0  ;;  %v665_v3 = vadd.f32 %v664_v61, %v663_v59  ;;  %v725_v9 = vmul.f32 %v1107_v63, %v1107_v63  ;;  %v668_v14 = vsel %vm606_vm2, %v1107_v63, 0.0 }
 0x14c   : > { %621 = vst.msk [vmem:[%s1649_s26 + $0x70] sm:$0xff] %vm606_vm2, %v517_v2  ;;  %v666_v10 = vsel %vm606_vm2, %v517_v2, 0.0  ;;  %v724_v11 = vmul.f32 %v517_v2, %v517_v2  ;;  %v1797_v17 = vpop.f32.mrb[14].mxu1 }
 0x14d   : > { %v667_v12 = vadd.f32 %v666_v10, %v665_v3  ;;  %v768_v13 = vadd.f32 %v767_v7, %v766_v1  ;;  %638 = vst.msk [vmem:[%s1649_s26 + $0xf8] sm:$0xff] %vm606_vm2, %v1797_v17  ;;  %v741_v21 = vmul.f32 %v1797_v17, %v1797_v17  ;;  %v1804_v23 = vpop.f32.mrb[15].mxu1  ;;  %v771_v24 = vsel %vm606_vm2, %v725_v9, 0.0 }
 0x14e   : > { %v769_v15 = vsel %vm606_vm2, %v724_v11, 0.0  ;;  %637 = vst.msk [vmem:[%s1649_s26 + $0xf0] sm:$0xff] %vm606_vm2, %v1804_v23 }
 0x14f   : > { %v669_v19 = vadd.f32 %v668_v14, %v667_v12  ;;  %v770_v20 = vadd.f32 %v769_v15, %v768_v13  ;;  %v1816_v29 = vsel %vm606_vm2, %v741_v21, 0.0 }
 0x151   : > { %v772_v27 = vadd.f32 %v771_v24, %v770_v20  ;;  %v671_v28 = vadd.f32 %v670_v16, %v669_v19 }
 0x152   : > { %1276 = shalt.err (!%p1273_p13)
}
 0x153   : > { %s1277_s5 = scalar_lea.hbm %s1789_s6, 4096  ;;  %s1281_s11 = scalar_lea.hbm %s2003_s2, 8192 }
 0x154   : > { %p1278_p7 = scmp.ne.s32.totalorder %s1789_s6, %s1277_s5  ;;  %p1282_p1 = scmp.lt.u32.totalorder %s1789_s6, %s2003_s2 }
 0x155   : > { %p1283_p11 = scmp.lt.u32.totalorder %s1281_s11, %s1277_s5  ;;  %p1285_p9 = scmp.lt.u32.totalorder %s1277_s5, %s1789_s6 }
 0x156   : > { %p1279_p3 = pnand %p1278_p7, %p2024_p10 }
 0x157   : > { %p1284_p8 = por %p1283_p11, %p1282_p1 }
 0x158   : > { %p1280_p12 = pneg %p1279_p3 }
 0x159   : > { %p1286_p2 = por %p1285_p9, %p1284_p8 }
 0x15b   : > { %p1287_p4 = pnand %p1286_p2, %p1280_p12 }
 0x15d   : > { %1290 = shalt.err (!%p1287_p4)
}
 0x15e   : > { %s1400_s13 = smov 128   ;;  %s1401_s23 = smov 8   ;;  %v672_v30 = vsel %vm606_vm2, %v1659_v43, 0.0  ;;  %v674_v31 = vsel %vm606_vm2, %v1683_v58, 0.0  ;;  %v774_v33 = vadd.f32 %v773_v25, %v772_v27  ;;  %v775_v35 = vsel %vm606_vm2, %v727_v46, 0.0 }
 0x15f   : > { %1140 = dma.vmem_to_hbm [thread:$0]  (%p2024_p10), %s1791_s8, 4096, %s1789_s6, %s813_s7, %s1400_s13, %s1400_s13, %s1401_s23   ;;  %v673_v34 = vadd.f32 %v672_v30, %v671_v28  ;;  %v729_v37 = vmul.f32 %v1676_v54, %v1676_v54  ;;  %v777_v38 = vsel %vm606_vm2, %v728_v26, 0.0  ;;  %v730_v39 = vmul.f32 %v1701_v8, %v1701_v8 }
 0x160   : > { %v776_v41 = vadd.f32 %v775_v35, %v774_v33  ;;  %v676_v43 = vsel %vm606_vm2, %v1676_v54, 0.0  ;;  %v678_v58 = vsel %vm606_vm2, %v1701_v8, 0.0  ;;  %v731_v47 = vmul.f32 %v1694_v4, %v1694_v4  ;;  %s817_s8 = sand.u32 1, %s1450_s19   ;;  %s1043_s6 = sshll.u32 %s1450_s19, 4 }
 0x161   : > { %v675_v40 = vadd.f32 %v674_v31, %v673_v34  ;;  %v779_v45 = vsel %vm606_vm2, %v729_v37, 0.0  ;;  %v781_v49 = vsel %vm606_vm2, %v730_v39, 0.0  ;;  %v732_v50 = vmul.f32 %v1719_v22, %v1719_v22  ;;  %s238_s7 = scalar_lea.vmem [#allocation8], %s1567_s9  ;;  %s244_s14 = scalar_lea.vmem [#allocation10], %s1567_s9 }
 0x162   : > { %v778_v42 = vadd.f32 %v777_v38, %v776_v41  ;;  %v680_v54 = vsel %vm606_vm2, %v1694_v4, 0.0  ;;  %v682_v8 = vsel %vm606_vm2, %v1719_v22, 0.0  ;;  %v783_v57 = vsel %vm606_vm2, %v731_v47, 0.0  ;;  %s850_s12 = sshll.u32 %s238_s7, 4  ;;  %s863_s22 = sshll.u32 %s244_s14, 4  ;;  %s1922_s12 = int_to_ptr.vmem [resolvable:$true] %s850_s12  ;;  %s1930_s22 = int_to_ptr.vmem [resolvable:$true] %s863_s22 }
 0x163   : > { %v677_v44 = vadd.f32 %v676_v43, %v675_v40  ;;  %v733_v59 = vmul.f32 %v1712_v18, %v1712_v18  ;;  %v785_v60 = vsel %vm606_vm2, %v732_v50, 0.0  ;;  %v734_v61 = vmul.f32 %v1737_v36, %v1737_v36  ;;  %s1920_s30 = scalar_lea.hbm %s2004_s3, %s1043_s6  ;;  %s1928_s11 = scalar_lea.hbm %s2005_s4, %s1043_s6 }
 0x164   : > { %v780_v53 = vadd.f32 %v779_v45, %v778_v42  ;;  %v684_v4 = vsel %vm606_vm2, %v1712_v18, 0.0  ;;  %v686_v22 = vsel %vm606_vm2, %v1737_v36, 0.0  ;;  %v735_v5 = vmul.f32 %v1730_v32, %v1730_v32  ;;  %s1932_s26 = scalar_lea.sflag [#allocation9], %s817_s8  ;;  %s1291_s29 = scalar_lea.vmem %s1922_s12, 16 }
 0x165   : > { %v679_v51 = vadd.f32 %v678_v58, %v677_v44  ;;  %v787_v3 = vsel %vm606_vm2, %v733_v59, 0.0  ;;  %v789_v7 = vsel %vm606_vm2, %v734_v61, 0.0  ;;  %v736_v9 = vmul.f32 %v1755_v52, %v1755_v52  ;;  %p1292_p5 = scmp.ne.s32.totalorder %s1922_s12, %s1291_s29  ;;  %s1402_s13 = smov [#allocation8]  }
 0x166   : > { %v782_v55 = vadd.f32 %v781_v49, %v780_v53  ;;  %v688_v18 = vsel %vm606_vm2, %v1730_v32, 0.0  ;;  %v690_v36 = vsel %vm606_vm2, %v1755_v52, 0.0  ;;  %v791_v14 = vsel %vm606_vm2, %v735_v5, 0.0  ;;  %s1295_s23 = sshll.u32 %s1402_s13, 4  ;;  %s1296_s23 = int_to_ptr.vmem [resolvable:$false] %s1295_s23 }
 0x167   : > { %v681_v56 = vadd.f32 %v680_v54, %v679_v51  ;;  %v737_v15 = vmul.f32 %v1748_v48, %v1748_v48  ;;  %v793_v16 = vsel %vm606_vm2, %v736_v9, 0.0  ;;  %v738_v19 = vmul.f32 %v1777_v6, %v1777_v6  ;;  %p1293_p0 = pnand %p1292_p5, %p2024_p10  ;;  %s1297_s25 = scalar_lea.vmem %s1296_s23, 32 }
 0x168   : > { %v784_v63 = vadd.f32 %v783_v57, %v782_v55  ;;  %v692_v32 = vsel %vm606_vm2, %v1748_v48, 0.0  ;;  %v694_v52 = vsel %vm606_vm2, %v1777_v6, 0.0  ;;  %v739_v26 = vmul.f32 %v1766_v0, %v1766_v0  ;;  %p1298_p13 = scmp.lt.s32.totalorder %s1922_s12, %s1296_s23  ;;  %p1299_p7 = scmp.lt.s32.totalorder %s1297_s25, %s1291_s29 }
 0x169   : > { %v683_v62 = vadd.f32 %v682_v8, %v681_v56  ;;  %v795_v25 = vsel %vm606_vm2, %v737_v15, 0.0  ;;  %v797_v27 = vsel %vm606_vm2, %v738_v19, 0.0  ;;  %v740_v28 = vmul.f32 %v1804_v23, %v1804_v23  ;;  %p1294_p6 = pneg %p1293_p0 }
 0x16a   : > { %v786_v1 = vadd.f32 %v785_v60, %v784_v63  ;;  %v696_v48 = vsel %vm606_vm2, %v1766_v0, 0.0  ;;  %v698_v6 = vsel %vm606_vm2, %v1804_v23, 0.0  ;;  %v799_v35 = vsel %vm606_vm2, %v739_v26, 0.0  ;;  %p1300_p3 = por %p1299_p7, %p1298_p13 }
 0x16b   : > { %v685_v2 = vadd.f32 %v684_v4, %v683_v62  ;;  %v801_v37 = vsel %vm606_vm2, %v740_v28, 0.0  ;;  %v700_v40 = vsel %vm606_vm2, %v1797_v17, 0.0  ;;  %vm708_vm3 = vcmask 57344  }
 0x16c   : > { %v788_v11 = vadd.f32 %v787_v3, %v786_v1  ;;  %p1301_p12 = pnand %p1300_p3, %p1294_p6 }
 0x16d   : > { %v687_v10 = vadd.f32 %v686_v22, %v685_v2 }
 0x16e   : > { %v790_v12 = vadd.f32 %v789_v7, %v788_v11 }
 0x16f   : > { %v689_v13 = vadd.f32 %v688_v18, %v687_v10 }
 0x170   : > { %v792_v21 = vadd.f32 %v791_v14, %v790_v12 }
 0x171   : > { %v691_v20 = vadd.f32 %v690_v36, %v689_v13 }
 0x172   : > { %v794_v24 = vadd.f32 %v793_v16, %v792_v21 }
 0x173   : > { %v693_v46 = vadd.f32 %v692_v32, %v691_v20 }
 0x174   : > { %v796_v31 = vadd.f32 %v795_v25, %v794_v24 }
 0x175   : > { %v695_v30 = vadd.f32 %v694_v52, %v693_v46 }
 0x176   : > { %v798_v33 = vadd.f32 %v797_v27, %v796_v31 }
 0x177   : > { %v697_v34 = vadd.f32 %v696_v48, %v695_v30 }
 0x178   : > { %v800_v39 = vadd.f32 %v799_v35, %v798_v33 }
 0x179   : > { %v699_v38 = vadd.f32 %v698_v6, %v697_v34 }
 0x17a   : > { %v802_v43 = vadd.f32 %v801_v37, %v800_v39 }
 0x17b   : > { %v701_v41 = vadd.f32 %v700_v40, %v699_v38 }
 0x17c   : > { %v804_v23 = vadd.f32 %v1816_v29, %v802_v43 }
 0x17d   : > { %v702_v0 = vrot.slane %v701_v41, 4 }
 0x17e   : > { %v805_v42 = vrot.slane %v804_v23, 4 }
 0x17f   : > { %v703_v58 = vadd.f32 %v702_v0, %v701_v41 }
 0x180   : > { %v806_v45 = vadd.f32 %v805_v42, %v804_v23 }
 0x181   : > { %v704_v44 = vrot.slane %v703_v58, 2 }
 0x182   : > { %v807_v49 = vrot.slane %v806_v45, 2 }
 0x183   : > { %v705_v47 = vadd.f32 %v704_v44, %v703_v58 }
 0x184   : > { %v808_v17 = vadd.f32 %v807_v49, %v806_v45 }
 0x185   : > { %v706_v50 = vrot.slane %v705_v47, 1 }
 0x186   : > { %v809_v53 = vrot.slane %v808_v17, 1 }
 0x187   : > { %v707_v51 = vadd.f32 %v706_v50, %v705_v47 }
 0x188   : > { %v810_v29 = vadd.f32 %v809_v53, %v808_v17 }
 0x189   : > { %709 = vst.msk [vmem:[%s238_s7] sm:$0x1] %vm708_vm3, %v707_v51 }
 0x18a   : > { %1304 = shalt.err (!%p1301_p12)
}
 0x18b   : > { %s1305_s8 = scalar_lea.hbm %s1920_s30, 16  ;;  %s1309_s5 = scalar_lea.hbm %s2004_s3, 32 }
 0x18c   : > { %p1306_p1 = scmp.ne.s32.totalorder %s1920_s30, %s1305_s8  ;;  %p1310_p9 = scmp.lt.u32.totalorder %s1920_s30, %s2004_s3 }
 0x18d   : > { %p1311_p2 = scmp.lt.u32.totalorder %s1309_s5, %s1305_s8  ;;  %p1313_p5 = scmp.lt.u32.totalorder %s1305_s8, %s1920_s30 }
 0x18e   : > { %p1307_p11 = pnand %p1306_p1, %p2024_p10 }
 0x18f   : > { %p1312_p4 = por %p1311_p2, %p1310_p9 }
 0x190   : > { %p1308_p8 = pneg %p1307_p11 }
 0x191   : > { %p1314_p0 = por %p1313_p5, %p1312_p4 }
 0x193   : > { %p1315_p6 = pnand %p1314_p0, %p1308_p8 }
 0x195   : > { %1318 = shalt.err (!%p1315_p6)
}
 0x196   : > { %1141 = dma.vmem_to_hbm [thread:$0]  (%p2024_p10), %s1922_s12, 16, %s1920_s30, %s1932_s26   ;;  %811 = vst.msk [vmem:[%s244_s14] sm:$0x1] %vm708_vm3, %v810_v29 }
 0x197   : > { %s1319_s29 = scalar_lea.vmem %s1930_s22, 16  ;;  %s1403_s13 = smov [#allocation10]  }
 0x198   : > { %p1320_p13 = scmp.ne.s32.totalorder %s1930_s22, %s1319_s29  ;;  %s1323_s23 = sshll.u32 %s1403_s13, 4  ;;  %s1324_s23 = int_to_ptr.vmem [resolvable:$false] %s1323_s23 }
 0x199   : > { %s1325_s25 = scalar_lea.vmem %s1324_s23, 32  ;;  %p1326_p12 = scmp.lt.s32.totalorder %s1930_s22, %s1324_s23 }
 0x19a   : > { %p1321_p7 = pnand %p1320_p13, %p2024_p10  ;;  %p1327_p1 = scmp.lt.s32.totalorder %s1325_s25, %s1319_s29 }
 0x19c   : > { %p1322_p3 = pneg %p1321_p7  ;;  %p1328_p11 = por %p1327_p1, %p1326_p12 }
 0x19e   : > { %p1329_p8 = pnand %p1328_p11, %p1322_p3 }
 0x1a0   : > { %1332 = shalt.err (!%p1329_p8)
}
 0x1a1   : > { %s1333_s9 = scalar_lea.hbm %s1928_s11, 16  ;;  %s1337_s30 = scalar_lea.hbm %s2005_s4, 32 }
 0x1a2   : > { %p1334_p9 = scmp.ne.s32.totalorder %s1928_s11, %s1333_s9  ;;  %p1338_p5 = scmp.lt.u32.totalorder %s1928_s11, %s2005_s4 }
 0x1a3   : > { %p1339_p0 = scmp.lt.u32.totalorder %s1337_s30, %s1333_s9  ;;  %p1341_p13 = scmp.lt.u32.totalorder %s1333_s9, %s1928_s11 }
 0x1a4   : > { %p1335_p2 = pnand %p1334_p9, %p2024_p10 }
 0x1a5   : > { %p1340_p6 = por %p1339_p0, %p1338_p5 }
 0x1a6   : > { %p1336_p4 = pneg %p1335_p2 }
 0x1a7   : > { %p1342_p7 = por %p1341_p13, %p1340_p6 }
 0x1a9   : > { %p1343_p3 = pnand %p1342_p7, %p1336_p4 }
 0x1ab   : > { %1346 = shalt.err (!%p1343_p3)
}
 0x1ac   : > { %1142 = dma.vmem_to_hbm [thread:$0]  (%p2024_p10), %s1930_s22, 16, %s1928_s11, %s1932_s26  }
 0x1ad PF: > { %s875_s7 = sand.u32 1, %s1381_s15   ;;  %p2025_p12 = scmp.ne.s32.totalorder %s2014_s28, 0 }
 0x1ae   : > { %p2026_p1 = scmp.ge.s32.totalorder %s1393_s18, 2  ;;  %s876_s5 = scalar_lea.sflag [#allocation4], %s875_s7 }
 0x1b0   : > { %p1155_p11 = pnand %p2026_p1, %p2025_p12 }
 0x1b2   : > { %1372 = dma.done.wait (!%p1155_p11), %s876_s5, 4096  }
 0x1b3   : > { %1374 = vsyncadd (!%p1155_p11), %s876_s5, 4294963200  ;;  %s884_s19 = sand.u32 1, %s996_s20  }
 0x1b4   : > { %s885_s10 = scalar_lea.sflag [#allocation9], %s884_s19 }
 0x1b5   : > { %1376 = dma.done.wait (!%p1155_p11), %s885_s10, 32  }
 0x1b6   : > { %1378 = vsyncadd (!%p1155_p11), %s885_s10, 4294967264  ;;  %p22_p10 = scmp.ge.s32.totalorder %s1454_s21, 4   ;;  %s2027_s15 = smov %s1385_s16 }
 0x1b7   : > { %s2028_s16 = smov %s1389_s17  ;;  %s2029_s17 = smov %s1466_s24 }
 0x1b8   : > { %s2030_s18 = smov %s1454_s21  ;;  %24 = sbr.rel (!%p22_p10) target bundleno = 8 (0x8), region = 109 }
 0x1bf   :  { %897 = vsyncpa [#allocation3], 1 }
 0x1c0   :  { %899 = vsyncpa [#allocation3 + $0x1], 1 }
 0x1c1   :  { %900 = vsyncpa [#allocation6], 1 }
 0x1c2   :  { %901 = vsyncpa [#allocation4], 1 }
 0x1c3   :  { %903 = vsyncpa [#allocation4 + $0x1], 1 }
 0x1c4   :  { %904 = vsyncpa [#allocation9], 1 }
 0x1c5   :  { %906 = vsyncpa [#allocation9 + $0x1], 1 }

// kernel: conv_block_forward.7
= control target key start
LH: loop header
LB: loop body
LE: loop exit
PB: predicated region body
PF: predicated region fallthrough
CT: control target
= control target key end

     0   :  { %s1419_s0 = inlined_call_operand.hbm [shape: f32[128,16], index: 0, kind: input, shape index: {}]   ;;  %s1420_s1 = inlined_call_operand.hbm [shape: f32[1,16], index: 1, kind: input, shape index: {}]   ;;  %s1421_s2 = inlined_call_operand.hbm [shape: f32[1,16], index: 2, kind: input, shape index: {}]   ;;  %s1422_s3 = inlined_call_operand.hbm [shape: f32[128,16], index: 3, kind: input, shape index: {}]   ;;  %s1423_s4 = inlined_call_operand.hbm [shape: f32[1,16], index: 4, kind: input, shape index: {}]   ;;  %s1424_s5 = inlined_call_operand.hbm [shape: f32[1,16], index: 5, kind: input, shape index: {}]   ;;  %s1425_s6 = inlined_call_operand.hbm [shape: f32[128,16], index: 6, kind: output, shape index: {}]  }
   0x1   :  { %1429 = sst [smem:[#allocation20_spill]] %s1419_s0 }
   0x2   :  { %1430 = sst [smem:[#allocation21_spill]] %s1420_s1 }
   0x3   :  { %1431 = sst [smem:[#allocation22_spill]] %s1421_s2 }
   0x4   :  { %11 = vsyncpa [#allocation3], 0 }
   0x5   :  { %13 = vsyncpa [#allocation3 + $0x1], 0 }
   0x6   :  { %14 = vsyncpa [#allocation6], 0 }
   0x7   :  { %15 = vsyncpa [#allocation9], 0 }
   0x8   :  { %17 = vsyncpa [#allocation9 + $0x1], 0 }
   0x9   :  { %18 = vsyncpa [#allocation12], 0 }
   0xa   :  { %19 = vsyncpa [#allocation4], 0 }
   0xb   :  { %21 = vsyncpa [#allocation4 + $0x1], 0  ;;  %s1043_s21 = smov 0   ;;  %s1045_s22 = smov 0  }
   0xc   :  { %s1047_s23 = smov 0   ;;  %s1049_s24 = smov 0  }
   0xd LB: > { %s1064_s25 = sadd.s32 4294967295, %s995_s24   ;;  %s612_s26 = sadd.s32 4294967294, %s995_s24   ;;  %s995_s24 = sphi %s1049_s24, %s1456_s24   ;;  %s991_s23 = sphi %s1047_s23, %s1455_s23   ;;  %s987_s22 = sphi %s1045_s22, %s1454_s22   ;;  %s983_s21 = sphi %s1043_s21, %s1453_s21  }
   0xe   : > { %p47_p0 = scmp.ne.s32.totalorder %s987_s22, %s983_s21  ;;  %p1426_p1 = scmp.eq.s32.totalorder %s1064_s25, 0 }
   0xf   : > { %p187_p3 = scmp.eq.s32.totalorder %s612_s26, 1  ;;  %p613_p5 = scmp.ge.s32.totalorder %s995_s24, 1 }
  0x10   : > { %p1073_p4 = por %p1426_p1, %p47_p0  ;;  %p194_p7 = scmp.lt.s32.totalorder %s995_s24, 3 }
  0x11   : > { %p1078_p6 = por %p187_p3, %p47_p0  ;;  %s997_s30 = smov [#allocation5]  }
  0x12   : > { %s1432_s27 = scalar_select %p1073_p4, 1, 0 }
  0x13   : > { %s1433_s28 = scalar_select %p1078_p6, 1, 0 }
  0x14   : > { %p1083_p8 = pnand %p613_p5, %p194_p7  ;;  %s207_s7 = sshll.u32 %s997_s30, 4  ;;  %s208_s7 = int_to_ptr.vmem [resolvable:$true] %s207_s7 }
  0x15   : > { %s998_s8 = smov [#allocation10]   ;;  %s999_s11 = smov [#allocation7]  }
  0x16   : > { %s1434_s29 = scalar_select %p1083_p8, 1, 0 }
  0x17   : > { %p667_p10 = pneg %p1083_p8  ;;  %s229_s9 = sshll.u32 %s998_s8, 4  ;;  %s1096_s9 = int_to_ptr.vmem [resolvable:$true] %s229_s9 }
  0x18   : > { %s218_s12 = sshll.u32 %s999_s11, 4  ;;  %s1436_s1 = sld [smem:[#allocation21_spill]]  ;;  %s1098_s12 = int_to_ptr.vmem [resolvable:$true] %s218_s12 }
  0x19   : > { %p1092_p11 = pnand %p667_p10, %p1426_p1 }
  0x1b   : > { %p1108_p13 = pneg %p1092_p11 }
  0x1e   : > { %s741_s15 = scalar_lea.hbm %s1436_s1, 16 }
  0x1f   : > { %p742_p12 = scmp.ne.s32.totalorder %s1436_s1, %s741_s15  ;;  %p748_p5 = scmp.lt.u32.totalorder %s741_s15, %s1436_s1 }
  0x21   : > { %p744_p0 = pnand %p1108_p13, %p742_p12 }
  0x23   : > { %p745_p3 = pneg %p744_p0 }
  0x25   : > { %p750_p7 = pnand %p748_p5, %p745_p3 }
  0x27   : > { %753 = shalt.err (!%p750_p7)
}
  0x28   : > { %s754_s26 = scalar_lea.vmem %s208_s7, 16  ;;  %s761_s30 = scalar_lea.vmem %s208_s7, 32 }
  0x29   : > { %p755_p10 = scmp.ne.s32.totalorder %s208_s7, %s754_s26  ;;  %p762_p2 = scmp.lt.s32.totalorder %s208_s7, %s208_s7 }
  0x2a   : > { %p763_p6 = scmp.lt.s32.totalorder %s761_s30, %s754_s26 }
  0x2b   : > { %p757_p9 = pnand %p755_p10, %p1108_p13 }
  0x2c   : > { %p764_p4 = por %p763_p6, %p762_p2 }
  0x2d   : > { %p758_p1 = pneg %p757_p9 }
  0x2f   : > { %p765_p8 = pnand %p764_p4, %p758_p1 }
  0x31   : > { %768 = shalt.err (!%p765_p8)
}
  0x32   : > { %670 = dma.hbm_to_vmem [thread:$0]  (!%p1092_p11), %s1436_s1, 16, %s208_s7, [#allocation6]  }
  0x33   : > { %s769_s15 = scalar_lea.hbm %s1423_s4, 16 }
  0x34   : > { %p770_p9 = scmp.ne.s32.totalorder %s1423_s4, %s769_s15  ;;  %p776_p1 = scmp.lt.u32.totalorder %s769_s15, %s1423_s4 }
  0x36   : > { %p772_p12 = pnand %p770_p9, %p1108_p13 }
  0x38   : > { %p773_p2 = pneg %p772_p12 }
  0x3a   : > { %p778_p4 = pnand %p776_p1, %p773_p2 }
  0x3c   : > { %781 = shalt.err (!%p778_p4)
}
  0x3d   : > { %s782_s7 = scalar_lea.vmem %s1096_s9, 16  ;;  %s789_s26 = scalar_lea.vmem %s1096_s9, 32 }
  0x3e   : > { %p783_p6 = scmp.ne.s32.totalorder %s1096_s9, %s782_s7  ;;  %p790_p3 = scmp.lt.s32.totalorder %s1096_s9, %s1096_s9 }
  0x3f   : > { %p791_p5 = scmp.lt.s32.totalorder %s789_s26, %s782_s7 }
  0x40   : > { %p785_p8 = pnand %p783_p6, %p1108_p13 }
  0x41   : > { %p792_p7 = por %p791_p5, %p790_p3 }
  0x42   : > { %p786_p0 = pneg %p785_p8 }
  0x44   : > { %p793_p10 = pnand %p792_p7, %p786_p0 }
  0x46   : > { %796 = shalt.err (!%p793_p10)
}
  0x47   : > { %676 = dma.hbm_to_vmem [thread:$0]  (!%p1092_p11), %s1423_s4, 16, %s1096_s9, [#allocation9]  }
  0x48   : > { %s1438_s2 = sld [smem:[#allocation22_spill]] }
  0x4e   : > { %s797_s14 = scalar_lea.hbm %s1438_s2, 16 }
  0x4f   : > { %p798_p9 = scmp.ne.s32.totalorder %s1438_s2, %s797_s14  ;;  %p804_p1 = scmp.lt.u32.totalorder %s797_s14, %s1438_s2 }
  0x51   : > { %p800_p12 = pnand %p798_p9, %p1108_p13 }
  0x53   : > { %p801_p2 = pneg %p800_p12 }
  0x55   : > { %p806_p4 = pnand %p804_p1, %p801_p2 }
  0x57   : > { %809 = shalt.err (!%p806_p4)
}
  0x58   : > { %s810_s9 = scalar_lea.vmem %s1098_s12, 16  ;;  %s817_s20 = scalar_lea.vmem %s1098_s12, 32 }
  0x59   : > { %p811_p6 = scmp.ne.s32.totalorder %s1098_s12, %s810_s9  ;;  %p818_p3 = scmp.lt.s32.totalorder %s1098_s12, %s1098_s12 }
  0x5a   : > { %p819_p5 = scmp.lt.s32.totalorder %s817_s20, %s810_s9 }
  0x5b   : > { %p813_p8 = pnand %p811_p6, %p1108_p13 }
  0x5c   : > { %p820_p7 = por %p819_p5, %p818_p3 }
  0x5d   : > { %p814_p0 = pneg %p813_p8 }
  0x5f   : > { %p821_p10 = pnand %p820_p7, %p814_p0 }
  0x61   : > { %824 = shalt.err (!%p821_p10)
}
  0x62   : > { %673 = dma.hbm_to_vmem [thread:$0]  (!%p1092_p11), %s1438_s2, 16, %s1098_s12, [#allocation6]  }
  0x63   : > { %s1000_s30 = smov [#allocation11]   ;;  %s825_s14 = scalar_lea.hbm %s1424_s5, 16 }
  0x64   : > { %s240_s8 = sshll.u32 %s1000_s30, 4  ;;  %p826_p9 = scmp.ne.s32.totalorder %s1424_s5, %s825_s14  ;;  %s241_s8 = int_to_ptr.vmem [resolvable:$true] %s240_s8 }
  0x65   : > { %p832_p1 = scmp.lt.u32.totalorder %s825_s14, %s1424_s5 }
  0x66   : > { %p828_p12 = pnand %p826_p9, %p1108_p13 }
  0x68   : > { %p829_p2 = pneg %p828_p12 }
  0x6a   : > { %p834_p4 = pnand %p832_p1, %p829_p2 }
  0x6c   : > { %837 = shalt.err (!%p834_p4)
}
  0x6d   : > { %s838_s12 = scalar_lea.vmem %s241_s8, 16  ;;  %s845_s9 = scalar_lea.vmem %s241_s8, 32 }
  0x6e   : > { %p839_p6 = scmp.ne.s32.totalorder %s241_s8, %s838_s12  ;;  %p846_p3 = scmp.lt.s32.totalorder %s241_s8, %s241_s8 }
  0x6f   : > { %p847_p5 = scmp.lt.s32.totalorder %s845_s9, %s838_s12 }
  0x70   : > { %p841_p8 = pnand %p839_p6, %p1108_p13 }
  0x71   : > { %p848_p7 = por %p847_p5, %p846_p3 }
  0x72   : > { %p842_p0 = pneg %p841_p8 }
  0x74   : > { %p849_p10 = pnand %p848_p7, %p842_p0 }
  0x76   : > { %852 = shalt.err (!%p849_p10)
}
  0x77   : > { %679 = dma.hbm_to_vmem [thread:$0]  (!%p1092_p11), %s1424_s5, 16, %s241_s8, [#allocation12]  }
  0x78   : > { %s1191_s18 = sadd.s32 1, %s995_s24   ;;  %s34_s10 = sadd.s32 1, %s991_s23 }
  0x79   : > { %s31_s26 = ssub.s32 %s995_s24, %s1191_s18  ;;  %p41_p13 = scmp.ne.s32.totalorder %s991_s23, %s987_s22 }
  0x7a   : > { %p32_p9 = scmp.eq.s32.totalorder %s31_s26, 0  ;;  %p42_p12 = scmp.eq.s32.totalorder %s995_s24, 0 }
  0x7b   : > { %p1439_p2 = scmp.eq.s32.totalorder %s1064_s25, 1  ;;  %p695_p4 = scmp.lt.s32.totalorder %s995_s24, 2 }
  0x7c   : > { %s1207_s11 = scalar_select %p32_p9, %s991_s23, %s34_s10  }
  0x7d   : > { %p1201_p1 = por %p1439_p2, %p41_p13  ;;  %p43_p6 = por %p42_p12, %p41_p13 }
  0x7e   : > { %s251_s13 = sand.u32 1, %s991_s23   ;;  %s642_s8 = sshll.u32 %s995_s24, 10 }
  0x7f   : > { %s1210_s14 = sshll.u32 %s251_s13, 6  ;;  %s1441_s0 = sld [smem:[#allocation20_spill]] }
  0x80   : > { %s255_s19 = scalar_lea.vmem [#allocation2], %s1210_s14  ;;  %p1223_p11 = pnand %p695_p4, %p43_p6 }
  0x81   : > { %s262_s12 = sshll.u32 %s255_s19, 4  ;;  %s1227_s20 = scalar_lea.sflag [#allocation3], %s251_s13  ;;  %s1221_s12 = int_to_ptr.vmem [resolvable:$true] %s262_s12 }
  0x82   : > { %p855_p0 = pneg %p1223_p11 }
  0x85   : > { %s1218_s17 = scalar_lea.hbm %s1441_s0, %s642_s8  ;;  %s858_s15 = scalar_lea.hbm %s1441_s0, 2048 }
  0x86   : > { %s853_s7 = scalar_lea.hbm %s1218_s17, 1024  ;;  %p859_p7 = scmp.lt.u32.totalorder %s1218_s17, %s1441_s0 }
  0x87   : > { %p854_p8 = scmp.ne.s32.totalorder %s1218_s17, %s853_s7  ;;  %p860_p10 = scmp.lt.u32.totalorder %s858_s15, %s853_s7 }
  0x88   : > { %p862_p9 = scmp.lt.u32.totalorder %s853_s7, %s1218_s17 }
  0x89   : > { %p856_p3 = pnand %p855_p0, %p854_p8  ;;  %p861_p13 = por %p860_p10, %p859_p7 }
  0x8b   : > { %p857_p5 = pneg %p856_p3  ;;  %p863_p12 = por %p862_p9, %p861_p13 }
  0x8d   : > { %p864_p2 = pnand %p863_p12, %p857_p5 }
  0x8f   : > { %867 = shalt.err (!%p864_p2)
}
  0x90   : > { %s868_s13 = scalar_lea.vmem %s1221_s12, 1024  ;;  %s1001_s10 = smov [#allocation2]  }
  0x91   : > { %p869_p4 = scmp.ne.s32.totalorder %s1221_s12, %s868_s13  ;;  %s873_s26 = sshll.u32 %s1001_s10, 4  ;;  %s874_s26 = int_to_ptr.vmem [resolvable:$false] %s873_s26 }
  0x92   : > { %s875_s16 = scalar_lea.vmem %s874_s26, 2048  ;;  %p876_p3 = scmp.lt.s32.totalorder %s1221_s12, %s874_s26 }
  0x93   : > { %p871_p6 = pnand %p869_p4, %p855_p0  ;;  %p877_p7 = scmp.lt.s32.totalorder %s875_s16, %s868_s13 }
  0x95   : > { %p872_p8 = pneg %p871_p6  ;;  %p878_p10 = por %p877_p7, %p876_p3 }
  0x97   : > { %p879_p13 = pnand %p878_p10, %p872_p8 }
  0x99   : > { %882 = shalt.err (!%p879_p13)
}
  0x9a   : > { %s1002_s7 = smov 128   ;;  %s1003_s15 = smov 8  }
  0x9b   : > { %683 = dma.hbm_to_vmem [thread:$0]  (!%p1223_p11), %s1218_s17, 1024, %s1221_s12, %s1227_s20, %s1002_s7, %s1002_s7, %s1003_s15  }
  0x9c   : > { %s1263_s10 = scalar_lea.hbm %s1422_s3, %s642_s8  ;;  %s276_s26 = scalar_lea.vmem [#allocation8], %s1210_s14 }
  0x9d   : > { %s283_s16 = sshll.u32 %s276_s26, 4  ;;  %s272_s0 = sand.u32 1, %s995_s24   ;;  %s1266_s16 = int_to_ptr.vmem [resolvable:$true] %s283_s16 }
  0x9e   : > { %s1269_s1 = scalar_lea.sflag [#allocation9], %s272_s0  ;;  %s883_s2 = scalar_lea.hbm %s1263_s10, 1024 }
  0x9f   : > { %p884_p5 = scmp.ne.s32.totalorder %s1263_s10, %s883_s2  ;;  %s888_s12 = scalar_lea.hbm %s1422_s3, 2048 }
  0xa0   : > { %p889_p2 = scmp.lt.u32.totalorder %s1263_s10, %s1422_s3  ;;  %p890_p4 = scmp.lt.u32.totalorder %s888_s12, %s883_s2 }
  0xa1   : > { %p886_p9 = pnand %p884_p5, %p855_p0  ;;  %p892_p8 = scmp.lt.u32.totalorder %s883_s2, %s1263_s10 }
  0xa2   : > { %p891_p6 = por %p890_p4, %p889_p2 }
  0xa3   : > { %p887_p12 = pneg %p886_p9 }
  0xa4   : > { %p893_p3 = por %p892_p8, %p891_p6 }
  0xa6   : > { %p894_p7 = pnand %p893_p3, %p887_p12 }
  0xa8   : > { %897 = shalt.err (!%p894_p7)
}
  0xa9   : > { %s898_s0 = scalar_lea.vmem %s1266_s16, 1024  ;;  %s1004_s14 = smov [#allocation8]  }
  0xaa   : > { %p899_p10 = scmp.ne.s32.totalorder %s1266_s16, %s898_s0  ;;  %s903_s13 = sshll.u32 %s1004_s14, 4  ;;  %s904_s13 = int_to_ptr.vmem [resolvable:$false] %s903_s13 }
  0xab   : > { %s905_s26 = scalar_lea.vmem %s904_s13, 2048  ;;  %p906_p9 = scmp.lt.s32.totalorder %s1266_s16, %s904_s13 }
  0xac   : > { %p901_p13 = pnand %p899_p10, %p855_p0  ;;  %p907_p2 = scmp.lt.s32.totalorder %s905_s26, %s898_s0 }
  0xae   : > { %p902_p5 = pneg %p901_p13  ;;  %p908_p4 = por %p907_p2, %p906_p9 }
  0xb0   : > { %p909_p6 = pnand %p908_p4, %p902_p5 }
  0xb2   : > { %912 = shalt.err (!%p909_p6)
}
  0xb3   : > { %686 = dma.hbm_to_vmem [thread:$0]  (!%p1223_p11), %s1263_s10, 1024, %s1266_s16, %s1269_s1, %s1002_s7, %s1002_s7, %s1003_s15  }
  0xb4   : > { %p1443_p0 = scmp.ne.s32.totalorder %s1434_s29, 0 }
  0xb5   : > { %s1301_s2 = sand.u32 (!%p1443_p0), 1, %s987_s22   ;;  %p1444_p12 = scmp.ne.s32.totalorder (!%p1443_p0), %s1432_s27, 0 }
  0xb6   : > { %295 = sbr.rel (%p1443_p0) target bundleno = 238 (0xee), region = 44  ;;  %s1304_s17 = sshll.u32 (!%p1443_p0), %s1301_s2, 6 }
  0xb7   : > { %s298_s9 = scalar_lea.sflag (!%p1443_p0), [#allocation3], %s1301_s2  ;;  %s1308_s8 = scalar_lea.vmem (!%p1443_p0), [#allocation2], %s1304_s17 }
  0xbd   : > { %958 = dma.done.wait (%p1444_p12), %s298_s9, 1024  }
  0xbe   : > { %960 = vsyncadd (%p1444_p12), %s298_s9, 4294966272  ;;  %p1445_p11 = scmp.eq.s32.totalorder %s1064_s25, 0 }
  0xc0   : > { %962 = dma.done.wait (%p1445_p11), [#allocation6], 32   ;;  %p1446_p8 = pmov %p1445_p11 }
  0xc1   : > { %s314_s1 = sand.u32 1, %s1064_s25   ;;  %s1320_s7 = scalar_lea.vmem [#allocation8], %s1304_s17 }
  0xc2   : > { %964 = vsyncadd (%p1446_p8), [#allocation6], 4294967264  ;;  %s315_s29 = scalar_lea.sflag [#allocation9], %s314_s1 }
  0xc3   : > { %966 = dma.done.wait (%p1444_p12), %s315_s29, 1024  }
  0xc4   : > { %968 = vsyncadd (%p1444_p12), %s315_s29, 4294966272  ;;  %p1447_p3 = pmov %p1446_p8 }
  0xc6   : > { %970 = dma.done.wait (%p1447_p3), [#allocation9], 16   ;;  %p1448_p7 = pmov %p1447_p3 }
  0xc7   : > { %p1449_p10 = pmov %p1447_p3 }
  0xc8   : > { %972 = vsyncadd (%p1448_p7), [#allocation9], 4294967280 }
  0xc9   : > { %974 = dma.done.wait (%p1449_p10), [#allocation12], 16   ;;  %p1450_p13 = pmov %p1447_p3 }
  0xca   : > { %v363_v0 = vld [vmem:[%s1308_s8] sm:$0xff]  ;;  %v364_v8 = vld [vmem:[%s1308_s8 + $0x8] sm:$0xff]  ;;  %v365_v10 = vld [vmem:[%s1308_s8 + $0x10] sm:$0xff]  ;;  %vm455_vm0 = vcmask 130048   ;;  %s359_s27 = scalar_lea.vmem [#allocation13], %s1304_s17  ;;  %s644_s10 = sshll.u32 %s1064_s25, 10 }
  0xcb   : > { %976 = vsyncadd (%p1450_p13), [#allocation12], 4294967280  ;;  %v633_v1 = vld [vmem:[#allocation5] ss:$0 sm:$0xff]  ;;  %v634_v2 = vld [vmem:[#allocation7] ss:$0 sm:$0xff]  ;;  %s1373_s20 = scalar_lea.hbm %s1425_s6, %s644_s10 }
  0xcc   : > { %v378_v3 = vmul.f32 %v633_v1, %v363_v0  ;;  %v401_v4 = vld [vmem:[%s1320_s7] sm:$0xff]  ;;  %v402_v9 = vld [vmem:[%s1320_s7 + $0x8] sm:$0xff]  ;;  %v379_v12 = vmul.f32 %v633_v1, %v364_v8  ;;  %v380_v14 = vmul.f32 %v633_v1, %v365_v10  ;;  %v403_v15 = vld [vmem:[%s1320_s7 + $0x10] sm:$0xff]  ;;  %s478_s15 = sshll.u32 %s359_s27, 4  ;;  %s465_s25 = scalar_lea.sflag [#allocation4], %s1301_s2  ;;  %s1368_s15 = int_to_ptr.vmem [resolvable:$true] %s478_s15 }
  0xcd   : > { %v635_v5 = vld [vmem:[#allocation10] ss:$0 sm:$0xff]  ;;  %v1336_v7 = vld [vmem:[#allocation11] ss:$0 sm:$0xff]  ;;  %v366_v16 = vld [vmem:[%s1308_s8 + $0x18] sm:$0xff]  ;;  %s913_s19 = scalar_lea.vmem %s1368_s15, 1024 }
  0xce   : > { %v416_v6 = vmul.f32 %v635_v5, %v401_v4  ;;  %v393_v11 = vadd.f32 %v634_v2, %v378_v3  ;;  %v417_v13 = vmul.f32 %v635_v5, %v402_v9  ;;  %v404_v17 = vld [vmem:[%s1320_s7 + $0x18] sm:$0xff]  ;;  %v418_v18 = vmul.f32 %v635_v5, %v403_v15  ;;  %v405_v22 = vld [vmem:[%s1320_s7 + $0x20] sm:$0xff]  ;;  %v406_v28 = vld [vmem:[%s1320_s7 + $0x28] sm:$0xff]  ;;  %p914_p5 = scmp.ne.s32.totalorder %s1368_s15, %s913_s19  ;;  %s1005_s0 = smov [#allocation13]  }
  0xcf   : > { %v381_v19 = vmul.f32 %v633_v1, %v366_v16  ;;  %v419_v20 = vmul.f32 %v635_v5, %v404_v17  ;;  %v367_v21 = vld [vmem:[%s1308_s8 + $0x20] sm:$0xff]  ;;  %v368_v23 = vld [vmem:[%s1308_s8 + $0x28] sm:$0xff]  ;;  %v394_v25 = vadd.f32 %v634_v2, %v379_v12  ;;  %v395_v26 = vadd.f32 %v634_v2, %v380_v14  ;;  %v369_v29 = vld [vmem:[%s1308_s8 + $0x30] sm:$0xff]  ;;  %s917_s14 = sshll.u32 %s1005_s0, 4  ;;  %s918_s14 = int_to_ptr.vmem [resolvable:$false] %s917_s14 }
  0xd0   : > { %v424_v24 = vadd.f32 %v416_v6, %v393_v11  ;;  %v382_v27 = vmul.f32 %v633_v1, %v367_v21  ;;  %v407_v30 = vld [vmem:[%s1320_s7 + $0x30] sm:$0xff]  ;;  %v420_v32 = vmul.f32 %v635_v5, %v405_v22  ;;  %v383_v33 = vmul.f32 %v633_v1, %v368_v23  ;;  %v408_v44 = vld [vmem:[%s1320_s7 + $0x38] sm:$0xff]  ;;  %p915_p9 = pnand %p914_p5, %p1201_p1  ;;  %s919_s13 = scalar_lea.vmem %s918_s14, 2048 }
  0xd1   : > { %v396_v31 = vadd.f32 %v634_v2, %v381_v19  ;;  %v421_v34 = vmul.f32 %v635_v5, %v406_v28  ;;  %v425_v36 = vadd.f32 %v417_v13, %v394_v25  ;;  %v426_v37 = vadd.f32 %v418_v18, %v395_v26  ;;  %v370_v39 = vld [vmem:[%s1308_s8 + $0x38] sm:$0xff]  ;;  %p920_p4 = scmp.lt.s32.totalorder %s1368_s15, %s918_s14  ;;  %p921_p6 = scmp.lt.s32.totalorder %s919_s13, %s913_s19 }
  0xd2   : > { %v439_v35 = vadd.f32 %v1336_v7, %v424_v24  ;;  %v397_v38 = vadd.f32 %v634_v2, %v382_v27  ;;  %v398_v41 = vadd.f32 %v634_v2, %v383_v33  ;;  %v384_v42 = vmul.f32 %v633_v1, %v369_v29  ;;  %p916_p2 = pneg %p915_p9 }
  0xd3   : > { %v427_v40 = vadd.f32 %v419_v20, %v396_v31  ;;  %v422_v43 = vmul.f32 %v635_v5, %v407_v30  ;;  %v440_v46 = vadd.f32 %v1336_v7, %v425_v36  ;;  %v441_v47 = vadd.f32 %v1336_v7, %v426_v37  ;;  %p922_p0 = por %p921_p6, %p920_p4 }
  0xd4   : > { %v447_v45 = vmax.f32 %v439_v35, 0.0  ;;  %v428_v48 = vadd.f32 %v420_v32, %v397_v38  ;;  %v429_v50 = vadd.f32 %v421_v34, %v398_v41  ;;  %v399_v51 = vadd.f32 %v634_v2, %v384_v42 }
  0xd5   : > { %v442_v49 = vadd.f32 %v1336_v7, %v427_v40  ;;  %v385_v52 = vmul.f32 %v633_v1, %v370_v39  ;;  %v448_v53 = vmax.f32 %v440_v46, 0.0  ;;  %v449_v54 = vmax.f32 %v441_v47, 0.0  ;;  %p923_p12 = pnand %p922_p0, %p916_p2 }
  0xd6   : > { %456 = vst.msk [vmem:[%s359_s27] sm:$0xff] %vm455_vm0, %v447_v45  ;;  %v443_v55 = vadd.f32 %v1336_v7, %v428_v48  ;;  %v423_v56 = vmul.f32 %v635_v5, %v408_v44  ;;  %v444_v58 = vadd.f32 %v1336_v7, %v429_v50  ;;  %v430_v59 = vadd.f32 %v422_v43, %v399_v51 }
  0xd7   : > { %v450_v57 = vmax.f32 %v442_v49, 0.0  ;;  %v400_v60 = vadd.f32 %v634_v2, %v385_v52  ;;  %457 = vst.msk [vmem:[%s359_s27 + $0x8] sm:$0xff] %vm455_vm0, %v448_v53  ;;  %458 = vst.msk [vmem:[%s359_s27 + $0x10] sm:$0xff] %vm455_vm0, %v449_v54 }
  0xd8   : > { %v451_v61 = vmax.f32 %v443_v55, 0.0  ;;  %v452_v62 = vmax.f32 %v444_v58, 0.0  ;;  %v445_v63 = vadd.f32 %v1336_v7, %v430_v59 }
  0xd9   : > { %459 = vst.msk [vmem:[%s359_s27 + $0x18] sm:$0xff] %vm455_vm0, %v450_v57  ;;  %v431_v0 = vadd.f32 %v423_v56, %v400_v60 }
  0xda   : > { %460 = vst.msk [vmem:[%s359_s27 + $0x20] sm:$0xff] %vm455_vm0, %v451_v61  ;;  %461 = vst.msk [vmem:[%s359_s27 + $0x28] sm:$0xff] %vm455_vm0, %v452_v62  ;;  %v453_v1 = vmax.f32 %v445_v63, 0.0 }
  0xdb   : > { %v446_v2 = vadd.f32 %v1336_v7, %v431_v0 }
  0xdc   : > { %462 = vst.msk [vmem:[%s359_s27 + $0x30] sm:$0xff] %vm455_vm0, %v453_v1 }
  0xdd   : > { %v454_v3 = vmax.f32 %v446_v2, 0.0 }
  0xdf   : > { %463 = vst.msk [vmem:[%s359_s27 + $0x38] sm:$0xff] %vm455_vm0, %v454_v3 }
  0xe0   : > { %926 = shalt.err (!%p923_p12)
}
  0xe1   : > { %s927_s26 = scalar_lea.hbm %s1373_s20, 1024  ;;  %s931_s8 = scalar_lea.hbm %s1425_s6, 2048 }
  0xe2   : > { %p928_p11 = scmp.ne.s32.totalorder %s1373_s20, %s927_s26  ;;  %p932_p7 = scmp.lt.u32.totalorder %s1373_s20, %s1425_s6 }
  0xe3   : > { %p933_p10 = scmp.lt.u32.totalorder %s931_s8, %s927_s26  ;;  %p935_p5 = scmp.lt.u32.totalorder %s927_s26, %s1373_s20 }
  0xe4   : > { %p929_p8 = pnand %p928_p11, %p1201_p1 }
  0xe5   : > { %p934_p13 = por %p933_p10, %p932_p7 }
  0xe6   : > { %p930_p3 = pneg %p929_p8 }
  0xe7   : > { %p936_p9 = por %p935_p5, %p934_p13 }
  0xe9   : > { %p937_p2 = pnand %p936_p9, %p930_p3 }
  0xeb   : > { %940 = shalt.err (!%p937_p2)
}
  0xec   : > { %s1006_s7 = smov 128   ;;  %s1007_s27 = smov 8  }
  0xed   : > { %665 = dma.vmem_to_hbm [thread:$0]  (%p1201_p1), %s1368_s15, 1024, %s1373_s20, %s465_s25, %s1006_s7, %s1006_s7, %s1007_s27  }
  0xee PF: > { %s493_s10 = sand.u32 1, %s983_s21   ;;  %p1451_p4 = scmp.ne.s32.totalorder %s1433_s28, 0 }
  0xef   : > { %p1452_p6 = scmp.ge.s32.totalorder %s995_s24, 2  ;;  %s494_s16 = scalar_lea.sflag [#allocation4], %s493_s10 }
  0xf1   : > { %p688_p0 = pnand %p1452_p6, %p1451_p4 }
  0xf3   : > { %978 = dma.done.wait (!%p688_p0), %s494_s16, 1024  }
  0xf4   : > { %980 = vsyncadd (!%p688_p0), %s494_s16, 4294966272  ;;  %p24_p12 = scmp.ge.s32.totalorder %s1191_s18, 4   ;;  %s1453_s21 = smov %s987_s22 }
  0xf5   : > { %s1454_s22 = smov %s991_s23  ;;  %s1455_s23 = smov %s1207_s11 }
  0xf6   : > { %s1456_s24 = smov %s1191_s18  ;;  %26 = sbr.rel (!%p24_p12) target bundleno = 13 (0xd), region = 118 }
  0xfd   :  { %499 = vsyncpa [#allocation3], 1 }
  0xfe   :  { %501 = vsyncpa [#allocation3 + $0x1], 1 }
  0xff   :  { %502 = vsyncpa [#allocation6], 1 }
 0x100   :  { %503 = vsyncpa [#allocation9], 1 }
 0x101   :  { %505 = vsyncpa [#allocation9 + $0x1], 1 }
 0x102   :  { %506 = vsyncpa [#allocation12], 1 }
 0x103   :  { %507 = vsyncpa [#allocation4], 1 }
 0x104   :  { %509 = vsyncpa [#allocation4 + $0x1], 1 }

// kernel: conv_block_forward.6
= control target key start
LH: loop header
LB: loop body
LE: loop exit
PB: predicated region body
PF: predicated region fallthrough
CT: control target
= control target key end

     0   :  { %s2698_s0 = inlined_call_operand.hbm [shape: f32[128,8], index: 0, kind: input, shape index: {}]   ;;  %s2699_s1 = inlined_call_operand.hbm [shape: f32[1,8], index: 1, kind: input, shape index: {}]   ;;  %s2700_s2 = inlined_call_operand.hbm [shape: f32[1,8], index: 2, kind: input, shape index: {}]   ;;  %s2701_s3 = inlined_call_operand.hbm [shape: f32[8,16], index: 3, kind: input, shape index: {}]   ;;  %s2702_s4 = inlined_call_operand.hbm [shape: f32[128,4], index: 4, kind: input, shape index: {}]   ;;  %s2703_s5 = inlined_call_operand.hbm [shape: f32[4,16], index: 5, kind: input, shape index: {}]   ;;  %s2704_s6 = inlined_call_operand.hbm [shape: f32[128,16], index: 6, kind: output, shape index: {0}]   ;;  %s2705_s7 = inlined_call_operand.hbm [shape: f32[128,16], index: 7, kind: output, shape index: {1}]   ;;  %s2706_s8 = inlined_call_operand.hbm [shape: f32[2,1,16], index: 8, kind: output, shape index: {2}]   ;;  %s2707_s9 = inlined_call_operand.hbm [shape: f32[2,1,16], index: 9, kind: output, shape index: {3}]   ;;  %s2708_s10 = inlined_call_operand.hbm [shape: f32[2,1,16], index: 10, kind: output, shape index: {4}]   ;;  %s2709_s11 = inlined_call_operand.hbm [shape: f32[2,1,16], index: 11, kind: output, shape index: {5}]  }
   0x1   :  { %2733 = sst [smem:[#allocation36_spill]] %s2698_s0 }
   0x2   :  { %2734 = sst [smem:[#allocation37_spill]] %s2699_s1 }
   0x3   :  { %2735 = sst [smem:[#allocation38_spill]] %s2700_s2 }
   0x4   :  { %2736 = sst [smem:[#allocation39_spill]] %s2704_s6 }
   0x5   :  { %2737 = sst [smem:[#allocation40_spill]] %s2706_s8 }
   0x6   :  { %2738 = sst [smem:[#allocation41_spill]] %s2707_s9 }
   0x7   :  { %2739 = sst [smem:[#allocation42_spill]] %s2708_s10 }
   0x8   :  { %2740 = sst [smem:[#allocation43_spill]] %s2709_s11 }
   0x9   :  { %17 = vsyncpa [#allocation3], 0 }
   0xa   :  { %19 = vsyncpa [#allocation3 + $0x1], 0 }
   0xb   :  { %20 = vsyncpa [#allocation6], 0 }
   0xc   :  { %21 = vsyncpa [#allocation9], 0 }
   0xd   :  { %22 = vsyncpa [#allocation4], 0 }
   0xe   :  { %24 = vsyncpa [#allocation4 + $0x1], 0 }
   0xf   :  { %25 = vsyncpa [#allocation14], 0 }
  0x10   :  { %27 = vsyncpa [#allocation14 + $0x1], 0 }
  0x11   :  { %28 = vsyncpa [#allocation17], 0 }
  0x12   :  { %30 = vsyncpa [#allocation17 + $0x1], 0 }
  0x13   :  { %31 = vsyncpa [#allocation20], 0 }
  0x14   :  { %33 = vsyncpa [#allocation20 + $0x1], 0  ;;  %s2059_s17 = smov 0   ;;  %s2061_s18 = smov 0  }
  0x15   :  { %s2063_s19 = smov 0   ;;  %s2065_s20 = smov 0  }
  0x16 LB: > { %2741 = sst [smem:[#allocation30_spill]] %s1969_s17  ;;  %s2080_s21 = sadd.s32 4294967295, %s1981_s20   ;;  %s1981_s20 = sphi %s2065_s20, %s2784_s20   ;;  %s1977_s19 = sphi %s2063_s19, %s2786_s19   ;;  %s1973_s18 = sphi %s2061_s18, %s2788_s18   ;;  %s1969_s17 = sphi %s2059_s17, %s2787_s17  }
  0x17   : > { %2742 = sst [smem:[#allocation31_spill]] %s1977_s19  ;;  %s2710_s22 = sadd.s32 4294967294, %s1981_s20  }
  0x18   : > { %p59_p0 = scmp.ne.s32.totalorder %s1973_s18, %s1969_s17  ;;  %p2713_p1 = scmp.eq.s32.totalorder %s2080_s21, 0 }
  0x19   : > { %p199_p3 = scmp.eq.s32.totalorder %s2710_s22, 1  ;;  %p1352_p5 = scmp.ge.s32.totalorder %s1981_s20, 1 }
  0x1a   : > { %p2091_p4 = por %p2713_p1, %p59_p0  ;;  %p336_p7 = scmp.lt.s32.totalorder %s1981_s20, 3 }
  0x1b   : > { %p2096_p6 = por %p199_p3, %p59_p0  ;;  %s1983_s26 = smov [#allocation5]  }
  0x1c   : > { %s2743_s23 = scalar_select %p2091_p4, 1, 0 }
  0x1d   : > { %s2744_s24 = scalar_select %p2096_p6, 1, 0 }
  0x1e   : > { %p2101_p8 = pnand %p1352_p5, %p336_p7  ;;  %s349_s27 = sshll.u32 %s1983_s26, 4  ;;  %s350_s27 = int_to_ptr.vmem [resolvable:$true] %s349_s27 }
  0x1f   : > { %2745 = sst [smem:[#allocation32_spill]] %s2744_s24  ;;  %s1984_s28 = smov [#allocation7]  }
  0x20   : > { %s2746_s25 = scalar_select %p2101_p8, 1, 0 }
  0x21   : > { %p1486_p10 = pneg %p2101_p8  ;;  %s360_s29 = sshll.u32 %s1984_s28, 4  ;;  %s2114_s29 = int_to_ptr.vmem [resolvable:$true] %s360_s29 }
  0x22   : > { %s2117_s12 = sadd.s32 1, %s1981_s20   ;;  %s2749_s1 = sld [smem:[#allocation37_spill]] }
  0x23   : > { %p2110_p11 = pnand %p1486_p10, %p2713_p1  ;;  %2748 = sst [smem:[#allocation33_spill]] %s2117_s12 }
  0x25   : > { %s2747_s30 = scalar_select %p2110_p11, 1, 0 }
  0x26   : > { %p2129_p13 = pneg %p2110_p11 }
  0x28   : > { %s1575_s16 = scalar_lea.hbm %s2749_s1, 16 }
  0x29   : > { %p1576_p12 = scmp.ne.s32.totalorder %s2749_s1, %s1575_s16  ;;  %p1582_p5 = scmp.lt.u32.totalorder %s1575_s16, %s2749_s1 }
  0x2b   : > { %p1578_p0 = pnand %p2129_p13, %p1576_p12 }
  0x2d   : > { %p1579_p3 = pneg %p1578_p0 }
  0x2f   : > { %p1584_p7 = pnand %p1582_p5, %p1579_p3 }
  0x31   : > { %1587 = shalt.err (!%p1584_p7)
}
  0x32   : > { %s1588_s14 = scalar_lea.vmem %s350_s27, 16  ;;  %s1595_s22 = scalar_lea.vmem %s350_s27, 32 }
  0x33   : > { %p1589_p10 = scmp.ne.s32.totalorder %s350_s27, %s1588_s14  ;;  %p1596_p2 = scmp.lt.s32.totalorder %s350_s27, %s350_s27 }
  0x34   : > { %p1597_p6 = scmp.lt.s32.totalorder %s1595_s22, %s1588_s14 }
  0x35   : > { %p1591_p9 = pnand %p1589_p10, %p2129_p13 }
  0x36   : > { %p1598_p4 = por %p1597_p6, %p1596_p2 }
  0x37   : > { %p1592_p1 = pneg %p1591_p9 }
  0x39   : > { %p1599_p8 = pnand %p1598_p4, %p1592_p1 }
  0x3b   : > { %1602 = shalt.err (!%p1599_p8)
}
  0x3c   : > { %1489 = dma.hbm_to_vmem [thread:$0]  (!%p2110_p11), %s2749_s1, 16, %s350_s27, [#allocation6]  }
  0x3d   : > { %s2751_s2 = sld [smem:[#allocation38_spill]] }
  0x43   : > { %s1603_s16 = scalar_lea.hbm %s2751_s2, 16 }
  0x44   : > { %p1604_p9 = scmp.ne.s32.totalorder %s2751_s2, %s1603_s16  ;;  %p1610_p1 = scmp.lt.u32.totalorder %s1603_s16, %s2751_s2 }
  0x46   : > { %p1606_p12 = pnand %p1604_p9, %p2129_p13 }
  0x48   : > { %p1607_p2 = pneg %p1606_p12 }
  0x4a   : > { %p1612_p4 = pnand %p1610_p1, %p1607_p2 }
  0x4c   : > { %1615 = shalt.err (!%p1612_p4)
}
  0x4d   : > { %s1616_s27 = scalar_lea.vmem %s2114_s29, 16  ;;  %s1623_s10 = scalar_lea.vmem %s2114_s29, 32 }
  0x4e   : > { %p1617_p6 = scmp.ne.s32.totalorder %s2114_s29, %s1616_s27  ;;  %p1624_p3 = scmp.lt.s32.totalorder %s2114_s29, %s2114_s29 }
  0x4f   : > { %p1625_p5 = scmp.lt.s32.totalorder %s1623_s10, %s1616_s27 }
  0x50   : > { %p1619_p8 = pnand %p1617_p6, %p2129_p13 }
  0x51   : > { %p1626_p7 = por %p1625_p5, %p1624_p3 }
  0x52   : > { %p1620_p0 = pneg %p1619_p8 }
  0x54   : > { %p1627_p10 = pnand %p1626_p7, %p1620_p0 }
  0x56   : > { %1630 = shalt.err (!%p1627_p10)
}
  0x57   : > { %1492 = dma.hbm_to_vmem [thread:$0]  (!%p2110_p11), %s2751_s2, 16, %s2114_s29, [#allocation6]  }
  0x58   : > { %s2752_s26 = ssub.s32 %s1981_s20, %s2117_s12  ;;  %s46_s17 = sadd.s32 1, %s1977_s19 }
  0x59   : > { %p44_p9 = scmp.eq.s32.totalorder %s2752_s26, 0  ;;  %p53_p12 = scmp.ne.s32.totalorder %s1977_s19, %s1973_s18 }
  0x5a   : > { %p54_p2 = scmp.eq.s32.totalorder %s1981_s20, 0  ;;  %p2754_p4 = scmp.eq.s32.totalorder %s2080_s21, 1 }
  0x5b   : > { %s2177_s24 = scalar_select %p44_p9, %s1977_s19, %s46_s17  }
  0x5c   : > { %p55_p1 = por %p54_p2, %p53_p12  ;;  %p2181_p6 = por %p2754_p4, %p53_p12 }
  0x5d   : > { %2753 = sst [smem:[#allocation34_spill]] %s2177_s24  ;;  %p1529_p8 = scmp.lt.s32.totalorder %s1981_s20, 2 }
  0x5e   : > { %s2755_s16 = scalar_select %p2181_p6, 1, 0 }
  0x5f   : > { %s393_s14 = sand.u32 1, %s1981_s20   ;;  %s395_s22 = sand.u32 1, %s1977_s19  }
  0x60   : > { %2756 = sst [smem:[#allocation35_spill]] %s2755_s16  ;;  %s2188_s27 = sshll.u32 %s395_s22, 6 }
  0x61   : > { %s2717_s29 = sshll.u32 %s1981_s20, 10  ;;  %s2757_s0 = sld [smem:[#allocation36_spill]] }
  0x62   : > { %s397_s26 = scalar_lea.vmem [#allocation2], %s2188_s27  ;;  %p2199_p0 = pnand %p1529_p8, %p55_p1 }
  0x63   : > { %s404_s17 = sshll.u32 %s397_s26, 4  ;;  %s2205_s22 = scalar_lea.sflag [#allocation3], %s393_s14  ;;  %s2203_s17 = int_to_ptr.vmem [resolvable:$true] %s404_s17 }
  0x64   : > { %s2758_s1 = scalar_select %p2199_p0, 1, 0 }
  0x65   : > { %p2730_p5 = pneg %p2199_p0 }
  0x67   : > { %s2196_s15 = scalar_lea.hbm %s2757_s0, %s2717_s29  ;;  %s1636_s26 = scalar_lea.hbm %s2757_s0, 2048 }
  0x68   : > { %s1631_s2 = scalar_lea.hbm %s2196_s15, 1024  ;;  %p1637_p9 = scmp.lt.u32.totalorder %s2196_s15, %s2757_s0 }
  0x69   : > { %p1632_p3 = scmp.ne.s32.totalorder %s2196_s15, %s1631_s2  ;;  %p1638_p12 = scmp.lt.u32.totalorder %s1636_s26, %s1631_s2 }
  0x6a   : > { %p1640_p1 = scmp.lt.u32.totalorder %s1631_s2, %s2196_s15 }
  0x6b   : > { %p1634_p7 = pnand %p2730_p5, %p1632_p3  ;;  %p1639_p2 = por %p1638_p12, %p1637_p9 }
  0x6d   : > { %p1635_p10 = pneg %p1634_p7  ;;  %p1641_p4 = por %p1640_p1, %p1639_p2 }
  0x6f   : > { %p1642_p8 = pnand %p1641_p4, %p1635_p10 }
  0x71   : > { %1645 = shalt.err (!%p1642_p8)
}
  0x72   : > { %s1646_s14 = scalar_lea.vmem %s2203_s17, 1024  ;;  %s1985_s10 = smov [#allocation2]  }
  0x73   : > { %p1647_p3 = scmp.ne.s32.totalorder %s2203_s17, %s1646_s14  ;;  %s1651_s13 = sshll.u32 %s1985_s10, 4  ;;  %s1652_s13 = int_to_ptr.vmem [resolvable:$false] %s1651_s13 }
  0x74   : > { %s1653_s24 = scalar_lea.vmem %s1652_s13, 2048  ;;  %p1654_p11 = scmp.lt.s32.totalorder %s2203_s17, %s1652_s13 }
  0x75   : > { %p1649_p7 = pnand %p1647_p3, %p2730_p5  ;;  %p1655_p9 = scmp.lt.s32.totalorder %s1653_s24, %s1646_s14 }
  0x77   : > { %p1650_p6 = pneg %p1649_p7  ;;  %p1656_p12 = por %p1655_p9, %p1654_p11 }
  0x79   : > { %p1657_p2 = pnand %p1656_p12, %p1650_p6 }
  0x7b   : > { %1660 = shalt.err (!%p1657_p2)
}
  0x7c   : > { %s1986_s2 = smov 128   ;;  %s1987_s29 = smov 8  }
  0x7d   : > { %1502 = dma.hbm_to_vmem [thread:$0]  (!%p2199_p0), %s2196_s15, 1024, %s2203_s17, %s2205_s22, %s1986_s2, %s1986_s2, %s1987_s29  }
  0x7e   : > { %s2759_s26 = sshll.u32 %s1981_s20, 10  ;;  %s418_s24 = scalar_lea.vmem [#allocation10], %s2188_s27 }
  0x7f   : > { %s2241_s13 = scalar_lea.hbm %s2702_s4, %s2759_s26  ;;  %s425_s0 = sshll.u32 %s418_s24, 4  ;;  %s2262_s0 = int_to_ptr.vmem [resolvable:$true] %s425_s0 }
  0x80   : > { %s1988_s19 = smov [#allocation8]   ;;  %s1661_s11 = scalar_lea.hbm %s2701_s3, 128 }
  0x81   : > { %s371_s12 = sshll.u32 %s1988_s19, 4  ;;  %p1662_p11 = scmp.ne.s32.totalorder %s2701_s3, %s1661_s11  ;;  %s372_s12 = int_to_ptr.vmem [resolvable:$true] %s371_s12 }
  0x82   : > { %p1668_p1 = scmp.lt.u32.totalorder %s1661_s11, %s2701_s3 }
  0x83   : > { %p1664_p6 = pnand %p1662_p11, %p2129_p13 }
  0x85   : > { %p1665_p10 = pneg %p1664_p6 }
  0x87   : > { %p1670_p4 = pnand %p1668_p1, %p1665_p10 }
  0x89   : > { %1673 = shalt.err (!%p1670_p4)
}
  0x8a   : > { %s1674_s27 = scalar_lea.vmem %s372_s12, 128  ;;  %p1682_p9 = scmp.lt.s32.totalorder %s372_s12, %s372_s12 }
  0x8b   : > { %p1675_p8 = scmp.ne.s32.totalorder %s372_s12, %s1674_s27  ;;  %p1683_p12 = scmp.lt.s32.totalorder %s1674_s27, %s1674_s27 }
  0x8d   : > { %p1677_p3 = pnand %p1675_p8, %p2129_p13  ;;  %p1684_p2 = por %p1683_p12, %p1682_p9 }
  0x8f   : > { %p1678_p7 = pneg %p1677_p3 }
  0x91   : > { %p1685_p5 = pnand %p1684_p2, %p1678_p7 }
  0x93   : > { %1688 = shalt.err (!%p1685_p5)
}
  0x94   : > { %p2760_p11 = scmp.ne.s32.totalorder %s2747_s30, 0  ;;  %s1989_s9 = smov [#allocation11]  }
  0x95   : > { %s382_s11 = sshll.u32 %s1989_s9, 4  ;;  %s1689_s26 = scalar_lea.hbm %s2703_s5, 64  ;;  %s383_s11 = int_to_ptr.vmem [resolvable:$true] %s382_s11 }
  0x96   : > { %1495 = dma.hbm_to_vmem [thread:$0]  (!%p2760_p11), %s2701_s3, 128, %s372_s12, [#allocation9]  }
  0x97   : > { %p1690_p5 = scmp.ne.s32.totalorder %s2703_s5, %s1689_s26  ;;  %p1696_p1 = scmp.lt.u32.totalorder %s1689_s26, %s2703_s5 }
  0x99   : > { %p1692_p6 = pnand %p1690_p5, %p2129_p13 }
  0x9b   : > { %p1693_p10 = pneg %p1692_p6 }
  0x9d   : > { %p1698_p4 = pnand %p1696_p1, %p1693_p10 }
  0x9f   : > { %1701 = shalt.err (!%p1698_p4)
}
  0xa0   : > { %s1702_s12 = scalar_lea.vmem %s383_s11, 64  ;;  %p1710_p9 = scmp.lt.s32.totalorder %s383_s11, %s383_s11 }
  0xa1   : > { %p1703_p8 = scmp.ne.s32.totalorder %s383_s11, %s1702_s12  ;;  %p1711_p12 = scmp.lt.s32.totalorder %s1702_s12, %s1702_s12 }
  0xa3   : > { %p1705_p3 = pnand %p1703_p8, %p2129_p13  ;;  %p1712_p2 = por %p1711_p12, %p1710_p9 }
  0xa5   : > { %p1706_p7 = pneg %p1705_p3 }
  0xa7   : > { %p1713_p0 = pnand %p1712_p2, %p1706_p7 }
  0xa9   : > { %1716 = shalt.err (!%p1713_p0)
}
  0xaa   : > { %1498 = dma.hbm_to_vmem [thread:$0]  (!%p2760_p11), %s2703_s5, 64, %s383_s11, [#allocation6]  }
  0xab   : > { %s1717_s6 = scalar_lea.hbm %s2241_s13, 1024  ;;  %p2761_p13 = scmp.ne.s32.totalorder %s2758_s1, 0 }
  0xac   : > { %p1718_p5 = scmp.ne.s32.totalorder %s2241_s13, %s1717_s6  ;;  %s1722_s9 = scalar_lea.hbm %s2702_s4, 2048 }
  0xad   : > { %p2762_p6 = pneg %p2761_p13  ;;  %p1723_p0 = scmp.lt.u32.totalorder %s2241_s13, %s2702_s4 }
  0xae   : > { %p1724_p4 = scmp.lt.u32.totalorder %s1722_s9, %s1717_s6  ;;  %p1726_p3 = scmp.lt.u32.totalorder %s1717_s6, %s2241_s13 }
  0xaf   : > { %p1720_p10 = pnand %p1718_p5, %p2762_p6 }
  0xb0   : > { %p1725_p8 = por %p1724_p4, %p1723_p0 }
  0xb1   : > { %p1721_p1 = pneg %p1720_p10 }
  0xb2   : > { %p1727_p7 = por %p1726_p3, %p1725_p8 }
  0xb4   : > { %p1728_p9 = pnand %p1727_p7, %p1721_p1 }
  0xb6   : > { %1731 = shalt.err (!%p1728_p9)
}
  0xb7   : > { %s1732_s11 = scalar_lea.vmem %s2262_s0, 1024  ;;  %p2763_p12 = pmov %p2762_p6 }
  0xb8   : > { %p1733_p11 = scmp.ne.s32.totalorder %s2262_s0, %s1732_s11  ;;  %s1990_s16 = smov [#allocation10]  }
  0xb9   : > { %s1737_s26 = sshll.u32 %s1990_s16, 4  ;;  %s1738_s26 = int_to_ptr.vmem [resolvable:$false] %s1737_s26 }
  0xba   : > { %p1735_p2 = pnand %p1733_p11, %p2763_p12  ;;  %s1739_s10 = scalar_lea.vmem %s1738_s26, 2048 }
  0xbb   : > { %p1740_p6 = scmp.lt.s32.totalorder %s2262_s0, %s1738_s26  ;;  %p1741_p10 = scmp.lt.s32.totalorder %s1739_s10, %s1732_s11 }
  0xbc   : > { %p1736_p5 = pneg %p1735_p2 }
  0xbd   : > { %p1742_p0 = por %p1741_p10, %p1740_p6 }
  0xbf   : > { %p1743_p4 = pnand %p1742_p0, %p1736_p5 }
  0xc1   : > { %1746 = shalt.err (!%p1743_p4)
}
  0xc2   : > { %1505 = dma.hbm_to_vmem [thread:$0]  (!%p2761_p13), %s2241_s13, 1024, %s2262_s0, %s2205_s22, %s1986_s2, %s1986_s2, %s1987_s29  }
  0xc3   : > { %p2764_p1 = scmp.ne.s32.totalorder %s2746_s25, 0 }
  0xc4   : > { %s2312_s14 = sand.u32 (!%p2764_p1), 1, %s2080_s21   ;;  %s2315_s24 = sand.u32 (!%p2764_p1), 1, %s1973_s18  }
  0xc5   : > { %437 = sbr.rel (%p2764_p1) target bundleno = 586 (0x24a), region = 44  ;;  %s2318_s1 = sshll.u32 (!%p2764_p1), %s2315_s24, 6 }
  0xc6   : > { %s440_s15 = scalar_lea.sflag (!%p2764_p1), [#allocation3], %s2312_s14  ;;  %s2322_s12 = scalar_lea.vmem (!%p2764_p1), [#allocation2], %s2318_s1 }
  0xc7   : > { %p2765_p8 = scmp.ne.s32.totalorder (!%p2764_p1), %s2743_s23, 0 }
  0xcc   : > { %1932 = dma.done.wait (%p2765_p8), %s440_s15, 1024  }
  0xcd   : > { %1934 = vsyncadd (%p2765_p8), %s440_s15, 4294966272  ;;  %p2766_p13 = scmp.eq.s32.totalorder %s2080_s21, 0 }
  0xcf   : > { %1936 = dma.done.wait (%p2766_p13), [#allocation6], 32   ;;  %p2767_p3 = pmov %p2766_p13 }
  0xd1   : > { %1938 = vsyncadd (%p2767_p3), [#allocation6], 4294967264  ;;  %p2768_p7 = pmov %p2767_p3 }
  0xd2   : > { %p2769_p9 = pmov %p2767_p3 }
  0xd3   : > { %1940 = dma.done.wait (%p2768_p7), [#allocation9], 128  }
  0xd4   : > { %1942 = vsyncadd (%p2769_p9), [#allocation9], 4294967168  ;;  %s2337_s0 = scalar_lea.vmem [#allocation10], %s2318_s1 }
  0xd5   : > { %1944 = dma.done.wait (%p2765_p8), %s440_s15, 1024  }
  0xd6   : > { %1946 = vsyncadd (%p2765_p8), %s440_s15, 4294966272  ;;  %p2770_p11 = pmov %p2767_p3 }
  0xd7   : > { %p2771_p12 = pmov %p2767_p3 }
  0xd8   : > { %1948 = dma.done.wait (%p2770_p11), [#allocation6], 64  }
  0xd9   : > { %1950 = vsyncadd (%p2771_p12), [#allocation6], 4294967232  ;;  %vm748_vm0 = vcmask 1043456   ;;  %vm723_vm1 = vcmask 31744   ;;  %v722_v0 = vld [vmem:[#allocation11] sm:$0xf] }
  0xda   : > { %v714_v1 = vld [vmem:[%s2337_s0] sm:$0xff]  ;;  %v715_v2 = vld [vmem:[%s2337_s0 + $0x8] sm:$0xff]  ;;  %1440 = vmatprep.subr.msk.mxu1 %vm748_vm0, %v722_v0  ;;  %v583_v3 = vld [vmem:[#allocation8] sm:$0xff]  ;;  %vm584_vm2 = vcmask 64512   ;;  %vm857_vm3 = vcmask 130048   ;;  %s2380_s23 = scalar_lea.vmem [#allocation13], %s2318_s1 }
  0xdb   : > { %1442 = vmatprep.mubr.msk.f32.mxu1 %vm723_vm1, %v714_v1  ;;  %v716_v4 = vld [vmem:[%s2337_s0 + $0x10] sm:$0xff]  ;;  %1441 = vmatpush3.msk.msra.mxu1 %vm748_vm0, %v722_v0  ;;  %v538_v9 = vld [vmem:[%s2322_s12 + $0x8] sm:$0xff]  ;;  %v539_v10 = vld [vmem:[%s2322_s12 + $0x10] sm:$0xff]  ;;  %s1030_s25 = sshll.u32 %s2380_s23, 4  ;;  %s2399_s22 = scalar_lea.vmem [#allocation12], %s2318_s1  ;;  %s2411_s25 = int_to_ptr.vmem [resolvable:$true] %s1030_s25 }
  0xdc   : > { %v537_v5 = vld [vmem:[%s2322_s12] sm:$0xff]  ;;  %1426 = vmatprep.subr.mxu0 %v583_v3  ;;  %1443 = vmatmul.mubr.msk.f32.vlgmr.msra.gmra.mrb[0].mxu1 %vm723_vm1, %v715_v2  ;;  %v540_v14 = vld [vmem:[%s2322_s12 + $0x18] sm:$0xff]  ;;  %v718_v16 = vld [vmem:[%s2337_s0 + $0x20] sm:$0xff]  ;;  %s1406_s2 = sshll.u32 %s2080_s21, 10  ;;  %s2772_s27 = sld [smem:[#allocation35_spill]] }
  0xdd   : > { %v1373_v6 = vld [vmem:[#allocation5] ss:$0 sm:$0xff]  ;;  %v1374_v7 = vld [vmem:[#allocation7] ss:$0 sm:$0xff]  ;;  %1427 = vmatpush3.msra.mxu0 %v583_v3  ;;  %1445 = vmatprep.mubr.msk.f32.mxu1 %vm723_vm1, %v716_v4  ;;  %v717_v11 = vld [vmem:[%s2337_s0 + $0x18] sm:$0xff]  ;;  %s2426_s17 = scalar_lea.hbm %s2705_s7, %s1406_s2  ;;  %s1014_s6 = sshll.u32 %s2399_s22, 4  ;;  %s2476_s6 = int_to_ptr.vmem [resolvable:$true] %s1014_s6 }
  0xde   : > { %v552_v8 = vmul.f32 %v1373_v6, %v537_v5  ;;  %v553_v12 = vmul.f32 %v1373_v6, %v538_v9  ;;  %v554_v13 = vmul.f32 %v1373_v6, %v539_v10  ;;  %v555_v17 = vmul.f32 %v1373_v6, %v540_v14  ;;  %v541_v18 = vld [vmem:[%s2322_s12 + $0x20] sm:$0xff]  ;;  %v542_v19 = vld [vmem:[%s2322_s12 + $0x28] sm:$0xff]  ;;  %v543_v24 = vld [vmem:[%s2322_s12 + $0x30] sm:$0xff]  ;;  %s985_s28 = scalar_lea.sflag [#allocation14], %s2312_s14  ;;  %s1747_s8 = scalar_lea.vmem %s2411_s25, 1024 }
  0xdf   : > { %v556_v22 = vmul.f32 %v1373_v6, %v541_v18  ;;  %v557_v23 = vmul.f32 %v1373_v6, %v542_v19  ;;  %v558_v27 = vmul.f32 %v1373_v6, %v543_v24  ;;  %v544_v28 = vld [vmem:[%s2322_s12 + $0x38] sm:$0xff]  ;;  %v721_v39 = vld [vmem:[%s2337_s0 + $0x38] sm:$0xff]  ;;  %p1748_p2 = scmp.ne.s32.totalorder %s2411_s25, %s1747_s8  ;;  %s1991_s9 = smov [#allocation13]  }
  0xe0   : > { %v567_v15 = vadd.f32 %v1374_v7, %v552_v8  ;;  %v568_v20 = vadd.f32 %v1374_v7, %v553_v12  ;;  %v569_v21 = vadd.f32 %v1374_v7, %v554_v13  ;;  %1446 = vmatmul.mubr.msk.f32.gmra.mrb[2].mxu1 %vm723_vm1, %v717_v11  ;;  %v570_v26 = vadd.f32 %v1374_v7, %v555_v17  ;;  %v719_v31 = vld [vmem:[%s2337_s0 + $0x28] sm:$0xff]  ;;  %v720_v33 = vld [vmem:[%s2337_s0 + $0x30] sm:$0xff]  ;;  %s1751_s30 = sshll.u32 %s1991_s9, 4  ;;  %s1752_s30 = int_to_ptr.vmem [resolvable:$false] %s1751_s30 }
  0xe1   : > { %1448 = vmatprep.mubr.msk.f32.mxu1 %vm723_vm1, %v718_v16  ;;  %v571_v32 = vadd.f32 %v1374_v7, %v556_v22  ;;  %v572_v35 = vadd.f32 %v1374_v7, %v557_v23  ;;  %v559_v36 = vmul.f32 %v1373_v6, %v544_v28  ;;  %v573_v38 = vadd.f32 %v1374_v7, %v558_v27  ;;  %s1753_s19 = scalar_lea.vmem %s1752_s30, 2048  ;;  %p1754_p0 = scmp.lt.s32.totalorder %s2411_s25, %s1752_s30 }
  0xe2   : > { %v575_v25 = vmax.f32 %v567_v15, 0.0  ;;  %v576_v29 = vmax.f32 %v568_v20, 0.0  ;;  %v577_v30 = vmax.f32 %v569_v21, 0.0  ;;  %v578_v34 = vmax.f32 %v570_v26, 0.0  ;;  %p2773_p5 = scmp.ne.s32.totalorder %s2772_s27, 0  ;;  %p1755_p4 = scmp.lt.s32.totalorder %s1753_s19, %s1747_s8 }
  0xe3   : > { %v579_v37 = vmax.f32 %v571_v32, 0.0  ;;  %v580_v40 = vmax.f32 %v572_v35, 0.0  ;;  %v574_v41 = vadd.f32 %v1374_v7, %v559_v36  ;;  %v581_v42 = vmax.f32 %v573_v38, 0.0 }
  0xe4   : > { %1428 = vmatprep.mubr.msk.f32.mxu0 %vm584_vm2, %v575_v25  ;;  %1449 = vmatmul.mubr.msk.f32.gmra.mrb[4].mxu1 %vm723_vm1, %v719_v31  ;;  %p1749_p6 = pnand %p1748_p2, %p2773_p5  ;;  %p1756_p1 = por %p1755_p4, %p1754_p0 }
  0xe5   : > { %1429 = vmatmul.mubr.msk.f32.vlgmr.msra.gmra.mrb[0].mxu0 %vm584_vm2, %v576_v29  ;;  %1451 = vmatprep.mubr.msk.f32.mxu1 %vm723_vm1, %v720_v33  ;;  %v582_v43 = vmax.f32 %v574_v41, 0.0 }
  0xe6   : > { %1431 = vmatprep.mubr.msk.f32.mxu0 %vm584_vm2, %v577_v30  ;;  %p1750_p10 = pneg %p1749_p6 }
  0xe8   : > { %1452 = vmatmul.mubr.msk.f32.gmra.mrb[6].mxu1 %vm723_vm1, %v721_v39  ;;  %p1757_p8 = pnand %p1756_p1, %p1750_p10 }
  0xe9   : > { %1432 = vmatmul.mubr.msk.f32.gmra.mrb[2].mxu0 %vm584_vm2, %v578_v34 }
  0xea   : > { %1434 = vmatprep.mubr.msk.f32.mxu0 %vm584_vm2, %v579_v37 }
  0xed   : > { %1435 = vmatmul.mubr.msk.f32.gmra.mrb[4].mxu0 %vm584_vm2, %v580_v40 }
  0xee   : > { %1437 = vmatprep.mubr.msk.f32.mxu0 %vm584_vm2, %v581_v42 }
  0xf1   : > { %1438 = vmatmul.mubr.msk.f32.gmra.mrb[6].mxu0 %vm584_vm2, %v582_v43 }
 0x1af   : > { %v1444_v44 = vpop.f32.mrb[0].mxu1 }
 0x1b0   : > { %867 = vst.msk [vmem:[%s2380_s23 + $0x8] sm:$0xff] %vm857_vm3, %v1444_v44  ;;  %v928_v45 = vsel %vm857_vm3, %v1444_v44, 0.0  ;;  %v950_v46 = vmul.f32 %v1444_v44, %v1444_v44  ;;  %v818_v47 = vpop.f32.mrb[1].mxu1 }
 0x1b1   : > { %866 = vst.msk [vmem:[%s2380_s23] sm:$0xff] %vm857_vm3, %v818_v47  ;;  %v927_v48 = vsel %vm857_vm3, %v818_v47, 0.0  ;;  %v949_v49 = vmul.f32 %v818_v47, %v818_v47 }
 0x1b2   : > { %v958_v50 = vsel %vm857_vm3, %v950_v46, 0.0  ;;  %v929_v51 = vadd.f32 %v928_v45, %v927_v48 }
 0x1b3   : > { %v957_v52 = vsel %vm857_vm3, %v949_v49, 0.0  ;;  %v1447_v53 = vpop.f32.mrb[2].mxu1 }
 0x1b4   : > { %v959_v54 = vadd.f32 %v958_v50, %v957_v52  ;;  %869 = vst.msk [vmem:[%s2380_s23 + $0x18] sm:$0xff] %vm857_vm3, %v1447_v53  ;;  %v952_v55 = vmul.f32 %v1447_v53, %v1447_v53  ;;  %v828_v56 = vpop.f32.mrb[3].mxu1  ;;  %v932_v59 = vsel %vm857_vm3, %v1447_v53, 0.0 }
 0x1b5   : > { %868 = vst.msk [vmem:[%s2380_s23 + $0x10] sm:$0xff] %vm857_vm3, %v828_v56  ;;  %v930_v57 = vsel %vm857_vm3, %v828_v56, 0.0  ;;  %v951_v58 = vmul.f32 %v828_v56, %v828_v56 }
 0x1b6   : > { %v931_v61 = vadd.f32 %v930_v57, %v929_v51  ;;  %v962_v62 = vsel %vm857_vm3, %v952_v55, 0.0 }
 0x1b7   : > { %v960_v1 = vsel %vm857_vm3, %v951_v58, 0.0  ;;  %v1450_v3 = vpop.f32.mrb[4].mxu1 }
 0x1b8   : > { %v1430_v60 = vpop.f32.mrb[0].mxu0  ;;  %v961_v4 = vadd.f32 %v960_v1, %v959_v54  ;;  %871 = vst.msk [vmem:[%s2380_s23 + $0x28] sm:$0xff] %vm857_vm3, %v1450_v3  ;;  %v838_v7 = vpop.f32.mrb[5].mxu1  ;;  %v954_v10 = vmul.f32 %v1450_v3, %v1450_v3  ;;  %v933_v11 = vadd.f32 %v932_v59, %v931_v61  ;;  %v936_v18 = vsel %vm857_vm3, %v1450_v3, 0.0 }
 0x1b9   : > { %859 = vst.msk [vmem:[%s2399_s22 + $0x8] sm:$0xff] %vm857_vm3, %v1430_v60  ;;  %v875_v63 = vsel %vm857_vm3, %v1430_v60, 0.0  ;;  %v898_v0 = vmul.f32 %v1430_v60, %v1430_v60  ;;  %v675_v2 = vpop.f32.mrb[1].mxu0  ;;  %870 = vst.msk [vmem:[%s2380_s23 + $0x20] sm:$0xff] %vm857_vm3, %v838_v7  ;;  %v934_v14 = vsel %vm857_vm3, %v838_v7, 0.0  ;;  %v953_v15 = vmul.f32 %v838_v7, %v838_v7 }
 0x1ba   : > { %858 = vst.msk [vmem:[%s2399_s22] sm:$0xff] %vm857_vm3, %v675_v2  ;;  %v874_v5 = vsel %vm857_vm3, %v675_v2, 0.0  ;;  %v897_v6 = vmul.f32 %v675_v2, %v675_v2  ;;  %v963_v16 = vadd.f32 %v962_v62, %v961_v4  ;;  %v935_v22 = vadd.f32 %v934_v14, %v933_v11 }
 0x1bb   : > { %v906_v8 = vsel %vm857_vm3, %v898_v0, 0.0  ;;  %v876_v9 = vadd.f32 %v875_v63, %v874_v5  ;;  %v1453_v21 = vpop.f32.mrb[6].mxu1  ;;  %v964_v23 = vsel %vm857_vm3, %v953_v15, 0.0  ;;  %v966_v27 = vsel %vm857_vm3, %v954_v10, 0.0 }
 0x1bc   : > { %v905_v12 = vsel %vm857_vm3, %v897_v6, 0.0  ;;  %v1433_v13 = vpop.f32.mrb[2].mxu0  ;;  %873 = vst.msk [vmem:[%s2380_s23 + $0x38] sm:$0xff] %vm857_vm3, %v1453_v21  ;;  %v848_v26 = vpop.f32.mrb[7].mxu1  ;;  %v965_v29 = vadd.f32 %v964_v23, %v963_v16  ;;  %v956_v32 = vmul.f32 %v1453_v21, %v1453_v21  ;;  %v937_v34 = vadd.f32 %v936_v18, %v935_v22 }
 0x1bd   : > { %v907_v17 = vadd.f32 %v906_v8, %v905_v12  ;;  %861 = vst.msk [vmem:[%s2399_s22 + $0x18] sm:$0xff] %vm857_vm3, %v1433_v13  ;;  %v900_v19 = vmul.f32 %v1433_v13, %v1433_v13  ;;  %v685_v20 = vpop.f32.mrb[3].mxu0  ;;  %v879_v28 = vsel %vm857_vm3, %v1433_v13, 0.0  ;;  %872 = vst.msk [vmem:[%s2380_s23 + $0x30] sm:$0xff] %vm857_vm3, %v848_v26  ;;  %v938_v35 = vsel %vm857_vm3, %v848_v26, 0.0 }
 0x1be   : > { %860 = vst.msk [vmem:[%s2399_s22 + $0x10] sm:$0xff] %vm857_vm3, %v685_v20  ;;  %v877_v24 = vsel %vm857_vm3, %v685_v20, 0.0  ;;  %v899_v25 = vmul.f32 %v685_v20, %v685_v20 }
 0x1bf   : > { %v878_v30 = vadd.f32 %v877_v24, %v876_v9 }
 0x1c0   : > { %v908_v31 = vsel %vm857_vm3, %v899_v25, 0.0  ;;  %v1436_v33 = vpop.f32.mrb[4].mxu0 }
 0x1c1   : > { %1760 = shalt.err (!%p1757_p8)
}
 0x1c2   : > { %s1761_s11 = scalar_lea.hbm %s2426_s17, 1024  ;;  %s1765_s10 = scalar_lea.hbm %s2705_s7, 2048 }
 0x1c3   : > { %p1762_p13 = scmp.ne.s32.totalorder %s2426_s17, %s1761_s11  ;;  %p1766_p9 = scmp.lt.u32.totalorder %s2426_s17, %s2705_s7 }
 0x1c4   : > { %p1767_p11 = scmp.lt.u32.totalorder %s1765_s10, %s1761_s11  ;;  %p1769_p2 = scmp.lt.u32.totalorder %s1761_s11, %s2426_s17 }
 0x1c5   : > { %p1763_p3 = pnand %p1762_p13, %p2773_p5 }
 0x1c6   : > { %p1768_p12 = por %p1767_p11, %p1766_p9 }
 0x1c7   : > { %p1764_p7 = pneg %p1763_p3 }
 0x1c8   : > { %p1770_p6 = por %p1769_p2, %p1768_p12 }
 0x1ca   : > { %p1771_p10 = pnand %p1770_p6, %p1764_p7 }
 0x1cc   : > { %1774 = shalt.err (!%p1771_p10)
}
 0x1cd   : > { %s1992_s12 = smov 128   ;;  %s1993_s0 = smov 8   ;;  %v910_v36 = vsel %vm857_vm3, %v900_v19, 0.0  ;;  %v909_v37 = vadd.f32 %v908_v31, %v907_v17  ;;  %v940_v38 = vsel %vm857_vm3, %v1453_v21, 0.0  ;;  %863 = vst.msk [vmem:[%s2399_s22 + $0x28] sm:$0xff] %vm857_vm3, %v1436_v33  ;;  %v955_v39 = vmul.f32 %v848_v26, %v848_v26  ;;  %v695_v40 = vpop.f32.mrb[5].mxu0 }
 0x1ce   : > { %1475 = dma.vmem_to_hbm [thread:$0]  (%p2773_p5), %s2411_s25, 1024, %s2426_s17, %s985_s28, %s1992_s12, %s1992_s12, %s1993_s0   ;;  %v902_v41 = vmul.f32 %v1436_v33, %v1436_v33  ;;  %v939_v42 = vadd.f32 %v938_v35, %v937_v34  ;;  %v967_v43 = vadd.f32 %v966_v27, %v965_v29  ;;  %v880_v44 = vadd.f32 %v879_v28, %v878_v30  ;;  %v1439_v53 = vpop.f32.mrb[6].mxu0 }
 0x1cf   : > { %862 = vst.msk [vmem:[%s2399_s22 + $0x20] sm:$0xff] %vm857_vm3, %v695_v40  ;;  %v970_v45 = vsel %vm857_vm3, %v956_v32, 0.0  ;;  %v968_v46 = vsel %vm857_vm3, %v955_v39, 0.0  ;;  %v881_v47 = vsel %vm857_vm3, %v695_v40, 0.0  ;;  %v901_v48 = vmul.f32 %v695_v40, %v695_v40  ;;  %s2774_s29 = sld [smem:[#allocation39_spill]]  ;;  %865 = vst.msk [vmem:[%s2399_s22 + $0x38] sm:$0xff] %vm857_vm3, %v1439_v53 }
 0x1d0   : > { %v941_v49 = vadd.f32 %v940_v38, %v939_v42  ;;  %v969_v50 = vadd.f32 %v968_v46, %v967_v43  ;;  %v882_v51 = vadd.f32 %v881_v47, %v880_v44  ;;  %v911_v52 = vadd.f32 %v910_v36, %v909_v37  ;;  %v705_v56 = vpop.f32.mrb[7].mxu0  ;;  %s1775_s17 = scalar_lea.vmem %s2476_s6, 1024  ;;  %s1994_s8 = smov [#allocation12]  }
 0x1d1   : > { %v883_v54 = vsel %vm857_vm3, %v1436_v33, 0.0  ;;  %v912_v55 = vsel %vm857_vm3, %v901_v48, 0.0  ;;  %864 = vst.msk [vmem:[%s2399_s22 + $0x30] sm:$0xff] %vm857_vm3, %v705_v56  ;;  %v914_v61 = vsel %vm857_vm3, %v902_v41, 0.0  ;;  %v904_v62 = vmul.f32 %v1439_v53, %v1439_v53  ;;  %p1776_p0 = scmp.ne.s32.totalorder %s2476_s6, %s1775_s17  ;;  %s1779_s9 = sshll.u32 %s1994_s8, 4  ;;  %s1780_s9 = int_to_ptr.vmem [resolvable:$false] %s1779_s9 }
 0x1d2   : > { %v942_v57 = vrot.slane %v941_v49, 4  ;;  %v971_v58 = vadd.f32 %v970_v45, %v969_v50  ;;  %v913_v59 = vadd.f32 %v912_v55, %v911_v52  ;;  %v884_v60 = vadd.f32 %v883_v54, %v882_v51  ;;  %s1781_s30 = scalar_lea.vmem %s1780_s9, 2048  ;;  %p1782_p8 = scmp.lt.s32.totalorder %s2476_s6, %s1780_s9 }
 0x1d3   : > { %v885_v63 = vsel %vm857_vm3, %v705_v56, 0.0  ;;  %v903_v0 = vmul.f32 %v705_v56, %v705_v56  ;;  %p1777_p4 = pnand %p1776_p0, %p2773_p5  ;;  %p1783_p13 = scmp.lt.s32.totalorder %s1781_s30, %s1775_s17 }
 0x1d5   : > { %s2486_s13 = scalar_lea.hbm %s2774_s29, %s1406_s2  ;;  %s980_s2 = scalar_lea.sflag [#allocation4], %s2315_s24 }
 0x1d6   : > { %p1778_p1 = pneg %p1777_p4  ;;  %p1784_p3 = por %p1783_p13, %p1782_p8 }
 0x1d8   : > { %p1785_p7 = pnand %p1784_p3, %p1778_p1 }
 0x1da   : > { %1788 = shalt.err (!%p1785_p7)
}
 0x1db   : > { %s1789_s22 = scalar_lea.hbm %s2486_s13, 1024  ;;  %s1793_s16 = scalar_lea.hbm %s2774_s29, 2048 }
 0x1dc   : > { %p1790_p9 = scmp.ne.s32.totalorder %s2486_s13, %s1789_s22  ;;  %p1794_p2 = scmp.lt.u32.totalorder %s2486_s13, %s2774_s29 }
 0x1dd   : > { %p1795_p6 = scmp.lt.u32.totalorder %s1793_s16, %s1789_s22  ;;  %p1797_p0 = scmp.lt.u32.totalorder %s1789_s22, %s2486_s13 }
 0x1de   : > { %p1791_p11 = pnand %p1790_p9, %p2773_p5 }
 0x1df   : > { %p1796_p10 = por %p1795_p6, %p1794_p2 }
 0x1e0   : > { %p1792_p12 = pneg %p1791_p11 }
 0x1e1   : > { %p1798_p4 = por %p1797_p0, %p1796_p10 }
 0x1e3   : > { %p1799_p1 = pnand %p1798_p4, %p1792_p12 }
 0x1e5   : > { %1802 = shalt.err (!%p1799_p1)
}
 0x1e6   : > { %1474 = dma.vmem_to_hbm [thread:$0]  (%p2773_p5), %s2476_s6, 1024, %s2486_s13, %s980_s2, %s1992_s12, %s1992_s12, %s1993_s0   ;;  %v943_v1 = vadd.f32 %v942_v57, %v941_v49  ;;  %v972_v2 = vrot.slane %v971_v58, 4  ;;  %v886_v3 = vadd.f32 %v885_v63, %v884_v60  ;;  %v915_v4 = vadd.f32 %v914_v61, %v913_v59 }
 0x1e7   : > { %v887_v5 = vsel %vm857_vm3, %v1439_v53, 0.0  ;;  %v916_v6 = vsel %vm857_vm3, %v903_v0, 0.0  ;;  %v918_v11 = vsel %vm857_vm3, %v904_v62, 0.0  ;;  %vm895_vm4 = vcmask 122880   ;;  %s2527_s6 = sshll.u32 %s2080_s21, 4  ;;  %s532_s1 = scalar_lea.vmem [#allocation19], %s2315_s24 }
 0x1e8   : > { %v944_v7 = vrot.slane %v943_v1, 2  ;;  %v973_v8 = vadd.f32 %v972_v2, %v971_v58  ;;  %v888_v9 = vadd.f32 %v887_v5, %v886_v3  ;;  %v917_v10 = vadd.f32 %v916_v6, %v915_v4  ;;  %s1085_s15 = sshll.u32 %s532_s1, 4  ;;  %s526_s12 = scalar_lea.vmem [#allocation18], %s2315_s24  ;;  %s2538_s15 = int_to_ptr.vmem [resolvable:$true] %s1085_s15 }
 0x1e9   : > { %s2775_s23 = sld [smem:[#allocation43_spill]]  ;;  %s514_s13 = scalar_lea.vmem [#allocation15], %s2315_s24 }
 0x1ea   : > { %v945_v12 = vadd.f32 %v944_v7, %v943_v1  ;;  %v974_v13 = vrot.slane %v973_v8, 2  ;;  %v889_v14 = vrot.slane %v888_v9, 4  ;;  %v919_v15 = vadd.f32 %v918_v11, %v917_v10  ;;  %s2543_s2 = sshll.u32 %s514_s13, 4  ;;  %s520_s17 = scalar_lea.vmem [#allocation16], %s2315_s24  ;;  %s2582_s2 = int_to_ptr.vmem [resolvable:$true] %s2543_s2 }
 0x1eb   : > { %s2548_s8 = sshll.u32 %s520_s17, 4  ;;  %s2550_s9 = sshll.u32 %s526_s12, 4  ;;  %s2591_s8 = int_to_ptr.vmem [resolvable:$true] %s2548_s8  ;;  %s2603_s9 = int_to_ptr.vmem [resolvable:$true] %s2550_s9 }
 0x1ec   : > { %v946_v16 = vrot.slane %v945_v12, 1  ;;  %v975_v17 = vadd.f32 %v974_v13, %v973_v8  ;;  %v890_v18 = vadd.f32 %v889_v14, %v888_v9  ;;  %v920_v19 = vrot.slane %v919_v15, 4  ;;  %s1002_s30 = scalar_lea.sflag [#allocation20], %s2315_s24  ;;  %s1803_s22 = scalar_lea.vmem %s2538_s15, 16 }
 0x1ed   : > { %p1804_p8 = scmp.ne.s32.totalorder %s2538_s15, %s1803_s22  ;;  %s1995_s19 = smov [#allocation19]  }
 0x1ee   : > { %v947_v20 = vadd.f32 %v946_v16, %v945_v12  ;;  %v976_v21 = vrot.slane %v975_v17, 1  ;;  %v891_v22 = vrot.slane %v890_v18, 2  ;;  %v921_v23 = vadd.f32 %v920_v19, %v919_v15  ;;  %s1807_s11 = sshll.u32 %s1995_s19, 4  ;;  %s1808_s11 = int_to_ptr.vmem [resolvable:$false] %s1807_s11 }
 0x1ef   : > { %s2536_s25 = scalar_lea.hbm %s2775_s23, %s2527_s6  ;;  %p1805_p13 = pnand %p1804_p8, %p2773_p5 }
 0x1f0   : > { %v977_v24 = vadd.f32 %v976_v21, %v975_v17  ;;  %v892_v25 = vadd.f32 %v891_v22, %v890_v18  ;;  %v922_v26 = vrot.slane %v921_v23, 2  ;;  %948 = vst.msk [vmem:[%s526_s12] sm:$0x1] %vm895_vm4, %v947_v20  ;;  %s1809_s16 = scalar_lea.vmem %s1808_s11, 32  ;;  %p1810_p7 = scmp.lt.s32.totalorder %s2538_s15, %s1808_s11 }
 0x1f1   : > { %p1806_p3 = pneg %p1805_p13  ;;  %p1811_p9 = scmp.lt.s32.totalorder %s1809_s16, %s1803_s22 }
 0x1f2   : > { %v893_v27 = vrot.slane %v892_v25, 1  ;;  %v923_v28 = vadd.f32 %v922_v26, %v921_v23  ;;  %978 = vst.msk [vmem:[%s532_s1] sm:$0x1] %vm895_vm4, %v977_v24 }
 0x1f3   : > { %p1812_p11 = por %p1811_p9, %p1810_p7 }
 0x1f5   : > { %p1813_p12 = pnand %p1812_p11, %p1806_p3 }
 0x1f7   : > { %1816 = shalt.err (!%p1813_p12)
}
 0x1f8   : > { %s1817_s26 = scalar_lea.hbm %s2536_s25, 16  ;;  %s1821_s12 = scalar_lea.hbm %s2775_s23, 32 }
 0x1f9   : > { %p1818_p2 = scmp.ne.s32.totalorder %s2536_s25, %s1817_s26  ;;  %p1822_p0 = scmp.lt.u32.totalorder %s2536_s25, %s2775_s23 }
 0x1fa   : > { %p1823_p4 = scmp.lt.u32.totalorder %s1821_s12, %s1817_s26  ;;  %p1825_p8 = scmp.lt.u32.totalorder %s1817_s26, %s2536_s25 }
 0x1fb   : > { %p1819_p6 = pnand %p1818_p2, %p2773_p5 }
 0x1fc   : > { %p1824_p1 = por %p1823_p4, %p1822_p0 }
 0x1fd   : > { %p1820_p10 = pneg %p1819_p6 }
 0x1fe   : > { %p1826_p13 = por %p1825_p8, %p1824_p1 }
 0x200   : > { %p1827_p3 = pnand %p1826_p13, %p1820_p10 }
 0x202   : > { %1830 = shalt.err (!%p1827_p3)
}
 0x203   : > { %1479 = dma.vmem_to_hbm [thread:$0]  (%p2773_p5), %s2538_s15, 16, %s2536_s25, %s1002_s30   ;;  %v894_v29 = vadd.f32 %v893_v27, %v892_v25  ;;  %v924_v30 = vrot.slane %v923_v28, 1 }
 0x204   : > { %s2776_s11 = sld [smem:[#allocation40_spill]]  ;;  %s2777_s1 = sld [smem:[#allocation41_spill]] }
 0x205   : > { %v925_v31 = vadd.f32 %v924_v30, %v923_v28  ;;  %896 = vst.msk [vmem:[%s514_s13] sm:$0x1] %vm895_vm4, %v894_v29  ;;  %s2778_s30 = sld [smem:[#allocation42_spill]]  ;;  %s1831_s21 = scalar_lea.vmem %s2582_s2, 16 }
 0x206   : > { %p1832_p7 = scmp.ne.s32.totalorder %s2582_s2, %s1831_s21  ;;  %s1996_s22 = smov [#allocation15]  }
 0x207   : > { %s1835_s19 = sshll.u32 %s1996_s22, 4  ;;  %s1836_s19 = int_to_ptr.vmem [resolvable:$false] %s1835_s19 }
 0x208   : > { %p1833_p9 = pnand %p1832_p7, %p2773_p5  ;;  %s1837_s26 = scalar_lea.vmem %s1836_s19, 32 }
 0x209   : > { %p1838_p12 = scmp.lt.s32.totalorder %s2582_s2, %s1836_s19  ;;  %p1839_p2 = scmp.lt.s32.totalorder %s1837_s26, %s1831_s21 }
 0x20a   : > { %s2579_s16 = scalar_lea.hbm %s2776_s11, %s2527_s6  ;;  %s2588_s12 = scalar_lea.hbm %s2777_s1, %s2527_s6 }
 0x20b   : > { %s2600_s0 = scalar_lea.hbm %s2778_s30, %s2527_s6  ;;  %p1834_p11 = pneg %p1833_p9 }
 0x20c   : > { %p1840_p6 = por %p1839_p2, %p1838_p12 }
 0x20e   : > { %p1841_p10 = pnand %p1840_p6, %p1834_p11 }
 0x210   : > { %1844 = shalt.err (!%p1841_p10)
}
 0x211   : > { %s1845_s6 = scalar_lea.hbm %s2579_s16, 16  ;;  %s1849_s15 = scalar_lea.hbm %s2776_s11, 32 }
 0x212   : > { %p1846_p0 = scmp.ne.s32.totalorder %s2579_s16, %s1845_s6  ;;  %p1850_p8 = scmp.lt.u32.totalorder %s2579_s16, %s2776_s11 }
 0x213   : > { %p1851_p13 = scmp.lt.u32.totalorder %s1849_s15, %s1845_s6  ;;  %p1853_p7 = scmp.lt.u32.totalorder %s1845_s6, %s2579_s16 }
 0x214   : > { %p1847_p4 = pnand %p1846_p0, %p2773_p5 }
 0x215   : > { %p1852_p3 = por %p1851_p13, %p1850_p8 }
 0x216   : > { %p1848_p1 = pneg %p1847_p4 }
 0x217   : > { %p1854_p9 = por %p1853_p7, %p1852_p3 }
 0x219   : > { %p1855_p11 = pnand %p1854_p9, %p1848_p1 }
 0x21b   : > { %1858 = shalt.err (!%p1855_p11)
}
 0x21c   : > { %1476 = dma.vmem_to_hbm [thread:$0]  (%p2773_p5), %s2582_s2, 16, %s2579_s16, %s985_s28   ;;  %926 = vst.msk [vmem:[%s520_s17] sm:$0x1] %vm895_vm4, %v925_v31 }
 0x21d   : > { %s994_s21 = scalar_lea.sflag [#allocation17], %s2312_s14  ;;  %s1859_s19 = scalar_lea.vmem %s2591_s8, 16 }
 0x21e   : > { %p1860_p12 = scmp.ne.s32.totalorder %s2591_s8, %s1859_s19  ;;  %s1997_s26 = smov [#allocation16]  }
 0x21f   : > { %s1863_s6 = sshll.u32 %s1997_s26, 4  ;;  %s1864_s6 = int_to_ptr.vmem [resolvable:$false] %s1863_s6 }
 0x220   : > { %p1861_p2 = pnand %p1860_p12, %p2773_p5  ;;  %s1865_s13 = scalar_lea.vmem %s1864_s6, 32 }
 0x221   : > { %p1866_p10 = scmp.lt.s32.totalorder %s2591_s8, %s1864_s6  ;;  %p1867_p0 = scmp.lt.s32.totalorder %s1865_s13, %s1859_s19 }
 0x222   : > { %p1862_p6 = pneg %p1861_p2 }
 0x223   : > { %p1868_p4 = por %p1867_p0, %p1866_p10 }
 0x225   : > { %p1869_p1 = pnand %p1868_p4, %p1862_p6 }
 0x227   : > { %1872 = shalt.err (!%p1869_p1)
}
 0x228   : > { %s1873_s24 = scalar_lea.hbm %s2588_s12, 16  ;;  %s1877_s17 = scalar_lea.hbm %s2777_s1, 32 }
 0x229   : > { %p1874_p8 = scmp.ne.s32.totalorder %s2588_s12, %s1873_s24  ;;  %p1878_p7 = scmp.lt.u32.totalorder %s2588_s12, %s2777_s1 }
 0x22a   : > { %p1879_p9 = scmp.lt.u32.totalorder %s1877_s17, %s1873_s24  ;;  %p1881_p12 = scmp.lt.u32.totalorder %s1873_s24, %s2588_s12 }
 0x22b   : > { %p1875_p13 = pnand %p1874_p8, %p2773_p5 }
 0x22c   : > { %p1880_p11 = por %p1879_p9, %p1878_p7 }
 0x22d   : > { %p1876_p3 = pneg %p1875_p13 }
 0x22e   : > { %p1882_p2 = por %p1881_p12, %p1880_p11 }
 0x230   : > { %p1883_p6 = pnand %p1882_p2, %p1876_p3 }
 0x232   : > { %1886 = shalt.err (!%p1883_p6)
}
 0x233   : > { %1477 = dma.vmem_to_hbm [thread:$0]  (%p2773_p5), %s2591_s8, 16, %s2588_s12, %s994_s21  }
 0x234   : > { %s1887_s15 = scalar_lea.vmem %s2603_s9, 16  ;;  %s1998_s25 = smov [#allocation18]  }
 0x235   : > { %p1888_p10 = scmp.ne.s32.totalorder %s2603_s9, %s1887_s15  ;;  %s1891_s22 = sshll.u32 %s1998_s25, 4  ;;  %s1892_s22 = int_to_ptr.vmem [resolvable:$false] %s1891_s22 }
 0x236   : > { %s1893_s19 = scalar_lea.vmem %s1892_s22, 32  ;;  %p1894_p1 = scmp.lt.s32.totalorder %s2603_s9, %s1892_s22 }
 0x237   : > { %p1889_p0 = pnand %p1888_p10, %p2773_p5  ;;  %p1895_p8 = scmp.lt.s32.totalorder %s1893_s19, %s1887_s15 }
 0x239   : > { %p1890_p4 = pneg %p1889_p0  ;;  %p1896_p13 = por %p1895_p8, %p1894_p1 }
 0x23b   : > { %p1897_p3 = pnand %p1896_p13, %p1890_p4 }
 0x23d   : > { %1900 = shalt.err (!%p1897_p3)
}
 0x23e   : > { %s1901_s8 = scalar_lea.hbm %s2600_s0, 16  ;;  %s1905_s6 = scalar_lea.hbm %s2778_s30, 32 }
 0x23f   : > { %p1902_p7 = scmp.ne.s32.totalorder %s2600_s0, %s1901_s8  ;;  %p1906_p12 = scmp.lt.u32.totalorder %s2600_s0, %s2778_s30 }
 0x240   : > { %p1907_p2 = scmp.lt.u32.totalorder %s1905_s6, %s1901_s8  ;;  %p1909_p10 = scmp.lt.u32.totalorder %s1901_s8, %s2600_s0 }
 0x241   : > { %p1903_p9 = pnand %p1902_p7, %p2773_p5 }
 0x242   : > { %p1908_p6 = por %p1907_p2, %p1906_p12 }
 0x243   : > { %p1904_p11 = pneg %p1903_p9 }
 0x244   : > { %p1910_p0 = por %p1909_p10, %p1908_p6 }
 0x246   : > { %p1911_p4 = pnand %p1910_p0, %p1904_p11 }
 0x248   : > { %1914 = shalt.err (!%p1911_p4)
}
 0x249   : > { %1478 = dma.vmem_to_hbm [thread:$0]  (%p2773_p5), %s2603_s9, 16, %s2600_s0, %s994_s21  }
 0x24a PF: > { %s2779_s28 = sld [smem:[#allocation30_spill]]  ;;  %s2780_s2 = sld [smem:[#allocation32_spill]] }
 0x24b   : > { %p2782_p8 = scmp.ge.s32.totalorder %s1981_s20, 2 }
 0x250   : > { %s1097_s17 = sand.u32 1, %s2779_s28   ;;  %p2781_p1 = scmp.ne.s32.totalorder %s2780_s2, 0 }
 0x251   : > { %s1098_s16 = scalar_lea.sflag [#allocation4], %s1097_s17 }
 0x252   : > { %p1507_p13 = pnand %p2782_p8, %p2781_p1 }
 0x254   : > { %1952 = dma.done.wait (!%p1507_p13), %s1098_s16, 1024  }
 0x255   : > { %1954 = vsyncadd (!%p1507_p13), %s1098_s16, 4294966272  ;;  %s2783_s10 = sadd.s32 4294967294, %s1981_s20  }
 0x256   : > { %s1106_s15 = sand.u32 1, %s2783_s10  }
 0x257   : > { %s1107_s27 = scalar_lea.sflag [#allocation14], %s1106_s15 }
 0x258   : > { %1956 = dma.done.wait (!%p1507_p13), %s1107_s27, 1040  }
 0x259   : > { %1958 = vsyncadd (!%p1507_p13), %s1107_s27, 4294966256  ;;  %s1124_s14 = scalar_lea.sflag [#allocation17], %s1106_s15 }
 0x25a   : > { %1960 = dma.done.wait (!%p1507_p13), %s1124_s14, 32  }
 0x25b   : > { %1962 = vsyncadd (!%p1507_p13), %s1124_s14, 4294967264  ;;  %s1140_s9 = scalar_lea.sflag [#allocation20], %s1097_s17 }
 0x25c   : > { %1964 = dma.done.wait (!%p1507_p13), %s1140_s9, 16  }
 0x25d   : > { %1966 = vsyncadd (!%p1507_p13), %s1140_s9, 4294967280  ;;  %s2784_s20 = sld [smem:[#allocation33_spill]]  ;;  %s2785_s0 = sld [smem:[#allocation31_spill]] }
 0x25e   : > { %s2786_s19 = sld [smem:[#allocation34_spill]]  ;;  %s2787_s17 = smov %s1973_s18 }
 0x263   : > { %p36_p5 = scmp.ge.s32.totalorder %s2784_s20, 4   ;;  %s2788_s18 = smov %s2785_s0 }
 0x265   :  { %38 = sbr.rel (!%p36_p5) target bundleno = 22 (0x16), region = 197 }
 0x26c   :  { %1144 = vsyncpa [#allocation3], 1 }
 0x26d   :  { %1146 = vsyncpa [#allocation3 + $0x1], 1 }
 0x26e   :  { %1147 = vsyncpa [#allocation6], 1 }
 0x26f   :  { %1148 = vsyncpa [#allocation9], 1 }
 0x270   :  { %1149 = vsyncpa [#allocation4], 1 }
 0x271   :  { %1151 = vsyncpa [#allocation4 + $0x1], 1 }
 0x272   :  { %1152 = vsyncpa [#allocation14], 1 }
 0x273   :  { %1154 = vsyncpa [#allocation14 + $0x1], 1 }
 0x274   :  { %1155 = vsyncpa [#allocation17], 1 }
 0x275   :  { %1157 = vsyncpa [#allocation17 + $0x1], 1 }
 0x276   :  { %1158 = vsyncpa [#allocation20], 1 }
 0x277   :  { %1160 = vsyncpa [#allocation20 + $0x1], 1 }

// kernel: conv_block_forward.5
= control target key start
LH: loop header
LB: loop body
LE: loop exit
PB: predicated region body
PF: predicated region fallthrough
CT: control target
= control target key end

     0   :  { %10 = vsyncpa [#allocation3], 0  ;;  %s8258_s0 = inlined_call_operand.hbm [shape: f32[36,2,9,8], index: 0, kind: input, shape index: {}]   ;;  %s8259_s1 = inlined_call_operand.hbm [shape: f32[9,8,8], index: 1, kind: input, shape index: {}]   ;;  %s8260_s2 = inlined_call_operand.hbm [shape: f32[2,8,8,8], index: 2, kind: output, shape index: {0}]   ;;  %s8261_s3 = inlined_call_operand.hbm [shape: f32[2,1,8], index: 3, kind: output, shape index: {1}]   ;;  %s8262_s4 = inlined_call_operand.hbm [shape: f32[2,1,8], index: 4, kind: output, shape index: {2}]  }
   0x1   :  { %12 = vsyncpa [#allocation3 + $0x1], 0 }
   0x2   :  { %13 = vsyncpa [#allocation6], 0 }
   0x3   :  { %14 = vsyncpa [#allocation4], 0 }
   0x4   :  { %16 = vsyncpa [#allocation4 + $0x1], 0 }
   0x5   :  { %17 = vsyncpa [#allocation9], 0 }
   0x6   :  { %19 = vsyncpa [#allocation9 + $0x1], 0  ;;  %s7401_s15 = smov 0   ;;  %s7403_s16 = smov 0  }
   0x7   :  { %s7405_s17 = smov 0   ;;  %s7407_s18 = smov 0  }
   0x8   :  { %s7409_s19 = smov 0   ;;  %s7411_s20 = smov 0  }
   0x9 LB: > { %s7432_s21 = sadd.s32 4294967295, %s7363_s20   ;;  %s8266_s22 = sadd.s32 4294967294, %s7363_s20   ;;  %s7363_s20 = sphi %s7411_s20, %s25_s20   ;;  %s7359_s19 = sphi %s7409_s19, %s8285_s19   ;;  %s7355_s18 = sphi %s7407_s18, %s8284_s18   ;;  %s7351_s17 = sphi %s7405_s17, %s8283_s17   ;;  %s7347_s16 = sphi %s7403_s16, %s8282_s16   ;;  %s7343_s15 = sphi %s7401_s15, %s8281_s15  }
   0xa   : > { %p57_p0 = scmp.ne.s32.totalorder %s7347_s16, %s7343_s15  ;;  %p8263_p1 = scmp.eq.s32.totalorder %s7432_s21, 0 }
   0xb   : > { %p110_p3 = scmp.eq.s32.totalorder %s8266_s22, 1  ;;  %p6276_p5 = scmp.ge.s32.totalorder %s7363_s20, 1 }
   0xc   : > { %p7443_p4 = por %p8263_p1, %p57_p0  ;;  %p169_p7 = scmp.lt.s32.totalorder %s7363_s20, 3 }
   0xd   : > { %p7448_p6 = por %p110_p3, %p57_p0  ;;  %s7365_s26 = smov [#allocation5]  }
   0xe   : > { %s8267_s23 = scalar_select %p7443_p4, 1, 0 }
   0xf   : > { %s8268_s24 = scalar_select %p7448_p6, 1, 0 }
  0x10   : > { %p7453_p8 = pnand %p6276_p5, %p169_p7  ;;  %s181_s27 = sshll.u32 %s7365_s26, 4  ;;  %s182_s27 = int_to_ptr.vmem [resolvable:$true] %s181_s27 }
  0x11   : > { %s37_s29 = sadd.s32 1, %s7359_s19  ;;  %s7159_s6 = scalar_lea.hbm %s8259_s1, 1152 }
  0x12   : > { %s8269_s25 = scalar_select %p7453_p8, 1, 0 }
  0x13   : > { %p7082_p9 = pneg %p7453_p8  ;;  %p7160_p12 = scmp.ne.s32.totalorder %s8259_s1, %s7159_s6 }
  0x14   : > { %p7166_p5 = scmp.lt.u32.totalorder %s7159_s6, %s8259_s1 }
  0x15   : > { %p7462_p11 = pnand %p7082_p9, %p8263_p1 }
  0x17   : > { %p7161_p13 = pneg %p7462_p11 }
  0x19   : > { %p7162_p0 = pnand %p7161_p13, %p7160_p12 }
  0x1b   : > { %p7163_p3 = pneg %p7162_p0 }
  0x1d   : > { %p7168_p7 = pnand %p7166_p5, %p7163_p3 }
  0x1f   : > { %7171 = shalt.err (!%p7168_p7)
}
  0x20   : > { %s7172_s11 = scalar_lea.vmem %s182_s27, 1152  ;;  %p7180_p2 = scmp.lt.s32.totalorder %s182_s27, %s182_s27 }
  0x21   : > { %p7173_p9 = scmp.ne.s32.totalorder %s182_s27, %s7172_s11  ;;  %p7181_p6 = scmp.lt.s32.totalorder %s7172_s11, %s7172_s11 }
  0x23   : > { %p7175_p10 = pnand %p7173_p9, %p7161_p13  ;;  %p7182_p4 = por %p7181_p6, %p7180_p2 }
  0x25   : > { %p7176_p1 = pneg %p7175_p10 }
  0x27   : > { %p7183_p8 = pnand %p7182_p4, %p7176_p1 }
  0x29   : > { %7186 = shalt.err (!%p7183_p8)
}
  0x2a   : > { %s7366_s12 = smov 128   ;;  %s7367_s13 = smov 8  }
  0x2b   : > { %7085 = dma.hbm_to_vmem [thread:$0]  (!%p7462_p11), %s8259_s1, 1152, %s182_s27, [#allocation6], %s7366_s12, %s7366_s12, %s7367_s13  }
  0x2c   : > { %p39_p1 = scmp.ge.s32.totalorder %s37_s29, 2  ;;  %s44_s30 = sadd.s32 1, %s7351_s17 }
  0x2d   : > { %p51_p2 = scmp.ne.s32.totalorder %s7351_s17, %s7347_s16  ;;  %p52_p4 = scmp.eq.s32.totalorder %s7363_s20, 0 }
  0x2e   : > { %s8287_s29 = smov (%p39_p1, %s37_s29), 0  ;;  %p8271_p8 = scmp.eq.s32.totalorder %s7432_s21, 1 }
  0x2f   : > { %p53_p6 = por %p52_p4, %p51_p2  ;;  %s41_s28 = ssub.s32 %s7359_s19, %s8287_s29 }
  0x30   : > { %p7494_p10 = por %p8271_p8, %p51_p2  ;;  %p7101_p12 = scmp.lt.s32.totalorder %s7363_s20, 2 }
  0x31   : > { %p42_p13 = scmp.eq.s32.totalorder %s41_s28, 0  ;;  %s195_s6 = sand.u32 1, %s7351_s17  }
  0x32   : > { %s7068_s7 = smul.u32 576, %s195_s6  ;;  %p7506_p11 = pnand %p7101_p12, %p53_p6 }
  0x33   : > { %s7503_s8 = scalar_select %p42_p13, %s7351_s17, %s44_s30  }
  0x34   : > { %s6435_s27 = smul.u32 9216, %s7359_s19  ;;  %s199_s9 = scalar_lea.vmem [#allocation2], %s7068_s7 }
  0x35   : > { %s207_s10 = sshll.u32 %s199_s9, 4  ;;  %s7517_s30 = scalar_lea.sflag [#allocation3], %s195_s6  ;;  %s7515_s10 = int_to_ptr.vmem [resolvable:$true] %s207_s10 }
  0x36   : > { %s7513_s22 = scalar_lea.hbm %s8258_s0, %s6435_s27  ;;  %p7189_p3 = pneg %p7506_p11 }
  0x37   : > { %s7187_s28 = scalar_lea.hbm %s7513_s22, 9216  ;;  %s7192_s27 = scalar_lea.hbm %s8258_s0, 18432 }
  0x38   : > { %p7188_p0 = scmp.ne.s32.totalorder %s7513_s22, %s7187_s28  ;;  %p7193_p9 = scmp.lt.u32.totalorder %s7513_s22, %s8258_s0 }
  0x39   : > { %p7194_p1 = scmp.lt.u32.totalorder %s7192_s27, %s7187_s28  ;;  %p7196_p4 = scmp.lt.u32.totalorder %s7187_s28, %s7513_s22 }
  0x3a   : > { %p7190_p5 = pnand %p7189_p3, %p7188_p0 }
  0x3b   : > { %p7195_p2 = por %p7194_p1, %p7193_p9 }
  0x3c   : > { %p7191_p7 = pneg %p7190_p5 }
  0x3d   : > { %p7197_p6 = por %p7196_p4, %p7195_p2 }
  0x3f   : > { %p7198_p8 = pnand %p7197_p6, %p7191_p7 }
  0x41   : > { %7201 = shalt.err (!%p7198_p8)
}
  0x42   : > { %s7202_s6 = scalar_lea.vmem %s7515_s10, 9216  ;;  %s7368_s7 = smov [#allocation2]  }
  0x43   : > { %p7203_p12 = scmp.ne.s32.totalorder %s7515_s10, %s7202_s6  ;;  %s7207_s9 = sshll.u32 %s7368_s7, 4  ;;  %s7208_s9 = int_to_ptr.vmem [resolvable:$false] %s7207_s9 }
  0x44   : > { %s7209_s14 = scalar_lea.vmem %s7208_s9, 18432  ;;  %p7210_p5 = scmp.lt.s32.totalorder %s7515_s10, %s7208_s9 }
  0x45   : > { %p7205_p13 = pnand %p7203_p12, %p7189_p3  ;;  %p7211_p9 = scmp.lt.s32.totalorder %s7209_s14, %s7202_s6 }
  0x47   : > { %p7206_p0 = pneg %p7205_p13  ;;  %p7212_p1 = por %p7211_p9, %p7210_p5 }
  0x49   : > { %p7213_p2 = pnand %p7212_p1, %p7206_p0 }
  0x4b   : > { %7216 = shalt.err (!%p7213_p2)
}
  0x4c   : > { %7089 = dma.hbm_to_vmem [thread:$0]  (!%p7506_p11), %s7513_s22, 9216, %s7515_s10, %s7517_s30, %s7366_s12, %s7366_s12, %s7367_s13  }
  0x4d   : > { %p8274_p3 = scmp.ne.s32.totalorder %s8269_s25, 0 }
  0x4e   : > { %s7551_s28 = sand.u32 (!%p8274_p3), 1, %s7347_s16   ;;  %p8275_p7 = scmp.ne.s32.totalorder (!%p8274_p3), %s8267_s23, 0 }
  0x4f   : > { %219 = sbr.rel (%p8274_p3) target bundleno = 641 (0x281), region = 28  ;;  %s222_s26 = scalar_lea.sflag (!%p8274_p3), [#allocation3], %s7551_s28 }
  0x50   : > { %s7069_s27 = smul.u32 (!%p8274_p3), 576, %s7551_s28 }
  0x52   : > { %s7555_s6 = scalar_lea.vmem (!%p8274_p3), [#allocation2], %s7069_s27 }
  0x56   : > { %7326 = dma.done.wait (%p8275_p7), %s222_s26, 9216  }
  0x57   : > { %7328 = vsyncadd (%p8275_p7), %s222_s26, 4294958080  ;;  %p8276_p11 = scmp.eq.s32.totalorder %s7432_s21, 0 }
  0x59   : > { %7330 = dma.done.wait (%p8276_p11), [#allocation6], 1152   ;;  %p8277_p4 = pmov %p8276_p11 }
  0x5a   : > { %v7369_v0 = vmov 0.0   ;;  %vm7370_vm0 = vmmov 0   ;;  %vm286_vm1 = vcmask 64512   ;;  %v7571_v1 = vld [vmem:[#allocation5 + $0x8] sm:$0xff]  ;;  %v285_v2 = vld [vmem:[%s7555_s6 + $0x10] sm:$0xff]  ;;  %v7579_v4 = vld [vmem:[#allocation5] sm:$0xff] }
  0x5b   : > { %7332 = vsyncadd (%p8277_p4), [#allocation6], 4294966144  ;;  %6580 = vmatprep.subr.mxu0 %v7369_v0  ;;  %6625 = vmatprep.subr.mxu1 %v7369_v0  ;;  %v7575_v3 = vld [vmem:[%s7555_s6 + $0x50] sm:$0xff]  ;;  %v283_v5 = vld [vmem:[%s7555_s6] sm:$0xff]  ;;  %vm434_vm2 = vcmask 1046528   ;;  %s6283_s22 = sshll.u32 %s7551_s28, 6 }
  0x5c   : > { %6582 = vmatprep.mubr.msk.f32.mxu0 %vm7370_vm0, %v7369_v0  ;;  %6627 = vmatprep.mubr.msk.f32.mxu1 %vm7370_vm0, %v7369_v0  ;;  %v7596_v6 = vld [vmem:[%s7555_s6 + $0x40] sm:$0xff]  ;;  %v7598_v7 = vld [vmem:[#allocation5 + $0x10] sm:$0xff]  ;;  %v284_v8 = vld [vmem:[%s7555_s6 + $0x8] sm:$0x1]  ;;  %v435_v10 = vrot.slane %v283_v5, 1  ;;  %s8079_s23 = scalar_lea.vmem [#allocation7], %s6283_s22 }
  0x5d   : > { %6581 = vmatpush3.msra.mxu0 %v7571_v1  ;;  %6626 = vmatpush3.msra.mxu1 %v7571_v1  ;;  %v6300_v9 = vld [vmem:[%s7555_s6 + $0x48] sm:$0x1]  ;;  %v436_v11 = vrot.slane %v284_v8, 1  ;;  %v1145_v12 = vrot.slane %v7596_v6, 1  ;;  %v7618_v16 = vld [vmem:[#allocation5 + $0x18] sm:$0xff]  ;;  %v6287_v17 = vld [vmem:[%s7555_s6 + $0x20] sm:$0xff] }
  0x5e   : > { %6583 = vmatmul.mubr.msk.f32.vlgmr.msra.gmra.mrb[0].mxu0 %vm286_vm1, %v285_v2  ;;  %6585 = vmatprep.subr.mxu0 %v7369_v0  ;;  %v1146_v13 = vrot.slane %v6300_v9, 1  ;;  %v6305_v18 = vld [vmem:[%s7555_s6 + $0x60] sm:$0xff]  ;;  %v6289_v20 = vld [vmem:[%s7555_s6 + $0x30] sm:$0xff]  ;;  %v7646_v22 = vld [vmem:[#allocation5 + $0x28] sm:$0xff]  ;;  %v666_v25 = vrot.slane %v6287_v17, 1  ;;  %vm268_vm3 = vcmask 57344  }
  0x5f   : > { %6628 = vmatmul.mubr.msk.f32.vlgmr.msra.gmra.mrb[0].mxu1 %vm286_vm1, %v7575_v3  ;;  %6586 = vmatpush3.msra.mxu0 %v7579_v4  ;;  %v437_v14 = vsel %vm434_vm2, %v435_v10, %v436_v11  ;;  %v7632_v19 = vld [vmem:[#allocation5 + $0x20] sm:$0xff]  ;;  %v6307_v21 = vld [vmem:[%s7555_s6 + $0x70] sm:$0xff]  ;;  %v6288_v23 = vld [vmem:[%s7555_s6 + $0x28] sm:$0x1]  ;;  %v1376_v27 = vrot.slane %v6305_v18, 1  ;;  %s8097_s25 = scalar_lea.vmem [#allocation8], %s7551_s28 }
  0x60   : > { %6630 = vmatprep.subr.mxu1 %v7369_v0  ;;  %6587 = vmatprep.mubr.msk.f32.mxu0 %vm7370_vm0, %v7369_v0  ;;  %v1147_v15 = vsel %vm434_vm2, %v1145_v12, %v1146_v13  ;;  %v6306_v24 = vld [vmem:[%s7555_s6 + $0x68] sm:$0x1]  ;;  %v667_v26 = vrot.slane %v6288_v23, 1  ;;  %v7662_v31 = vld [vmem:[#allocation5 + $0x30] sm:$0xff]  ;;  %v6311_v32 = vld [vmem:[%s7555_s6 + $0x80] sm:$0xff]  ;;  %s8103_s12 = scalar_lea.vmem [#allocation10], %s7551_s28 }
  0x61   : > { %6631 = vmatpush3.msra.mxu1 %v7579_v4  ;;  %6632 = vmatprep.mubr.msk.f32.mxu1 %vm7370_vm0, %v7369_v0  ;;  %v1377_v28 = vrot.slane %v6306_v24, 1  ;;  %v7675_v33 = vld [vmem:[#allocation5 + $0x38] sm:$0xff]  ;;  %v6313_v34 = vld [vmem:[%s7555_s6 + $0x90] sm:$0xff]  ;;  %v7689_v35 = vld [vmem:[#allocation5 + $0x40] sm:$0xff]  ;;  %v1607_v39 = vrot.slane %v6311_v32, 1  ;;  %s5993_s13 = sshll.u32 %s8079_s23, 4  ;;  %s8122_s13 = int_to_ptr.vmem [resolvable:$true] %s5993_s13 }
  0x62   : > { %6590 = vmatprep.subr.mxu0 %v7369_v0  ;;  %6635 = vmatprep.subr.mxu1 %v7369_v0  ;;  %v668_v29 = vsel %vm434_vm2, %v666_v25, %v667_v26  ;;  %v6294_v36 = vld [vmem:[%s7555_s6 + $0x48] sm:$0x1]  ;;  %v7715_v43 = vld [vmem:[%s7555_s6 + $0xd0] sm:$0xff]  ;;  %v7733_v44 = vld [vmem:[%s7555_s6 + $0xc0] sm:$0xff]  ;;  %269 = vst.msk [vmem:[%s8097_s25] sm:$0x1] %vm268_vm3, %v7369_v0 }
  0x63   : > { %v1378_v30 = vsel %vm434_vm2, %v1376_v27, %v1377_v28  ;;  %v6312_v37 = vld [vmem:[%s7555_s6 + $0x88] sm:$0x1]  ;;  %v898_v38 = vrot.slane %v6294_v36, 1  ;;  %v2563_v48 = vrot.slane %v7733_v44, 1  ;;  %v6323_v52 = vld [vmem:[%s7555_s6 + $0xa0] sm:$0xff]  ;;  %v6325_v54 = vld [vmem:[%s7555_s6 + $0xb0] sm:$0xff] }
  0x64   : > { %v1608_v40 = vrot.slane %v6312_v37, 1  ;;  %v6318_v45 = vld [vmem:[%s7555_s6 + $0x88] sm:$0x1]  ;;  %v6341_v53 = vld [vmem:[%s7555_s6 + $0xe0] sm:$0xff]  ;;  %v6343_v55 = vld [vmem:[%s7555_s6 + $0xf0] sm:$0xff]  ;;  %v2085_v58 = vrot.slane %v6323_v52, 1 }
  0x65   : > { %v899_v41 = vsel %vm434_vm2, %v1145_v12, %v898_v38  ;;  %v6336_v46 = vld [vmem:[%s7555_s6 + $0xc8] sm:$0x1]  ;;  %v1855_v47 = vrot.slane %v6318_v45, 1  ;;  %v2794_v60 = vrot.slane %v6341_v53, 1  ;;  %v6347_v2 = vld [vmem:[%s7555_s6 + $0x100] sm:$0xff]  ;;  %v7838_v13 = vld [vmem:[%s7555_s6 + $0x150] sm:$0xff] }
  0x66   : > { %6588 = vmatmul.mubr.msk.f32.vlgmr.msra.gmra.mrb[0].mxu0 %vm286_vm1, %v283_v5  ;;  %v1609_v42 = vsel %vm434_vm2, %v1607_v39, %v1608_v40  ;;  %v2564_v49 = vrot.slane %v6336_v46, 1  ;;  %v6324_v56 = vld [vmem:[%s7555_s6 + $0xa8] sm:$0x1]  ;;  %v3025_v9 = vrot.slane %v6347_v2, 1  ;;  %v6359_v25 = vld [vmem:[%s7555_s6 + $0x120] sm:$0xff]  ;;  %v6361_v27 = vld [vmem:[%s7555_s6 + $0x130] sm:$0xff] }
  0x67   : > { %6633 = vmatmul.mubr.msk.f32.vlgmr.msra.gmra.mrb[0].mxu1 %vm286_vm1, %v7596_v6  ;;  %6591 = vmatpush3.msra.mxu0 %v7598_v7  ;;  %v1856_v50 = vsel %vm434_vm2, %v1607_v39, %v1855_v47  ;;  %v6342_v57 = vld [vmem:[%s7555_s6 + $0xe8] sm:$0x1]  ;;  %v2086_v59 = vrot.slane %v6324_v56, 1  ;;  %v6377_v26 = vld [vmem:[%s7555_s6 + $0x160] sm:$0xff]  ;;  %v6379_v28 = vld [vmem:[%s7555_s6 + $0x170] sm:$0xff]  ;;  %s6434_s10 = sshll.u32 %s7355_s18, 10 }
  0x68   : > { %6636 = vmatpush3.msra.mxu1 %v7598_v7  ;;  %6592 = vmatprep.mubr.msk.f32.mxu0 %vm7370_vm0, %v7369_v0  ;;  %v2565_v51 = vsel %vm434_vm2, %v2563_v48, %v2564_v49  ;;  %v2795_v61 = vrot.slane %v6342_v57, 1  ;;  %v6330_v5 = vld [vmem:[%s7555_s6 + $0xc8] sm:$0x1]  ;;  %v4212_v36 = vrot.slane %v6377_v26, 1  ;;  %v6383_v40 = vld [vmem:[%s7555_s6 + $0x180] sm:$0xff]  ;;  %v7961_v49 = vld [vmem:[%s7555_s6 + $0x1d0] sm:$0xff]  ;;  %s8127_s7 = scalar_lea.hbm %s8260_s2, %s6434_s10 }
  0x69   : > { %6637 = vmatprep.mubr.msk.f32.mxu1 %vm7370_vm0, %v7369_v0  ;;  %6595 = vmatprep.subr.mxu0 %v7369_v0  ;;  %v2087_v62 = vsel %vm434_vm2, %v2085_v58, %v2086_v59  ;;  %v2317_v8 = vrot.slane %v6330_v5, 1  ;;  %v4443_v45 = vrot.slane %v6383_v40, 1  ;;  %v6413_v56 = vld [vmem:[%s7555_s6 + $0x1e0] sm:$0xff]  ;;  %v6415_v57 = vld [vmem:[%s7555_s6 + $0x1f0] sm:$0xff]  ;;  %v6396_v58 = vld [vmem:[%s7555_s6 + $0x1a8] sm:$0x1] }
  0x6a   : > { %6640 = vmatprep.subr.mxu1 %v7369_v0  ;;  %v2796_v63 = vsel %vm434_vm2, %v2794_v60, %v2795_v61  ;;  %v6414_v59 = vld [vmem:[%s7555_s6 + $0x1e8] sm:$0x1]  ;;  %v5630_v61 = vrot.slane %v6413_v56, 1  ;;  %270 = vst.msk [vmem:[%s8103_s12] sm:$0x1] %vm268_vm3, %v7369_v0  ;;  %s5970_s9 = scalar_lea.sflag [#allocation4], %s7551_s28 }
  0x6b   : > { %v2318_v11 = vsel %vm434_vm2, %v2563_v48, %v2317_v8  ;;  %v6420_v5 = vld [vmem:[%s7555_s6 + $0x208] sm:$0x1]  ;;  %s7217_s14 = scalar_lea.vmem %s8122_s13, 1024  ;;  %s7371_s27 = smov [#allocation7]  }
  0x6c   : > { %v5862_v8 = vrot.slane %v6420_v5, 1  ;;  %p7218_p6 = scmp.ne.s32.totalorder %s8122_s13, %s7217_s14  ;;  %s7221_s26 = sshll.u32 %s7371_s27, 4  ;;  %s7222_s26 = int_to_ptr.vmem [resolvable:$false] %s7221_s26 }
  0x6d   : > { %p7224_p13 = scmp.lt.s32.totalorder %s8122_s13, %s7222_s26 }
  0x6e   : > { %6593 = vmatmul.mubr.msk.f32.vlgmr.msra.gmra.mrb[0].mxu0 %vm286_vm1, %v437_v14  ;;  %v7856_v14 = vld [vmem:[%s7555_s6 + $0x140] sm:$0xff]  ;;  %p7219_p8 = pnand %p7218_p6, %p7494_p10 }
  0x6f   : > { %6638 = vmatmul.mubr.msk.f32.vlgmr.msra.gmra.mrb[0].mxu1 %vm286_vm1, %v1147_v15  ;;  %6596 = vmatpush3.msra.mxu0 %v7618_v16  ;;  %v6354_v15 = vld [vmem:[%s7555_s6 + $0x108] sm:$0x1] }
  0x70   : > { %6641 = vmatpush3.msra.mxu1 %v7618_v16  ;;  %6597 = vmatprep.mubr.msk.f32.mxu0 %vm7370_vm0, %v7369_v0  ;;  %p7220_p12 = pneg %p7219_p8 }
  0x71   : > { %6642 = vmatprep.mubr.msk.f32.mxu1 %vm7370_vm0, %v7369_v0  ;;  %6600 = vmatprep.subr.mxu0 %v7369_v0 }
  0x72   : > { %6645 = vmatprep.subr.mxu1 %v7369_v0 }
  0x76   : > { %6598 = vmatmul.mubr.msk.f32.vlgmr.msra.gmra.mrb[0].mxu0 %vm286_vm1, %v6287_v17  ;;  %v6372_v17 = vld [vmem:[%s7555_s6 + $0x148] sm:$0x1] }
  0x77   : > { %6643 = vmatmul.mubr.msk.f32.vlgmr.msra.gmra.mrb[0].mxu1 %vm286_vm1, %v6305_v18  ;;  %6601 = vmatpush3.msra.mxu0 %v7632_v19  ;;  %v3273_v18 = vrot.slane %v6354_v15, 1 }
  0x78   : > { %6646 = vmatpush3.msra.mxu1 %v7632_v19  ;;  %6602 = vmatprep.mubr.msk.f32.mxu0 %vm7370_vm0, %v7369_v0 }
  0x79   : > { %6647 = vmatprep.mubr.msk.f32.mxu1 %vm7370_vm0, %v7369_v0  ;;  %6605 = vmatprep.subr.mxu0 %v7369_v0  ;;  %v3274_v23 = vsel %vm434_vm2, %v3025_v9, %v3273_v18 }
  0x7a   : > { %6650 = vmatprep.subr.mxu1 %v7369_v0 }
  0x7e   : > { %6603 = vmatmul.mubr.msk.f32.vlgmr.msra.gmra.mrb[0].mxu0 %vm286_vm1, %v6289_v20  ;;  %v3981_v20 = vrot.slane %v7856_v14, 1 }
  0x7f   : > { %6648 = vmatmul.mubr.msk.f32.vlgmr.msra.gmra.mrb[0].mxu1 %vm286_vm1, %v6307_v21  ;;  %6606 = vmatpush3.msra.mxu0 %v7646_v22  ;;  %v3982_v21 = vrot.slane %v6372_v17, 1 }
  0x80   : > { %6651 = vmatpush3.msra.mxu1 %v7646_v22  ;;  %6607 = vmatprep.mubr.msk.f32.mxu0 %vm7370_vm0, %v7369_v0 }
  0x81   : > { %6652 = vmatprep.mubr.msk.f32.mxu1 %vm7370_vm0, %v7369_v0  ;;  %6610 = vmatprep.subr.mxu0 %v7369_v0  ;;  %v3983_v24 = vsel %vm434_vm2, %v3981_v20, %v3982_v21 }
  0x82   : > { %6655 = vmatprep.subr.mxu1 %v7369_v0 }
  0x86   : > { %6608 = vmatmul.mubr.msk.f32.vlgmr.msra.gmra.mrb[0].mxu0 %vm286_vm1, %v668_v29  ;;  %v6360_v29 = vld [vmem:[%s7555_s6 + $0x128] sm:$0x1] }
  0x87   : > { %6653 = vmatmul.mubr.msk.f32.vlgmr.msra.gmra.mrb[0].mxu1 %vm286_vm1, %v1378_v30  ;;  %6611 = vmatpush3.msra.mxu0 %v7662_v31  ;;  %v6378_v30 = vld [vmem:[%s7555_s6 + $0x168] sm:$0x1] }
  0x88   : > { %6656 = vmatpush3.msra.mxu1 %v7662_v31  ;;  %6612 = vmatprep.mubr.msk.f32.mxu0 %vm7370_vm0, %v7369_v0  ;;  %v4213_v37 = vrot.slane %v6378_v30, 1 }
  0x89   : > { %6657 = vmatprep.mubr.msk.f32.mxu1 %vm7370_vm0, %v7369_v0  ;;  %6615 = vmatprep.subr.mxu0 %v7369_v0 }
  0x8a   : > { %6660 = vmatprep.subr.mxu1 %v7369_v0  ;;  %v4214_v39 = vsel %vm434_vm2, %v4212_v36, %v4213_v37 }
  0x8e   : > { %6613 = vmatmul.mubr.msk.f32.vlgmr.msra.gmra.mrb[0].mxu0 %vm286_vm1, %v7596_v6  ;;  %v6348_v6 = vld [vmem:[%s7555_s6 + $0x108] sm:$0x1] }
  0x8f   : > { %6658 = vmatmul.mubr.msk.f32.vlgmr.msra.gmra.mrb[0].mxu1 %vm286_vm1, %v6311_v32  ;;  %6616 = vmatpush3.msra.mxu0 %v7675_v33  ;;  %v3026_v10 = vrot.slane %v6348_v6, 1 }
  0x90   : > { %6661 = vmatpush3.msra.mxu1 %v7675_v33  ;;  %6617 = vmatprep.mubr.msk.f32.mxu0 %vm7370_vm0, %v7369_v0 }
  0x91   : > { %6662 = vmatprep.mubr.msk.f32.mxu1 %vm7370_vm0, %v7369_v0  ;;  %6620 = vmatprep.subr.mxu0 %v7369_v0  ;;  %v3027_v12 = vsel %vm434_vm2, %v3025_v9, %v3026_v10 }
  0x92   : > { %6665 = vmatprep.subr.mxu1 %v7369_v0 }
  0x96   : > { %6618 = vmatmul.mubr.msk.f32.vlgmr.msra.gmra.mrb[0].mxu0 %vm286_vm1, %v7575_v3  ;;  %v6349_v3 = vld [vmem:[%s7555_s6 + $0x110] sm:$0xff] }
  0x97   : > { %6663 = vmatmul.mubr.msk.f32.vlgmr.msra.gmra.mrb[0].mxu1 %vm286_vm1, %v6313_v34  ;;  %6621 = vmatpush3.msra.mxu0 %v7689_v35 }
  0x98   : > { %6666 = vmatpush3.msra.mxu1 %v7689_v35  ;;  %6622 = vmatprep.mubr.msk.f32.mxu0 %vm7370_vm0, %v7369_v0 }
  0x99   : > { %6667 = vmatprep.mubr.msk.f32.mxu1 %vm7370_vm0, %v7369_v0  ;;  %6670 = vmatprep.subr.mxu0 %v7369_v0 }
  0x9a   : > { %6715 = vmatprep.subr.mxu1 %v7369_v0 }
  0x9e   : > { %6623 = vmatmul.mubr.msk.f32.vlgmr.msra.gmra.mrb[0].mxu0 %vm286_vm1, %v899_v41  ;;  %v6385_v41 = vld [vmem:[%s7555_s6 + $0x190] sm:$0xff] }
  0x9f   : > { %6668 = vmatmul.mubr.msk.f32.vlgmr.msra.gmra.mrb[0].mxu1 %vm286_vm1, %v1609_v42  ;;  %6671 = vmatpush3.msra.mxu0 %v7571_v1  ;;  %v6366_v42 = vld [vmem:[%s7555_s6 + $0x148] sm:$0x1] }
  0xa0   : > { %6672 = vmatprep.mubr.msk.f32.mxu0 %vm7370_vm0, %v7369_v0  ;;  %6716 = vmatpush3.msra.mxu1 %v7571_v1 }
  0xa1   : > { %6717 = vmatprep.mubr.msk.f32.mxu1 %vm7370_vm0, %v7369_v0  ;;  %6675 = vmatprep.subr.mxu0 %v7369_v0 }
  0xa2   : > { %6673 = vmatmul.mubr.msk.f32.vlgmr.msra.gmra.mrb[2].mxu0 %vm286_vm1, %v6313_v34  ;;  %6720 = vmatprep.subr.mxu1 %v7369_v0  ;;  %v3504_v34 = vrot.slane %v6360_v29, 1 }
  0xa3   : > { %6718 = vmatmul.mubr.msk.f32.vlgmr.msra.gmra.mrb[2].mxu1 %vm286_vm1, %v7715_v43  ;;  %6676 = vmatpush3.msra.mxu0 %v7579_v4 }
  0xa4   : > { %6721 = vmatpush3.msra.mxu1 %v7579_v4  ;;  %6677 = vmatprep.mubr.msk.f32.mxu0 %vm7370_vm0, %v7369_v0 }
  0xa5   : > { %6722 = vmatprep.mubr.msk.f32.mxu1 %vm7370_vm0, %v7369_v0  ;;  %6680 = vmatprep.subr.mxu0 %v7369_v0 }
  0xa6   : > { %6725 = vmatprep.subr.mxu1 %v7369_v0 }
  0xaa   : > { %6678 = vmatmul.mubr.msk.f32.vlgmr.msra.gmra.mrb[2].mxu0 %vm286_vm1, %v6311_v32  ;;  %v3503_v32 = vrot.slane %v6359_v25, 1 }
  0xab   : > { %6723 = vmatmul.mubr.msk.f32.vlgmr.msra.gmra.mrb[2].mxu1 %vm286_vm1, %v7733_v44  ;;  %6681 = vmatpush3.msra.mxu0 %v7598_v7 }
  0xac   : > { %6726 = vmatpush3.msra.mxu1 %v7598_v7  ;;  %6682 = vmatprep.mubr.msk.f32.mxu0 %vm7370_vm0, %v7369_v0  ;;  %v3505_v38 = vsel %vm434_vm2, %v3503_v32, %v3504_v34 }
  0xad   : > { %6727 = vmatprep.mubr.msk.f32.mxu1 %vm7370_vm0, %v7369_v0  ;;  %6685 = vmatprep.subr.mxu0 %v7369_v0 }
  0xae   : > { %6730 = vmatprep.subr.mxu1 %v7369_v0 }
  0xb2   : > { %6683 = vmatmul.mubr.msk.f32.vlgmr.msra.gmra.mrb[2].mxu0 %vm286_vm1, %v1856_v50  ;;  %v6390_v50 = vld [vmem:[%s7555_s6 + $0x188] sm:$0x1] }
  0xb3   : > { %6728 = vmatmul.mubr.msk.f32.vlgmr.msra.gmra.mrb[2].mxu1 %vm286_vm1, %v2565_v51  ;;  %6686 = vmatpush3.msra.mxu0 %v7618_v16  ;;  %v6408_v51 = vld [vmem:[%s7555_s6 + $0x1c8] sm:$0x1] }
  0xb4   : > { %6731 = vmatpush3.msra.mxu1 %v7618_v16  ;;  %6687 = vmatprep.mubr.msk.f32.mxu0 %vm7370_vm0, %v7369_v0 }
  0xb5   : > { %6732 = vmatprep.mubr.msk.f32.mxu1 %vm7370_vm0, %v7369_v0  ;;  %6690 = vmatprep.subr.mxu0 %v7369_v0 }
  0xb6   : > { %6735 = vmatprep.subr.mxu1 %v7369_v0 }
  0xba   : > { %6688 = vmatmul.mubr.msk.f32.vlgmr.msra.gmra.mrb[2].mxu0 %vm286_vm1, %v6323_v52 }
  0xbb   : > { %6733 = vmatmul.mubr.msk.f32.vlgmr.msra.gmra.mrb[2].mxu1 %vm286_vm1, %v6341_v53  ;;  %6691 = vmatpush3.msra.mxu0 %v7632_v19  ;;  %v5400_v53 = vrot.slane %v6408_v51, 1 }
  0xbc   : > { %6736 = vmatpush3.msra.mxu1 %v7632_v19  ;;  %6692 = vmatprep.mubr.msk.f32.mxu0 %vm7370_vm0, %v7369_v0 }
  0xbd   : > { %6737 = vmatprep.mubr.msk.f32.mxu1 %vm7370_vm0, %v7369_v0  ;;  %6695 = vmatprep.subr.mxu0 %v7369_v0 }
  0xbe   : > { %6740 = vmatprep.subr.mxu1 %v7369_v0 }
  0xc2   : > { %6693 = vmatmul.mubr.msk.f32.vlgmr.msra.gmra.mrb[2].mxu0 %vm286_vm1, %v6325_v54 }
  0xc3   : > { %6738 = vmatmul.mubr.msk.f32.vlgmr.msra.gmra.mrb[2].mxu1 %vm286_vm1, %v6343_v55  ;;  %6696 = vmatpush3.msra.mxu0 %v7646_v22 }
  0xc4   : > { %6741 = vmatpush3.msra.mxu1 %v7646_v22  ;;  %6697 = vmatprep.mubr.msk.f32.mxu0 %vm7370_vm0, %v7369_v0 }
  0xc5   : > { %6742 = vmatprep.mubr.msk.f32.mxu1 %vm7370_vm0, %v7369_v0  ;;  %6700 = vmatprep.subr.mxu0 %v7369_v0 }
  0xc6   : > { %6745 = vmatprep.subr.mxu1 %v7369_v0 }
  0xca   : > { %6698 = vmatmul.mubr.msk.f32.vlgmr.msra.gmra.mrb[2].mxu0 %vm286_vm1, %v2087_v62  ;;  %v5631_v62 = vrot.slane %v6414_v59, 1 }
  0xcb   : > { %6743 = vmatmul.mubr.msk.f32.vlgmr.msra.gmra.mrb[2].mxu1 %vm286_vm1, %v2796_v63  ;;  %6701 = vmatpush3.msra.mxu0 %v7662_v31 }
  0xcc   : > { %6746 = vmatpush3.msra.mxu1 %v7662_v31  ;;  %6702 = vmatprep.mubr.msk.f32.mxu0 %vm7370_vm0, %v7369_v0 }
  0xcd   : > { %6747 = vmatprep.mubr.msk.f32.mxu1 %vm7370_vm0, %v7369_v0  ;;  %6705 = vmatprep.subr.mxu0 %v7369_v0 }
  0xce   : > { %6750 = vmatprep.subr.mxu1 %v7369_v0 }
  0xd2   : > { %6703 = vmatmul.mubr.msk.f32.vlgmr.msra.gmra.mrb[2].mxu0 %vm286_vm1, %v7733_v44  ;;  %v3735_v44 = vrot.slane %v6366_v42, 1 }
  0xd3   : > { %6748 = vmatmul.mubr.msk.f32.vlgmr.msra.gmra.mrb[2].mxu1 %vm286_vm1, %v6347_v2  ;;  %6706 = vmatpush3.msra.mxu0 %v7675_v33 }
  0xd4   : > { %6751 = vmatpush3.msra.mxu1 %v7675_v33  ;;  %6707 = vmatprep.mubr.msk.f32.mxu0 %vm7370_vm0, %v7369_v0  ;;  %v3736_v47 = vsel %vm434_vm2, %v3981_v20, %v3735_v44 }
  0xd5   : > { %6752 = vmatprep.mubr.msk.f32.mxu1 %vm7370_vm0, %v7369_v0  ;;  %6710 = vmatprep.subr.mxu0 %v7369_v0 }
  0xd6   : > { %6755 = vmatprep.subr.mxu1 %v7369_v0 }
  0xda   : > { %6708 = vmatmul.mubr.msk.f32.vlgmr.msra.gmra.mrb[2].mxu0 %vm286_vm1, %v7715_v43  ;;  %v6384_v43 = vld [vmem:[%s7555_s6 + $0x188] sm:$0x1] }
  0xdb   : > { %6753 = vmatmul.mubr.msk.f32.vlgmr.msra.gmra.mrb[2].mxu1 %vm286_vm1, %v6349_v3  ;;  %6711 = vmatpush3.msra.mxu0 %v7689_v35  ;;  %v4444_v46 = vrot.slane %v6384_v43, 1 }
  0xdc   : > { %6756 = vmatpush3.msra.mxu1 %v7689_v35  ;;  %6712 = vmatprep.mubr.msk.f32.mxu0 %vm7370_vm0, %v7369_v0 }
  0xdd   : > { %6757 = vmatprep.mubr.msk.f32.mxu1 %vm7370_vm0, %v7369_v0  ;;  %6760 = vmatprep.subr.mxu0 %v7369_v0  ;;  %v4445_v48 = vsel %vm434_vm2, %v4443_v45, %v4444_v46 }
  0xde   : > { %6805 = vmatprep.subr.mxu1 %v7369_v0 }
  0xe2   : > { %6713 = vmatmul.mubr.msk.f32.vlgmr.msra.gmra.mrb[2].mxu0 %vm286_vm1, %v2318_v11 }
  0xe3   : > { %6758 = vmatmul.mubr.msk.f32.vlgmr.msra.gmra.mrb[2].mxu1 %vm286_vm1, %v3027_v12  ;;  %6761 = vmatpush3.msra.mxu0 %v7571_v1 }
  0xe4   : > { %6762 = vmatprep.mubr.msk.f32.mxu0 %vm7370_vm0, %v7369_v0  ;;  %6806 = vmatpush3.msra.mxu1 %v7571_v1 }
  0xe5   : > { %6807 = vmatprep.mubr.msk.f32.mxu1 %vm7370_vm0, %v7369_v0  ;;  %6765 = vmatprep.subr.mxu0 %v7369_v0 }
  0xe6   : > { %6763 = vmatmul.mubr.msk.f32.vlgmr.msra.gmra.mrb[4].mxu0 %vm286_vm1, %v6349_v3  ;;  %6810 = vmatprep.subr.mxu1 %v7369_v0  ;;  %v6402_v3 = vld [vmem:[%s7555_s6 + $0x1c8] sm:$0x1] }
  0xe7   : > { %6808 = vmatmul.mubr.msk.f32.vlgmr.msra.gmra.mrb[4].mxu1 %vm286_vm1, %v7838_v13  ;;  %6766 = vmatpush3.msra.mxu0 %v7579_v4 }
  0xe8   : > { %6811 = vmatpush3.msra.mxu1 %v7579_v4  ;;  %6767 = vmatprep.mubr.msk.f32.mxu0 %vm7370_vm0, %v7369_v0 }
  0xe9   : > { %6812 = vmatprep.mubr.msk.f32.mxu1 %vm7370_vm0, %v7369_v0  ;;  %6770 = vmatprep.subr.mxu0 %v7369_v0 }
  0xea   : > { %6815 = vmatprep.subr.mxu1 %v7369_v0 }
  0xee   : > { %6768 = vmatmul.mubr.msk.f32.vlgmr.msra.gmra.mrb[4].mxu0 %vm286_vm1, %v6347_v2  ;;  %v5632_v2 = vsel %vm434_vm2, %v5630_v61, %v5631_v62 }
  0xef   : > { %6813 = vmatmul.mubr.msk.f32.vlgmr.msra.gmra.mrb[4].mxu1 %vm286_vm1, %v7856_v14  ;;  %6771 = vmatpush3.msra.mxu0 %v7598_v7 }
  0xf0   : > { %6816 = vmatpush3.msra.mxu1 %v7598_v7  ;;  %6772 = vmatprep.mubr.msk.f32.mxu0 %vm7370_vm0, %v7369_v0 }
  0xf1   : > { %6817 = vmatprep.mubr.msk.f32.mxu1 %vm7370_vm0, %v7369_v0  ;;  %6775 = vmatprep.subr.mxu0 %v7369_v0 }
  0xf2   : > { %6820 = vmatprep.subr.mxu1 %v7369_v0 }
  0xf6   : > { %6773 = vmatmul.mubr.msk.f32.vlgmr.msra.gmra.mrb[4].mxu0 %vm286_vm1, %v3274_v23 }
  0xf7   : > { %6818 = vmatmul.mubr.msk.f32.vlgmr.msra.gmra.mrb[4].mxu1 %vm286_vm1, %v3983_v24  ;;  %6776 = vmatpush3.msra.mxu0 %v7618_v16 }
  0xf8   : > { %6821 = vmatpush3.msra.mxu1 %v7618_v16  ;;  %6777 = vmatprep.mubr.msk.f32.mxu0 %vm7370_vm0, %v7369_v0 }
  0xf9   : > { %6822 = vmatprep.mubr.msk.f32.mxu1 %vm7370_vm0, %v7369_v0  ;;  %6780 = vmatprep.subr.mxu0 %v7369_v0 }
  0xfa   : > { %6825 = vmatprep.subr.mxu1 %v7369_v0 }
  0xfe   : > { %6778 = vmatmul.mubr.msk.f32.vlgmr.msra.gmra.mrb[4].mxu0 %vm286_vm1, %v6359_v25 }
  0xff   : > { %6823 = vmatmul.mubr.msk.f32.vlgmr.msra.gmra.mrb[4].mxu1 %vm286_vm1, %v6377_v26  ;;  %6781 = vmatpush3.msra.mxu0 %v7632_v19 }
 0x100   : > { %6826 = vmatpush3.msra.mxu1 %v7632_v19  ;;  %6782 = vmatprep.mubr.msk.f32.mxu0 %vm7370_vm0, %v7369_v0 }
 0x101   : > { %6827 = vmatprep.mubr.msk.f32.mxu1 %vm7370_vm0, %v7369_v0  ;;  %6785 = vmatprep.subr.mxu0 %v7369_v0 }
 0x102   : > { %6830 = vmatprep.subr.mxu1 %v7369_v0 }
 0x106   : > { %6783 = vmatmul.mubr.msk.f32.vlgmr.msra.gmra.mrb[4].mxu0 %vm286_vm1, %v6361_v27 }
 0x107   : > { %6828 = vmatmul.mubr.msk.f32.vlgmr.msra.gmra.mrb[4].mxu1 %vm286_vm1, %v6379_v28  ;;  %6786 = vmatpush3.msra.mxu0 %v7646_v22 }
 0x108   : > { %6831 = vmatpush3.msra.mxu1 %v7646_v22  ;;  %6787 = vmatprep.mubr.msk.f32.mxu0 %vm7370_vm0, %v7369_v0 }
 0x109   : > { %6832 = vmatprep.mubr.msk.f32.mxu1 %vm7370_vm0, %v7369_v0  ;;  %6790 = vmatprep.subr.mxu0 %v7369_v0 }
 0x10a   : > { %6835 = vmatprep.subr.mxu1 %v7369_v0 }
 0x10e   : > { %6788 = vmatmul.mubr.msk.f32.vlgmr.msra.gmra.mrb[4].mxu0 %vm286_vm1, %v3505_v38 }
 0x10f   : > { %6833 = vmatmul.mubr.msk.f32.vlgmr.msra.gmra.mrb[4].mxu1 %vm286_vm1, %v4214_v39  ;;  %6791 = vmatpush3.msra.mxu0 %v7662_v31 }
 0x110   : > { %6836 = vmatpush3.msra.mxu1 %v7662_v31  ;;  %6792 = vmatprep.mubr.msk.f32.mxu0 %vm7370_vm0, %v7369_v0 }
 0x111   : > { %6837 = vmatprep.mubr.msk.f32.mxu1 %vm7370_vm0, %v7369_v0  ;;  %6795 = vmatprep.subr.mxu0 %v7369_v0 }
 0x112   : > { %6840 = vmatprep.subr.mxu1 %v7369_v0 }
 0x116   : > { %6793 = vmatmul.mubr.msk.f32.vlgmr.msra.gmra.mrb[4].mxu0 %vm286_vm1, %v7856_v14 }
 0x117   : > { %6838 = vmatmul.mubr.msk.f32.vlgmr.msra.gmra.mrb[4].mxu1 %vm286_vm1, %v6383_v40  ;;  %6796 = vmatpush3.msra.mxu0 %v7675_v33 }
 0x118   : > { %6841 = vmatpush3.msra.mxu1 %v7675_v33  ;;  %6797 = vmatprep.mubr.msk.f32.mxu0 %vm7370_vm0, %v7369_v0 }
 0x119   : > { %6842 = vmatprep.mubr.msk.f32.mxu1 %vm7370_vm0, %v7369_v0  ;;  %6800 = vmatprep.subr.mxu0 %v7369_v0 }
 0x11a   : > { %6845 = vmatprep.subr.mxu1 %v7369_v0 }
 0x11e   : > { %6798 = vmatmul.mubr.msk.f32.vlgmr.msra.gmra.mrb[4].mxu0 %vm286_vm1, %v7838_v13 }
 0x11f   : > { %6843 = vmatmul.mubr.msk.f32.vlgmr.msra.gmra.mrb[4].mxu1 %vm286_vm1, %v6385_v41  ;;  %6801 = vmatpush3.msra.mxu0 %v7689_v35 }
 0x120   : > { %6846 = vmatpush3.msra.mxu1 %v7689_v35  ;;  %6802 = vmatprep.mubr.msk.f32.mxu0 %vm7370_vm0, %v7369_v0 }
 0x121   : > { %6847 = vmatprep.mubr.msk.f32.mxu1 %vm7370_vm0, %v7369_v0  ;;  %6850 = vmatprep.subr.mxu0 %v7369_v0 }
 0x122   : > { %6895 = vmatprep.subr.mxu1 %v7369_v0 }
 0x126   : > { %6803 = vmatmul.mubr.msk.f32.vlgmr.msra.gmra.mrb[4].mxu0 %vm286_vm1, %v3736_v47 }
 0x127   : > { %6848 = vmatmul.mubr.msk.f32.vlgmr.msra.gmra.mrb[4].mxu1 %vm286_vm1, %v4445_v48  ;;  %6851 = vmatpush3.msra.mxu0 %v7571_v1 }
 0x128   : > { %6852 = vmatprep.mubr.msk.f32.mxu0 %vm7370_vm0, %v7369_v0  ;;  %6896 = vmatpush3.msra.mxu1 %v7571_v1  ;;  %v7979_v1 = vld [vmem:[%s7555_s6 + $0x1c0] sm:$0xff] }
 0x129   : > { %6897 = vmatprep.mubr.msk.f32.mxu1 %vm7370_vm0, %v7369_v0  ;;  %6855 = vmatprep.subr.mxu0 %v7369_v0  ;;  %v5399_v52 = vrot.slane %v7979_v1, 1 }
 0x12a   : > { %6853 = vmatmul.mubr.msk.f32.vlgmr.msra.gmra.mrb[6].mxu0 %vm286_vm1, %v6385_v41  ;;  %6900 = vmatprep.subr.mxu1 %v7369_v0 }
 0x12b   : > { %6898 = vmatmul.mubr.msk.f32.vlgmr.msra.gmra.mrb[6].mxu1 %vm286_vm1, %v7961_v49  ;;  %6856 = vmatpush3.msra.mxu0 %v7579_v4  ;;  %v5401_v55 = vsel %vm434_vm2, %v5399_v52, %v5400_v53 }
 0x12c   : > { %6901 = vmatpush3.msra.mxu1 %v7579_v4  ;;  %6857 = vmatprep.mubr.msk.f32.mxu0 %vm7370_vm0, %v7369_v0  ;;  %v4691_v4 = vrot.slane %v6390_v50, 1 }
 0x12d   : > { %6902 = vmatprep.mubr.msk.f32.mxu1 %vm7370_vm0, %v7369_v0  ;;  %6860 = vmatprep.subr.mxu0 %v7369_v0 }
 0x12e   : > { %6905 = vmatprep.subr.mxu1 %v7369_v0  ;;  %v4692_v54 = vsel %vm434_vm2, %v4443_v45, %v4691_v4 }
 0x132   : > { %6858 = vmatmul.mubr.msk.f32.vlgmr.msra.gmra.mrb[6].mxu0 %vm286_vm1, %v6383_v40 }
 0x133   : > { %6903 = vmatmul.mubr.msk.f32.vlgmr.msra.gmra.mrb[6].mxu1 %vm286_vm1, %v7979_v1  ;;  %6861 = vmatpush3.msra.mxu0 %v7598_v7 }
 0x134   : > { %6906 = vmatpush3.msra.mxu1 %v7598_v7  ;;  %6862 = vmatprep.mubr.msk.f32.mxu0 %vm7370_vm0, %v7369_v0  ;;  %v6395_v7 = vld [vmem:[%s7555_s6 + $0x1a0] sm:$0xff] }
 0x135   : > { %6907 = vmatprep.mubr.msk.f32.mxu1 %vm7370_vm0, %v7369_v0  ;;  %6865 = vmatprep.subr.mxu0 %v7369_v0  ;;  %v4921_v60 = vrot.slane %v6395_v7, 1 }
 0x136   : > { %6910 = vmatprep.subr.mxu1 %v7369_v0 }
 0x13a   : > { %6863 = vmatmul.mubr.msk.f32.vlgmr.msra.gmra.mrb[6].mxu0 %vm286_vm1, %v4692_v54 }
 0x13b   : > { %6908 = vmatmul.mubr.msk.f32.vlgmr.msra.gmra.mrb[6].mxu1 %vm286_vm1, %v5401_v55  ;;  %6866 = vmatpush3.msra.mxu0 %v7618_v16 }
 0x13c   : > { %6911 = vmatpush3.msra.mxu1 %v7618_v16  ;;  %6867 = vmatprep.mubr.msk.f32.mxu0 %vm7370_vm0, %v7369_v0  ;;  %v6397_v16 = vld [vmem:[%s7555_s6 + $0x1b0] sm:$0xff] }
 0x13d   : > { %6912 = vmatprep.mubr.msk.f32.mxu1 %vm7370_vm0, %v7369_v0  ;;  %6870 = vmatprep.subr.mxu0 %v7369_v0 }
 0x13e   : > { %6915 = vmatprep.subr.mxu1 %v7369_v0 }
 0x142   : > { %6868 = vmatmul.mubr.msk.f32.vlgmr.msra.gmra.mrb[6].mxu0 %vm286_vm1, %v6395_v7 }
 0x143   : > { %6913 = vmatmul.mubr.msk.f32.vlgmr.msra.gmra.mrb[6].mxu1 %vm286_vm1, %v6413_v56  ;;  %6871 = vmatpush3.msra.mxu0 %v7632_v19 }
 0x144   : > { %6916 = vmatpush3.msra.mxu1 %v7632_v19  ;;  %6872 = vmatprep.mubr.msk.f32.mxu0 %vm7370_vm0, %v7369_v0  ;;  %v4922_v19 = vrot.slane %v6396_v58, 1 }
 0x145   : > { %6917 = vmatprep.mubr.msk.f32.mxu1 %vm7370_vm0, %v7369_v0  ;;  %6875 = vmatprep.subr.mxu0 %v7369_v0 }
 0x146   : > { %6920 = vmatprep.subr.mxu1 %v7369_v0  ;;  %v4923_v63 = vsel %vm434_vm2, %v4921_v60, %v4922_v19 }
 0x14a   : > { %6873 = vmatmul.mubr.msk.f32.vlgmr.msra.gmra.mrb[6].mxu0 %vm286_vm1, %v6397_v16 }
 0x14b   : > { %6918 = vmatmul.mubr.msk.f32.vlgmr.msra.gmra.mrb[6].mxu1 %vm286_vm1, %v6415_v57  ;;  %6876 = vmatpush3.msra.mxu0 %v7646_v22 }
 0x14c   : > { %6921 = vmatpush3.msra.mxu1 %v7646_v22  ;;  %6877 = vmatprep.mubr.msk.f32.mxu0 %vm7370_vm0, %v7369_v0  ;;  %v6419_v22 = vld [vmem:[%s7555_s6 + $0x200] sm:$0xff] }
 0x14d   : > { %6922 = vmatprep.mubr.msk.f32.mxu1 %vm7370_vm0, %v7369_v0  ;;  %6880 = vmatprep.subr.mxu0 %v7369_v0  ;;  %v5861_v6 = vrot.slane %v6419_v22, 1 }
 0x14e   : > { %6925 = vmatprep.subr.mxu1 %v7369_v0 }
 0x14f   : > { %v5863_v10 = vsel %vm434_vm2, %v5861_v6, %v5862_v8 }
 0x152   : > { %6878 = vmatmul.mubr.msk.f32.vlgmr.msra.gmra.mrb[6].mxu0 %vm286_vm1, %v4923_v63 }
 0x153   : > { %6923 = vmatmul.mubr.msk.f32.vlgmr.msra.gmra.mrb[6].mxu1 %vm286_vm1, %v5632_v2  ;;  %6881 = vmatpush3.msra.mxu0 %v7662_v31 }
 0x154   : > { %6926 = vmatpush3.msra.mxu1 %v7662_v31  ;;  %6882 = vmatprep.mubr.msk.f32.mxu0 %vm7370_vm0, %v7369_v0  ;;  %v6421_v31 = vld [vmem:[%s7555_s6 + $0x210] sm:$0xff]  ;;  %s7223_s6 = scalar_lea.vmem %s7222_s26, 2048 }
 0x155   : > { %6927 = vmatprep.mubr.msk.f32.mxu1 %vm7370_vm0, %v7369_v0  ;;  %6885 = vmatprep.subr.mxu0 %v7369_v0  ;;  %p7225_p0 = scmp.lt.s32.totalorder %s7223_s6, %s7217_s14 }
 0x156   : > { %6930 = vmatprep.subr.mxu1 %v7369_v0 }
 0x157   : > { %p7226_p5 = por %p7225_p0, %p7224_p13 }
 0x159   : > { %p7227_p9 = pnand %p7226_p5, %p7220_p12 }
 0x15a   : > { %6883 = vmatmul.mubr.msk.f32.vlgmr.msra.gmra.mrb[6].mxu0 %vm286_vm1, %v7979_v1 }
 0x15b   : > { %6928 = vmatmul.mubr.msk.f32.vlgmr.msra.gmra.mrb[6].mxu1 %vm286_vm1, %v6419_v22  ;;  %6886 = vmatpush3.msra.mxu0 %v7675_v33 }
 0x15c   : > { %6931 = vmatpush3.msra.mxu1 %v7675_v33  ;;  %6887 = vmatprep.mubr.msk.f32.mxu0 %vm7370_vm0, %v7369_v0  ;;  %v5153_v33 = vrot.slane %v6402_v3, 1 }
 0x15d   : > { %6932 = vmatprep.mubr.msk.f32.mxu1 %vm7370_vm0, %v7369_v0  ;;  %6890 = vmatprep.subr.mxu0 %v7369_v0 }
 0x15e   : > { %6935 = vmatprep.subr.mxu1 %v7369_v0  ;;  %v5154_v9 = vsel %vm434_vm2, %v5399_v52, %v5153_v33 }
 0x162   : > { %6888 = vmatmul.mubr.msk.f32.vlgmr.msra.gmra.mrb[6].mxu0 %vm286_vm1, %v7961_v49 }
 0x163   : > { %6933 = vmatmul.mubr.msk.f32.vlgmr.msra.gmra.mrb[6].mxu1 %vm286_vm1, %v6421_v31  ;;  %6891 = vmatpush3.msra.mxu0 %v7689_v35 }
 0x164   : > { %6936 = vmatpush3.msra.mxu1 %v7689_v35  ;;  %6892 = vmatprep.mubr.msk.f32.mxu0 %vm7370_vm0, %v7369_v0 }
 0x165   : > { %6937 = vmatprep.mubr.msk.f32.mxu1 %vm7370_vm0, %v7369_v0 }
 0x16a   : > { %6893 = vmatmul.mubr.msk.f32.vlgmr.msra.gmra.mrb[6].mxu0 %vm286_vm1, %v5154_v9 }
 0x16b   : > { %6938 = vmatmul.mubr.msk.f32.vlgmr.msra.gmra.mrb[6].mxu1 %vm286_vm1, %v5863_v10 }
 0x171   : > { %v968_v11 = vpop.f32.mrb[0].mxu0 }
 0x172   : > { %v973_v35 = vsel %vm286_vm1, %v968_v11, 0.0  ;;  %v981_v12 = vmul.f32 %v968_v11, %v968_v11  ;;  %5954 = vst.msk [vmem:[%s8079_s23] sm:$0xff] %vm286_vm1, %v968_v11  ;;  %v1678_v13 = vpop.f32.mrb[0].mxu1  ;;  %v6624_v14 = vpop.f32.mrb[1].mxu0 }
 0x173   : > { %v974_v15 = vrot.slane %v973_v35, 4  ;;  %v1683_v17 = vsel %vm286_vm1, %v1678_v13, 0.0  ;;  %v1691_v18 = vmul.f32 %v1678_v13, %v1678_v13  ;;  %5955 = vst.msk [vmem:[%s8079_s23 + $0x8] sm:$0xff] %vm286_vm1, %v1678_v13  ;;  %v6669_v20 = vpop.f32.mrb[1].mxu1 }
 0x174   : > { %v982_v21 = vsel %vm286_vm1, %v981_v12, 0.0  ;;  %v1684_v23 = vrot.slane %v1683_v17, 4 }
 0x175   : > { %v975_v24 = vadd.f32 %v974_v15, %v973_v35  ;;  %v983_v25 = vrot.slane %v982_v21, 4  ;;  %v1692_v26 = vsel %vm286_vm1, %v1691_v18, 0.0 }
 0x176   : > { %v1685_v27 = vadd.f32 %v1684_v23, %v1683_v17  ;;  %v1693_v28 = vrot.slane %v1692_v26, 4 }
 0x177   : > { %v976_v29 = vrot.slane %v975_v24, 2  ;;  %v984_v30 = vadd.f32 %v983_v25, %v982_v21 }
 0x178   : > { %v1686_v32 = vrot.slane %v1685_v27, 2  ;;  %v1694_v34 = vadd.f32 %v1693_v28, %v1692_v26 }
 0x179   : > { %v977_v36 = vadd.f32 %v976_v29, %v975_v24  ;;  %v985_v37 = vrot.slane %v984_v30, 2 }
 0x17a   : > { %v1687_v38 = vadd.f32 %v1686_v32, %v1685_v27  ;;  %v1695_v39 = vrot.slane %v1694_v34, 2 }
 0x17b   : > { %v978_v40 = vrot.slane %v977_v36, 1  ;;  %v986_v41 = vadd.f32 %v985_v37, %v984_v30 }
 0x17c   : > { %v1688_v42 = vrot.slane %v1687_v38, 1  ;;  %v1696_v43 = vadd.f32 %v1695_v39, %v1694_v34 }
 0x17d   : > { %v979_v44 = vadd.f32 %v978_v40, %v977_v36  ;;  %v987_v45 = vrot.slane %v986_v41, 1 }
 0x17e   : > { %v1689_v46 = vadd.f32 %v1688_v42, %v1687_v38  ;;  %v1697_v47 = vrot.slane %v1696_v43, 1 }
 0x17f   : > { %v988_v48 = vadd.f32 %v987_v45, %v986_v41 }
 0x180   : > { %v1690_v49 = vadd.f32 %v1689_v46, %v979_v44  ;;  %v1698_v1 = vadd.f32 %v1697_v47, %v1696_v43 }
 0x182   : > { %v1699_v50 = vadd.f32 %v1698_v1, %v988_v48 }
 0x1b5   : > { %v2387_v51 = vpop.f32.mrb[2].mxu0 }
 0x1b6   : > { %v2392_v4 = vsel %vm286_vm1, %v2387_v51, 0.0  ;;  %v2400_v52 = vmul.f32 %v2387_v51, %v2387_v51  ;;  %5956 = vst.msk [vmem:[%s8079_s23 + $0x10] sm:$0xff] %vm286_vm1, %v2387_v51  ;;  %v3096_v53 = vpop.f32.mrb[2].mxu1  ;;  %v6714_v54 = vpop.f32.mrb[3].mxu0 }
 0x1b7   : > { %v2393_v55 = vrot.slane %v2392_v4, 4  ;;  %v3101_v7 = vsel %vm286_vm1, %v3096_v53, 0.0  ;;  %v3109_v56 = vmul.f32 %v3096_v53, %v3096_v53  ;;  %5957 = vst.msk [vmem:[%s8079_s23 + $0x18] sm:$0xff] %vm286_vm1, %v3096_v53  ;;  %v6759_v16 = vpop.f32.mrb[3].mxu1 }
 0x1b8   : > { %v2401_v57 = vsel %vm286_vm1, %v2400_v52, 0.0  ;;  %v3102_v58 = vrot.slane %v3101_v7, 4 }
 0x1b9   : > { %v2394_v59 = vadd.f32 %v2393_v55, %v2392_v4  ;;  %v2402_v60 = vrot.slane %v2401_v57, 4  ;;  %v3110_v19 = vsel %vm286_vm1, %v3109_v56, 0.0 }
 0x1ba   : > { %v3103_v61 = vadd.f32 %v3102_v58, %v3101_v7  ;;  %v3111_v62 = vrot.slane %v3110_v19, 4 }
 0x1bb   : > { %v2395_v63 = vrot.slane %v2394_v59, 2  ;;  %v2403_v2 = vadd.f32 %v2402_v60, %v2401_v57 }
 0x1bc   : > { %v3104_v22 = vrot.slane %v3103_v61, 2  ;;  %v3112_v31 = vadd.f32 %v3111_v62, %v3110_v19 }
 0x1bd   : > { %v2396_v3 = vadd.f32 %v2395_v63, %v2394_v59  ;;  %v2404_v5 = vrot.slane %v2403_v2, 2 }
 0x1be   : > { %v3105_v33 = vadd.f32 %v3104_v22, %v3103_v61  ;;  %v3113_v6 = vrot.slane %v3112_v31, 2 }
 0x1bf   : > { %v2397_v8 = vrot.slane %v2396_v3, 1  ;;  %v2405_v9 = vadd.f32 %v2404_v5, %v2403_v2 }
 0x1c0   : > { %v3106_v10 = vrot.slane %v3105_v33, 1  ;;  %v3114_v11 = vadd.f32 %v3113_v6, %v3112_v31 }
 0x1c1   : > { %v2398_v35 = vadd.f32 %v2397_v8, %v2396_v3  ;;  %v2406_v12 = vrot.slane %v2405_v9, 1 }
 0x1c2   : > { %v3115_v13 = vrot.slane %v3114_v11, 1  ;;  %v3107_v17 = vadd.f32 %v3106_v10, %v3105_v33 }
 0x1c3   : > { %v2399_v14 = vadd.f32 %v2398_v35, %v1690_v49  ;;  %v2407_v15 = vadd.f32 %v2406_v12, %v2405_v9 }
 0x1c4   : > { %v3116_v21 = vadd.f32 %v3115_v13, %v3114_v11 }
 0x1c5   : > { %v2408_v18 = vadd.f32 %v2407_v15, %v1699_v50  ;;  %v3108_v20 = vadd.f32 %v3107_v17, %v2399_v14 }
 0x1c7   : > { %v3117_v23 = vadd.f32 %v3116_v21, %v2408_v18 }
 0x1f9   : > { %v3805_v24 = vpop.f32.mrb[4].mxu0 }
 0x1fa   : > { %v3810_v25 = vsel %vm286_vm1, %v3805_v24, 0.0  ;;  %v3818_v26 = vmul.f32 %v3805_v24, %v3805_v24  ;;  %5958 = vst.msk [vmem:[%s8079_s23 + $0x20] sm:$0xff] %vm286_vm1, %v3805_v24  ;;  %v4514_v27 = vpop.f32.mrb[4].mxu1  ;;  %v6804_v28 = vpop.f32.mrb[5].mxu0 }
 0x1fb   : > { %v3811_v29 = vrot.slane %v3810_v25, 4  ;;  %v4519_v30 = vsel %vm286_vm1, %v4514_v27, 0.0  ;;  %v4527_v32 = vmul.f32 %v4514_v27, %v4514_v27  ;;  %5959 = vst.msk [vmem:[%s8079_s23 + $0x28] sm:$0xff] %vm286_vm1, %v4514_v27  ;;  %v6849_v34 = vpop.f32.mrb[5].mxu1 }
 0x1fc   : > { %v3819_v36 = vsel %vm286_vm1, %v3818_v26, 0.0  ;;  %v4520_v37 = vrot.slane %v4519_v30, 4 }
 0x1fd   : > { %v3812_v38 = vadd.f32 %v3811_v29, %v3810_v25  ;;  %v3820_v0 = vrot.slane %v3819_v36, 4  ;;  %v4528_v39 = vsel %vm286_vm1, %v4527_v32, 0.0 }
 0x1fe   : > { %v4521_v40 = vadd.f32 %v4520_v37, %v4519_v30  ;;  %v4529_v41 = vrot.slane %v4528_v39, 4 }
 0x1ff   : > { %v3813_v42 = vrot.slane %v3812_v38, 2  ;;  %v3821_v43 = vadd.f32 %v3820_v0, %v3819_v36 }
 0x200   : > { %v4522_v44 = vrot.slane %v4521_v40, 2  ;;  %v4530_v45 = vadd.f32 %v4529_v41, %v4528_v39 }
 0x201   : > { %v3814_v46 = vadd.f32 %v3813_v42, %v3812_v38  ;;  %v3822_v47 = vrot.slane %v3821_v43, 2 }
 0x202   : > { %v4523_v48 = vadd.f32 %v4522_v44, %v4521_v40  ;;  %v4531_v49 = vrot.slane %v4530_v45, 2 }
 0x203   : > { %v3815_v1 = vrot.slane %v3814_v46, 1  ;;  %v3823_v50 = vadd.f32 %v3822_v47, %v3821_v43 }
 0x204   : > { %v4524_v51 = vrot.slane %v4523_v48, 1  ;;  %v4532_v4 = vadd.f32 %v4531_v49, %v4530_v45 }
 0x205   : > { %v3816_v52 = vadd.f32 %v3815_v1, %v3814_v46  ;;  %v3824_v53 = vrot.slane %v3823_v50, 1 }
 0x206   : > { %v4533_v54 = vrot.slane %v4532_v4, 1  ;;  %v4525_v56 = vadd.f32 %v4524_v51, %v4523_v48 }
 0x207   : > { %v3817_v55 = vadd.f32 %v3816_v52, %v3108_v20  ;;  %v3825_v7 = vadd.f32 %v3824_v53, %v3823_v50 }
 0x208   : > { %v4534_v58 = vadd.f32 %v4533_v54, %v4532_v4 }
 0x209   : > { %v3826_v16 = vadd.f32 %v3825_v7, %v3117_v23  ;;  %v8116_v57 = vadd.f32 %v4525_v56, %v3817_v55 }
 0x20b   : > { %v8118_v59 = vadd.f32 %v4534_v58, %v3826_v16 }
 0x23d   : > { %v5223_v60 = vpop.f32.mrb[6].mxu0 }
 0x23e   : > { %v5228_v19 = vsel %vm286_vm1, %v5223_v60, 0.0  ;;  %v5236_v61 = vmul.f32 %v5223_v60, %v5223_v60  ;;  %5960 = vst.msk [vmem:[%s8079_s23 + $0x30] sm:$0xff] %vm286_vm1, %v5223_v60  ;;  %v5932_v62 = vpop.f32.mrb[6].mxu1  ;;  %v6894_v63 = vpop.f32.mrb[7].mxu0 }
 0x23f   : > { %v5229_v2 = vrot.slane %v5228_v19, 4  ;;  %v5937_v22 = vsel %vm286_vm1, %v5932_v62, 0.0  ;;  %v5945_v31 = vmul.f32 %v5932_v62, %v5932_v62  ;;  %5961 = vst.msk [vmem:[%s8079_s23 + $0x38] sm:$0xff] %vm286_vm1, %v5932_v62  ;;  %v6939_v3 = vpop.f32.mrb[7].mxu1 }
 0x240   : > { %v5237_v5 = vsel %vm286_vm1, %v5236_v61, 0.0  ;;  %v5938_v33 = vrot.slane %v5937_v22, 4 }
 0x241   : > { %7230 = shalt.err (!%p7227_p9)
}
 0x242   : > { %s7231_s22 = scalar_lea.hbm %s8127_s7, 1024  ;;  %s7235_s11 = scalar_lea.hbm %s8260_s2, 2048 }
 0x243   : > { %p7232_p1 = scmp.ne.s32.totalorder %s8127_s7, %s7231_s22  ;;  %p7236_p7 = scmp.lt.u32.totalorder %s8127_s7, %s8260_s2 }
 0x244   : > { %p7237_p11 = scmp.lt.u32.totalorder %s7235_s11, %s7231_s22  ;;  %p7239_p6 = scmp.lt.u32.totalorder %s7231_s22, %s8127_s7 }
 0x245   : > { %p7233_p2 = pnand %p7232_p1, %p7494_p10 }
 0x246   : > { %p7238_p4 = por %p7237_p11, %p7236_p7 }
 0x247   : > { %p7234_p3 = pneg %p7233_p2 }
 0x248   : > { %p7240_p8 = por %p7239_p6, %p7238_p4 }
 0x24a   : > { %p7241_p12 = pnand %p7240_p8, %p7234_p3 }
 0x24c   : > { %7244 = shalt.err (!%p7241_p12)
}
 0x24d   : > { %s7372_s14 = smov 128   ;;  %s7373_s26 = smov 8   ;;  %v5230_v6 = vadd.f32 %v5229_v2, %v5228_v19  ;;  %v5238_v8 = vrot.slane %v5237_v5, 4  ;;  %v5946_v9 = vsel %vm286_vm1, %v5945_v31, 0.0  ;;  %v5939_v10 = vadd.f32 %v5938_v33, %v5937_v22  ;;  %v5962_v34 = vld [vmem:[%s8097_s25] sm:$0x1] }
 0x24e   : > { %7076 = dma.vmem_to_hbm [thread:$0]  (%p7494_p10), %s8122_s13, 1024, %s8127_s7, %s5970_s9, %s7372_s14, %s7372_s14, %s7373_s26   ;;  %v5947_v11 = vrot.slane %v5946_v9, 4 }
 0x24f   : > { %v5231_v35 = vrot.slane %v5230_v6, 2  ;;  %v5239_v12 = vadd.f32 %v5238_v8, %v5237_v5  ;;  %v5940_v13 = vrot.slane %v5939_v10, 2  ;;  %s5974_s28 = sand.u32 1, %s7432_s21   ;;  %s6428_s13 = sshll.u32 %s7355_s18, 4  ;;  %v5966_v0 = vld [vmem:[%s8103_s12] sm:$0x1] }
 0x250   : > { %v5948_v14 = vadd.f32 %v5947_v11, %v5946_v9  ;;  %s6009_s7 = sshll.u32 %s8097_s25, 4  ;;  %s6022_s9 = sshll.u32 %s8103_s12, 4  ;;  %s8174_s7 = int_to_ptr.vmem [resolvable:$true] %s6009_s7  ;;  %s8183_s9 = int_to_ptr.vmem [resolvable:$true] %s6022_s9 }
 0x251   : > { %v5232_v15 = vadd.f32 %v5231_v35, %v5230_v6  ;;  %v5240_v17 = vrot.slane %v5239_v12, 2  ;;  %v5941_v18 = vadd.f32 %v5940_v13, %v5939_v10  ;;  %s8172_s23 = scalar_lea.hbm %s8261_s3, %s6428_s13  ;;  %s8181_s10 = scalar_lea.hbm %s8262_s4, %s6428_s13 }
 0x252   : > { %v5949_v20 = vrot.slane %v5948_v14, 2  ;;  %s8185_s11 = scalar_lea.sflag [#allocation9], %s5974_s28  ;;  %s7245_s30 = scalar_lea.vmem %s8174_s7, 16 }
 0x253   : > { %v5233_v21 = vrot.slane %v5232_v15, 1  ;;  %v5241_v23 = vadd.f32 %v5240_v17, %v5239_v12  ;;  %v5942_v24 = vrot.slane %v5941_v18, 1  ;;  %p7246_p13 = scmp.ne.s32.totalorder %s8174_s7, %s7245_s30  ;;  %s7374_s27 = smov [#allocation8]  }
 0x254   : > { %v5950_v25 = vadd.f32 %v5949_v20, %v5948_v14  ;;  %s7249_s14 = sshll.u32 %s7374_s27, 4  ;;  %s7250_s14 = int_to_ptr.vmem [resolvable:$false] %s7249_s14 }
 0x255   : > { %v5234_v26 = vadd.f32 %v5233_v21, %v5232_v15  ;;  %v5242_v27 = vrot.slane %v5241_v23, 1  ;;  %v5943_v32 = vadd.f32 %v5942_v24, %v5941_v18  ;;  %p7247_p0 = pnand %p7246_p13, %p7494_p10  ;;  %s7251_s26 = scalar_lea.vmem %s7250_s14, 32 }
 0x256   : > { %v5951_v28 = vrot.slane %v5950_v25, 1  ;;  %p7252_p9 = scmp.lt.s32.totalorder %s8174_s7, %s7250_s14  ;;  %p7253_p1 = scmp.lt.s32.totalorder %s7251_s26, %s7245_s30 }
 0x257   : > { %v5235_v29 = vadd.f32 %v5234_v26, %v8116_v57  ;;  %v5243_v30 = vadd.f32 %v5242_v27, %v5241_v23  ;;  %p7248_p5 = pneg %p7247_p0 }
 0x258   : > { %v5952_v38 = vadd.f32 %v5951_v28, %v5950_v25  ;;  %p7254_p2 = por %p7253_p1, %p7252_p9 }
 0x259   : > { %v5244_v36 = vadd.f32 %v5243_v30, %v8118_v59  ;;  %v5944_v37 = vadd.f32 %v5943_v32, %v5235_v29 }
 0x25a   : > { %p7255_p3 = pnand %p7254_p2, %p7248_p5 }
 0x25b   : > { %v5953_v39 = vadd.f32 %v5952_v38, %v5244_v36  ;;  %v5963_v40 = vadd.f32 %v5962_v34, %v5944_v37 }
 0x25d   : > { %5965 = vst.msk [vmem:[%s8097_s25] sm:$0x1] %vm268_vm3, %v5963_v40  ;;  %v5967_v41 = vadd.f32 %v5966_v0, %v5953_v39 }
 0x25e   : > { %7258 = shalt.err (!%p7255_p3)
}
 0x25f   : > { %s7259_s25 = scalar_lea.hbm %s8172_s23, 16  ;;  %s7263_s6 = scalar_lea.hbm %s8261_s3, 32 }
 0x260   : > { %p7260_p7 = scmp.ne.s32.totalorder %s8172_s23, %s7259_s25  ;;  %p7264_p6 = scmp.lt.u32.totalorder %s8172_s23, %s8261_s3 }
 0x261   : > { %p7265_p8 = scmp.lt.u32.totalorder %s7263_s6, %s7259_s25  ;;  %p7267_p13 = scmp.lt.u32.totalorder %s7259_s25, %s8172_s23 }
 0x262   : > { %p7261_p11 = pnand %p7260_p7, %p7494_p10 }
 0x263   : > { %p7266_p12 = por %p7265_p8, %p7264_p6 }
 0x264   : > { %p7262_p4 = pneg %p7261_p11 }
 0x265   : > { %p7268_p0 = por %p7267_p13, %p7266_p12 }
 0x267   : > { %p7269_p5 = pnand %p7268_p0, %p7262_p4 }
 0x269   : > { %7272 = shalt.err (!%p7269_p5)
}
 0x26a   : > { %7077 = dma.vmem_to_hbm [thread:$0]  (%p7494_p10), %s8174_s7, 16, %s8172_s23, %s8185_s11   ;;  %5968 = vst.msk [vmem:[%s8103_s12] sm:$0x1] %vm268_vm3, %v5967_v41 }
 0x26b   : > { %s7273_s21 = scalar_lea.vmem %s8183_s9, 16  ;;  %s7375_s30 = smov [#allocation10]  }
 0x26c   : > { %p7274_p9 = scmp.ne.s32.totalorder %s8183_s9, %s7273_s21  ;;  %s7277_s27 = sshll.u32 %s7375_s30, 4  ;;  %s7278_s27 = int_to_ptr.vmem [resolvable:$false] %s7277_s27 }
 0x26d   : > { %s7279_s14 = scalar_lea.vmem %s7278_s27, 32  ;;  %p7280_p3 = scmp.lt.s32.totalorder %s8183_s9, %s7278_s27 }
 0x26e   : > { %p7275_p1 = pnand %p7274_p9, %p7494_p10  ;;  %p7281_p7 = scmp.lt.s32.totalorder %s7279_s14, %s7273_s21 }
 0x270   : > { %p7276_p2 = pneg %p7275_p1  ;;  %p7282_p11 = por %p7281_p7, %p7280_p3 }
 0x272   : > { %p7283_p4 = pnand %p7282_p11, %p7276_p2 }
 0x274   : > { %7286 = shalt.err (!%p7283_p4)
}
 0x275   : > { %s7287_s12 = scalar_lea.hbm %s8181_s10, 16  ;;  %s7291_s26 = scalar_lea.hbm %s8262_s4, 32 }
 0x276   : > { %p7288_p6 = scmp.ne.s32.totalorder %s8181_s10, %s7287_s12  ;;  %p7292_p13 = scmp.lt.u32.totalorder %s8181_s10, %s8262_s4 }
 0x277   : > { %p7293_p0 = scmp.lt.u32.totalorder %s7291_s26, %s7287_s12  ;;  %p7295_p9 = scmp.lt.u32.totalorder %s7287_s12, %s8181_s10 }
 0x278   : > { %p7289_p8 = pnand %p7288_p6, %p7494_p10 }
 0x279   : > { %p7294_p5 = por %p7293_p0, %p7292_p13 }
 0x27a   : > { %p7290_p12 = pneg %p7289_p8 }
 0x27b   : > { %p7296_p1 = por %p7295_p9, %p7294_p5 }
 0x27d   : > { %p7297_p2 = pnand %p7296_p1, %p7290_p12 }
 0x27f   : > { %7300 = shalt.err (!%p7297_p2)
}
 0x280   : > { %7078 = dma.vmem_to_hbm [thread:$0]  (%p7494_p10), %s8183_s9, 16, %s8181_s10, %s8185_s11  }
 0x281 PF: > { %s6034_s13 = sand.u32 1, %s7343_s15   ;;  %p8278_p3 = scmp.ne.s32.totalorder %s8268_s24, 0 }
 0x282   : > { %p8279_p7 = scmp.ge.s32.totalorder %s7363_s20, 2  ;;  %s6035_s6 = scalar_lea.sflag [#allocation4], %s6034_s13 }
 0x284   : > { %p7091_p11 = pnand %p8279_p7, %p8278_p3 }
 0x286   : > { %7334 = dma.done.wait (!%p7091_p11), %s6035_s6, 1024  }
 0x287   : > { %7336 = vsyncadd (!%p7091_p11), %s6035_s6, 4294966272  ;;  %s8280_s22 = sadd.s32 4294967294, %s7363_s20  }
 0x288   : > { %s6043_s18 = sand.u32 1, %s8280_s22  }
 0x289   : > { %s6044_s21 = scalar_lea.sflag [#allocation9], %s6043_s18 }
 0x28a   : > { %7338 = dma.done.wait (!%p7091_p11), %s6044_s21, 32  }
 0x28b   : > { %7340 = vsyncadd (!%p7091_p11), %s6044_s21, 4294967264  ;;  %s25_s20 = sadd.s32 1, %s7363_s20   ;;  %s8281_s15 = smov %s7347_s16 }
 0x28c   : > { %p22_p10 = scmp.ge.s32.totalorder %s25_s20, 4   ;;  %s8282_s16 = smov %s7351_s17 }
 0x28d   : > { %s8283_s17 = smov %s7503_s8  ;;  %s8284_s18 = smov %s7359_s19 }
 0x28e   : > { %s8285_s19 = smov %s8287_s29  ;;  %24 = sbr.rel (!%p22_p10) target bundleno = 9 (0x9), region = 137 }
 0x295   :  { %6056 = vsyncpa [#allocation3], 1 }
 0x296   :  { %6058 = vsyncpa [#allocation3 + $0x1], 1 }
 0x297   :  { %6059 = vsyncpa [#allocation6], 1 }
 0x298   :  { %6060 = vsyncpa [#allocation4], 1 }
 0x299   :  { %6062 = vsyncpa [#allocation4 + $0x1], 1 }
 0x29a   :  { %6063 = vsyncpa [#allocation9], 1 }
 0x29b   :  { %6065 = vsyncpa [#allocation9 + $0x1], 1 }

</bundles_post_ra>
